<compile_context>
chip_gen: v7x
topology: tpu7x:2x2x1
jax: 0.10.0
libtpu: 0.0.40
codegen_flags: <defaults>
</compile_context>

<pallas_src>
import functools

import numpy as np
import jax
import jax.numpy as jnp
from jax.experimental import pallas as pl
from jax.experimental.pallas import tpu as pltpu


def _round_up(x, m):
    return (x + m - 1) // m * m


def _pad2d(x, rows, cols):
    r, c = x.shape
    if (r, c) == (rows, cols):
        return x
    return jnp.pad(x, ((0, rows - r), (0, cols - c)))


# ----------------------------- Pallas kernels -----------------------------

def _fused_bn_relu_kernel(w_ref, p_ref, g_ref, b_ref, o_ref, *, m_true, eps):
    """One ConvTranspose layer: GEMM + BatchNorm(batch stats) + ReLU.

    w_ref: (Np, Kp) bf16   transposed weight matrix W^T
    p_ref: (Kp, Mp) bf16   transposed patch matrix  P^T (cols >= m_true are zero)
    g_ref, b_ref: (Np, 1) f32   BN gamma / beta
    o_ref: (Np, Mp) f32
    """
    y = jnp.dot(w_ref[...], p_ref[...], preferred_element_type=jnp.float32)
    inv_m = 1.0 / m_true
    mean = jnp.sum(y, axis=1, keepdims=True) * inv_m            # zero-padded cols add 0
    var = jnp.maximum(
        jnp.sum(y * y, axis=1, keepdims=True) * inv_m - mean * mean, 0.0)
    scale = g_ref[...] * jax.lax.rsqrt(var + eps)
    shift = b_ref[...] - mean * scale
    o_ref[...] = jnp.maximum(y * scale + shift, 0.0)


def _fused_tanh_kernel(w_ref, p_ref, o_ref):
    """Final ConvTranspose layer: GEMM + Tanh."""
    y = jnp.dot(w_ref[...], p_ref[...], preferred_element_type=jnp.float32)
    o_ref[...] = jnp.tanh(y)


def _vmem_specs(n):
    return [pl.BlockSpec(memory_space=pltpu.MemorySpace.VMEM) for _ in range(n)]


def fused_conv_bn_relu(w_t, p_t, gamma, beta, *, m_true, eps=1e-5):
    Np, _ = w_t.shape
    _, Mp = p_t.shape
    return pl.pallas_call(
        functools.partial(_fused_bn_relu_kernel, m_true=float(m_true), eps=eps),
        out_shape=jax.ShapeDtypeStruct((Np, Mp), jnp.float32),
        in_specs=_vmem_specs(4),
        out_specs=pl.BlockSpec(memory_space=pltpu.MemorySpace.VMEM),
    )(w_t, p_t, gamma, beta)


def fused_conv_tanh(w_t, p_t):
    Np, _ = w_t.shape
    _, Mp = p_t.shape
    return pl.pallas_call(
        _fused_tanh_kernel,
        out_shape=jax.ShapeDtypeStruct((Np, Mp), jnp.float32),
        in_specs=_vmem_specs(2),
        out_specs=pl.BlockSpec(memory_space=pltpu.MemorySpace.VMEM),
    )(w_t, p_t)


# -------------------- glue: channel-major im2col for ConvTranspose --------------------

def _dilate_pad_cm(x, K, stride, pad):
    """ConvTranspose2d(x, W, s, p) == Conv2d(dilate_s(x) + pad(K-1-p), flip(W)).  x: (C,B,H,W)."""
    C, B, H, W = x.shape
    Hd = (H - 1) * stride + 1
    Wd = (W - 1) * stride + 1
    if stride > 1:
        xd = jnp.zeros((C, B, Hd, Wd), x.dtype).at[:, :, ::stride, ::stride].set(x)
    else:
        xd = x
    p = K - 1 - pad
    xp = jnp.pad(xd, ((0, 0), (0, 0), (p, p), (p, p)))
    OH = Hd + 2 * p - K + 1
    OW = Wd + 2 * p - K + 1
    return xp, OH, OW


def _im2col_cm(xp, K, OH, OW):
    """(C,B,Hp,Wp) -> P^T (C*K*K, B*OH*OW); rows ordered (ci,kh,kw), cols (b,oh,ow)."""
    C, B, _, _ = xp.shape
    cols = [xp[:, :, kh:kh + OH, kw:kw + OW] for kh in range(K) for kw in range(K)]
    st = jnp.stack(cols, axis=1)                     # (C, K*K, B, OH, OW)
    return st.reshape(C * K * K, B * OH * OW)


def _wt_to_matT(wt):
    """PyTorch ConvTranspose2d weight (Cin,Cout,K,K) -> W^T (Cout, Cin*K*K), cols (ci,kh,kw)."""
    Cin, Cout, K, _ = wt.shape
    wf = jnp.flip(wt, axis=(2, 3))
    return jnp.transpose(wf, (1, 0, 2, 3)).reshape(Cout, Cin * K * K)


def conv_transpose_layer(x_cm, wt, K, stride, pad, *, gamma=None, beta=None, eps=1e-5):
    """One fused ConvTranspose(+BN+ReLU | +Tanh) layer in channel-major layout."""
    _, B, _, _ = x_cm.shape
    Cout = wt.shape[1]
    xp, OH, OW = _dilate_pad_cm(x_cm, K, stride, pad)
    p_t = _im2col_cm(xp, K, OH, OW)                  # (Kd, M)
    w_t = _wt_to_matT(wt)                            # (Cout, Kd)
    Kd, M = p_t.shape

    Np = _round_up(Cout, 8)      # sublane granule only (no 128-lane Cout padding)
    Kp = _round_up(Kd, 128)      # contraction: lanes of W^T / sublanes of P^T
    Mp = _round_up(M, 128)       # lane-dense output axis

    w_t = _pad2d(w_t.astype(jnp.bfloat16), Np, Kp)
    p_t = _pad2d(p_t.astype(jnp.bfloat16), Kp, Mp)

    if gamma is None:
        y = fused_conv_tanh(w_t, p_t)
    else:
        g = _pad2d(gamma.reshape(-1, 1).astype(jnp.float32), Np, 1)
        b = _pad2d(beta.reshape(-1, 1).astype(jnp.float32), Np, 1)
        y = fused_conv_bn_relu(w_t, p_t, g, b, m_true=M, eps=eps)

    return y[:Cout, :M].reshape(Cout, B, OH, OW)     # stays channel-major


# ------------------------------ Generator ------------------------------

def init_params(key, nz, ngf, nc, n_classes):
    ks = jax.random.split(key, 6)

    def w(k, shape):
        return (0.02 * jax.random.normal(k, shape)).astype(jnp.float32)

    return dict(
        emb=jax.random.normal(ks[0], (n_classes, n_classes), jnp.float32),
        w1=w(ks[1], (nz + n_classes, ngf * 4, 7, 7)),
        g1=jnp.ones((ngf * 4,), jnp.float32), b1=jnp.zeros((ngf * 4,), jnp.float32),
        w2=w(ks[2], (ngf * 4, ngf * 2, 4, 4)),
        g2=jnp.ones((ngf * 2,), jnp.float32), b2=jnp.zeros((ngf * 2,), jnp.float32),
        w3=w(ks[3], (ngf * 2, ngf, 4, 4)),
        g3=jnp.ones((ngf,), jnp.float32), b3=jnp.zeros((ngf,), jnp.float32),
        w4=w(ks[4], (ngf, nc, 3, 3)),
    )


@jax.jit
def generator_forward(params, noise, labels):
    B = noise.shape[0]
    emb = params["emb"][labels]                                 # embedding gather (glue)
    x = jnp.concatenate([noise.reshape(B, -1), emb], axis=1)    # (B, nz + n_classes)
    x = x.T.reshape(-1, B, 1, 1)                                # channel-major (C, B, 1, 1)
    x = conv_transpose_layer(x, params["w1"], 7, 1, 0, gamma=params["g1"], beta=params["b1"])
    x = conv_transpose_layer(x, params["w2"], 4, 2, 1, gamma=params["g2"], beta=params["b2"])
    x = conv_transpose_layer(x, params["w3"], 4, 2, 1, gamma=params["g3"], beta=params["b3"])
    x = conv_transpose_layer(x, params["w4"], 3, 1, 1)          # tanh head, (nc, B, 28, 28)
    return jnp.transpose(x, (1, 0, 2, 3))                       # back to NCHW


# --------------------------- pure-JAX reference ---------------------------

def _conv_t_ref(x, wt, stride, pad):
    _, _, K, _ = wt.shape
    w_conv = jnp.transpose(jnp.flip(wt, (2, 3)), (1, 0, 2, 3))  # (Cout, Cin, K, K)
    p = K - 1 - pad
    return jax.lax.conv_general_dilated(
        x, w_conv, window_strides=(1, 1), padding=[(p, p), (p, p)],
        lhs_dilation=(stride, stride),
        dimension_numbers=("NCHW", "OIHW", "NCHW"),
        precision=jax.lax.Precision.HIGHEST)


def _bn_ref(x, gamma, beta, eps=1e-5):
    mean = x.mean(axis=(0, 2, 3), keepdims=True)
    var = x.var(axis=(0, 2, 3), keepdims=True)
    return ((x - mean) * jax.lax.rsqrt(var + eps)
            * gamma[None, :, None, None] + beta[None, :, None, None])


def reference_forward(params, noise, labels):
    B = noise.shape[0]
    emb = params["emb"][labels]
    x = jnp.concatenate([noise.reshape(B, -1), emb], axis=1).reshape(B, -1, 1, 1)
    x = jnp.maximum(_bn_ref(_conv_t_ref(x, params["w1"], 1, 0), params["g1"], params["b1"]), 0.0)
    x = jnp.maximum(_bn_ref(_conv_t_ref(x, params["w2"], 2, 1), params["g2"], params["b2"]), 0.0)
    x = jnp.maximum(_bn_ref(_conv_t_ref(x, params["w3"], 2, 1), params["g3"], params["b3"]), 0.0)
    return jnp.tanh(_conv_t_ref(x, params["w4"], 1, 1))


# --------------------------------- main ---------------------------------

if __name__ == "__main__":
    nz, ngf, nc, n_classes, B = 16, 16, 1, 10, 2

    key = jax.random.PRNGKey(0)
    kp, kn, kl = jax.random.split(key, 3)
    params = init_params(kp, nz, ngf, nc, n_classes)
    noise = jax.random.normal(kn, (B, nz, 1, 1), jnp.float32)
    labels = jax.random.randint(kl, (B,), 0, n_classes)

    out = generator_forward(params, noise, labels)
    out = jax.block_until_ready(out)
    assert out.shape == (B, nc, 28, 28), out.shape

    ref = jax.block_until_ready(reference_forward(params, noise, labels))
    np.testing.assert_allclose(np.asarray(out), np.asarray(ref),
                               atol=3e-2, rtol=3e-2)

    print("KERNEL_OK")
</pallas_src>

<mosaic_0001>
module attributes {stable_mosaic.version = 11 : i64} {
  func.func @_fused_bn_relu_kernel(%arg0: memref<64x1280xbf16, #tpu.memory_space<vmem>>, %arg1: memref<1280x128xbf16, #tpu.memory_space<vmem>>, %arg2: memref<64x1xf32, #tpu.memory_space<vmem>>, %arg3: memref<64x1xf32, #tpu.memory_space<vmem>>, %arg4: memref<64x128xf32, #tpu.memory_space<vmem>>) attributes {dimension_semantics = [], scalar_prefetch = 0 : i64, scratch_operands = 0 : i64, tpu.core_type = #tpu.core_type<tc>} {
    %c0 = arith.constant 0 : index
    %c0_0 = arith.constant 0 : index
    %0 = vector.load %arg0[%c0, %c0_0] : memref<64x1280xbf16, #tpu.memory_space<vmem>>, vector<64x1280xbf16>
    %c0_1 = arith.constant 0 : index
    %c0_2 = arith.constant 0 : index
    %1 = vector.load %arg1[%c0_1, %c0_2] : memref<1280x128xbf16, #tpu.memory_space<vmem>>, vector<1280x128xbf16>
    %cst = arith.constant dense<0.000000e+00> : vector<64x128xf32>
    %2 = tpu.matmul %0, %1, %cst {dimension_numbers = #tpu.dot_dimension_numbers<[1], [0], [0], [1], [0, 0, 1, 1], [], []>} : vector<64x1280xbf16>, vector<1280x128xbf16>, vector<64x128xf32> -> vector<64x128xf32>
    %cst_3 = arith.constant dense<0.000000e+00> : vector<64xf32>
    %3 = vector.multi_reduction <add>, %2, %cst_3 [1] : vector<64x128xf32> to vector<64xf32>
    %4 = vector.shape_cast %3 : vector<64xf32> to vector<64x1xf32>
    %cst_4 = arith.constant 0.0102040814 : f32
    %5 = vector.broadcast %cst_4 : f32 to vector<64x1xf32>
    %6 = arith.mulf %4, %5 : vector<64x1xf32>
    %7 = arith.mulf %2, %2 : vector<64x128xf32>
    %cst_5 = arith.constant dense<0.000000e+00> : vector<64xf32>
    %8 = vector.multi_reduction <add>, %7, %cst_5 [1] : vector<64x128xf32> to vector<64xf32>
    %9 = vector.shape_cast %8 : vector<64xf32> to vector<64x1xf32>
    %cst_6 = arith.constant 0.0102040814 : f32
    %10 = vector.broadcast %cst_6 : f32 to vector<64x1xf32>
    %11 = arith.mulf %9, %10 : vector<64x1xf32>
    %12 = arith.mulf %6, %6 : vector<64x1xf32>
    %13 = arith.subf %11, %12 : vector<64x1xf32>
    %cst_7 = arith.constant 0.000000e+00 : f32
    %14 = vector.broadcast %cst_7 : f32 to vector<64x1xf32>
    %15 = arith.maximumf %13, %14 : vector<64x1xf32>
    %c0_8 = arith.constant 0 : index
    %c0_9 = arith.constant 0 : index
    %16 = vector.load %arg2[%c0_8, %c0_9] : memref<64x1xf32, #tpu.memory_space<vmem>>, vector<64x1xf32>
    %cst_10 = arith.constant 9.99999974E-6 : f32
    %17 = vector.broadcast %cst_10 : f32 to vector<64x1xf32>
    %18 = arith.addf %15, %17 : vector<64x1xf32>
    %19 = math.rsqrt %18 : vector<64x1xf32>
    %20 = arith.mulf %16, %19 : vector<64x1xf32>
    %c0_11 = arith.constant 0 : index
    %c0_12 = arith.constant 0 : index
    %21 = vector.load %arg3[%c0_11, %c0_12] : memref<64x1xf32, #tpu.memory_space<vmem>>, vector<64x1xf32>
    %22 = arith.mulf %6, %20 : vector<64x1xf32>
    %23 = arith.subf %21, %22 : vector<64x1xf32>
    %24 = vector.broadcast %20 : vector<64x1xf32> to vector<64x128xf32>
    %25 = arith.mulf %2, %24 : vector<64x128xf32>
    %26 = vector.broadcast %23 : vector<64x1xf32> to vector<64x128xf32>
    %27 = arith.addf %25, %26 : vector<64x128xf32>
    %cst_13 = arith.constant 0.000000e+00 : f32
    %28 = vector.broadcast %cst_13 : f32 to vector<64x128xf32>
    %29 = arith.maximumf %27, %28 : vector<64x128xf32>
    %c0_14 = arith.constant 0 : index
    %c0_15 = arith.constant 0 : index
    %30 = vector.load %arg4[%c0_14, %c0_15] : memref<64x128xf32, #tpu.memory_space<vmem>>, vector<64x128xf32>
    tpu.vector_store %arg4[%c0_14, %c0_15], %29 {strides = array<i32>} : memref<64x128xf32, #tpu.memory_space<vmem>>, vector<64x128xf32>,
    return
  }
}

module attributes {stable_mosaic.version = 11 : i64} {
  func.func @_fused_bn_relu_kernel(%arg0: memref<32x1024xbf16, #tpu.memory_space<vmem>>, %arg1: memref<1024x512xbf16, #tpu.memory_space<vmem>>, %arg2: memref<32x1xf32, #tpu.memory_space<vmem>>, %arg3: memref<32x1xf32, #tpu.memory_space<vmem>>, %arg4: memref<32x512xf32, #tpu.memory_space<vmem>>) attributes {dimension_semantics = [], scalar_prefetch = 0 : i64, scratch_operands = 0 : i64, tpu.core_type = #tpu.core_type<tc>} {
    %c0 = arith.constant 0 : index
    %c0_0 = arith.constant 0 : index
    %0 = vector.load %arg0[%c0, %c0_0] : memref<32x1024xbf16, #tpu.memory_space<vmem>>, vector<32x1024xbf16>
    %c0_1 = arith.constant 0 : index
    %c0_2 = arith.constant 0 : index
    %1 = vector.load %arg1[%c0_1, %c0_2] : memref<1024x512xbf16, #tpu.memory_space<vmem>>, vector<1024x512xbf16>
    %cst = arith.constant dense<0.000000e+00> : vector<32x512xf32>
    %2 = tpu.matmul %0, %1, %cst {dimension_numbers = #tpu.dot_dimension_numbers<[1], [0], [0], [1], [0, 0, 1, 1], [], []>} : vector<32x1024xbf16>, vector<1024x512xbf16>, vector<32x512xf32> -> vector<32x512xf32>
    %cst_3 = arith.constant dense<0.000000e+00> : vector<32xf32>
    %3 = vector.multi_reduction <add>, %2, %cst_3 [1] : vector<32x512xf32> to vector<32xf32>
    %4 = vector.shape_cast %3 : vector<32xf32> to vector<32x1xf32>
    %cst_4 = arith.constant 0.00255102036 : f32
    %5 = vector.broadcast %cst_4 : f32 to vector<32x1xf32>
    %6 = arith.mulf %4, %5 : vector<32x1xf32>
    %7 = arith.mulf %2, %2 : vector<32x512xf32>
    %cst_5 = arith.constant dense<0.000000e+00> : vector<32xf32>
    %8 = vector.multi_reduction <add>, %7, %cst_5 [1] : vector<32x512xf32> to vector<32xf32>
    %9 = vector.shape_cast %8 : vector<32xf32> to vector<32x1xf32>
    %cst_6 = arith.constant 0.00255102036 : f32
    %10 = vector.broadcast %cst_6 : f32 to vector<32x1xf32>
    %11 = arith.mulf %9, %10 : vector<32x1xf32>
    %12 = arith.mulf %6, %6 : vector<32x1xf32>
    %13 = arith.subf %11, %12 : vector<32x1xf32>
    %cst_7 = arith.constant 0.000000e+00 : f32
    %14 = vector.broadcast %cst_7 : f32 to vector<32x1xf32>
    %15 = arith.maximumf %13, %14 : vector<32x1xf32>
    %c0_8 = arith.constant 0 : index
    %c0_9 = arith.constant 0 : index
    %16 = vector.load %arg2[%c0_8, %c0_9] : memref<32x1xf32, #tpu.memory_space<vmem>>, vector<32x1xf32>
    %cst_10 = arith.constant 9.99999974E-6 : f32
    %17 = vector.broadcast %cst_10 : f32 to vector<32x1xf32>
    %18 = arith.addf %15, %17 : vector<32x1xf32>
    %19 = math.rsqrt %18 : vector<32x1xf32>
    %20 = arith.mulf %16, %19 : vector<32x1xf32>
    %c0_11 = arith.constant 0 : index
    %c0_12 = arith.constant 0 : index
    %21 = vector.load %arg3[%c0_11, %c0_12] : memref<32x1xf32, #tpu.memory_space<vmem>>, vector<32x1xf32>
    %22 = arith.mulf %6, %20 : vector<32x1xf32>
    %23 = arith.subf %21, %22 : vector<32x1xf32>
    %24 = vector.broadcast %20 : vector<32x1xf32> to vector<32x512xf32>
    %25 = arith.mulf %2, %24 : vector<32x512xf32>
    %26 = vector.broadcast %23 : vector<32x1xf32> to vector<32x512xf32>
    %27 = arith.addf %25, %26 : vector<32x512xf32>
    %cst_13 = arith.constant 0.000000e+00 : f32
    %28 = vector.broadcast %cst_13 : f32 to vector<32x512xf32>
    %29 = arith.maximumf %27, %28 : vector<32x512xf32>
    %c0_14 = arith.constant 0 : index
    %c0_15 = arith.constant 0 : index
    %30 = vector.load %arg4[%c0_14, %c0_15] : memref<32x512xf32, #tpu.memory_space<vmem>>, vector<32x512xf32>
    tpu.vector_store %arg4[%c0_14, %c0_15], %29 {strides = array<i32>} : memref<32x512xf32, #tpu.memory_space<vmem>>, vector<32x512xf32>,
    return
  }
}

module attributes {stable_mosaic.version = 11 : i64} {
  func.func @_fused_bn_relu_kernel(%arg0: memref<16x512xbf16, #tpu.memory_space<vmem>>, %arg1: memref<512x1664xbf16, #tpu.memory_space<vmem>>, %arg2: memref<16x1xf32, #tpu.memory_space<vmem>>, %arg3: memref<16x1xf32, #tpu.memory_space<vmem>>, %arg4: memref<16x1664xf32, #tpu.memory_space<vmem>>) attributes {dimension_semantics = [], scalar_prefetch = 0 : i64, scratch_operands = 0 : i64, tpu.core_type = #tpu.core_type<tc>} {
    %c0 = arith.constant 0 : index
    %c0_0 = arith.constant 0 : index
    %0 = vector.load %arg0[%c0, %c0_0] : memref<16x512xbf16, #tpu.memory_space<vmem>>, vector<16x512xbf16>
    %c0_1 = arith.constant 0 : index
    %c0_2 = arith.constant 0 : index
    %1 = vector.load %arg1[%c0_1, %c0_2] : memref<512x1664xbf16, #tpu.memory_space<vmem>>, vector<512x1664xbf16>
    %cst = arith.constant dense<0.000000e+00> : vector<16x1664xf32>
    %2 = tpu.matmul %0, %1, %cst {dimension_numbers = #tpu.dot_dimension_numbers<[1], [0], [0], [1], [0, 0, 1, 1], [], []>} : vector<16x512xbf16>, vector<512x1664xbf16>, vector<16x1664xf32> -> vector<16x1664xf32>
    %cst_3 = arith.constant dense<0.000000e+00> : vector<16xf32>
    %3 = vector.multi_reduction <add>, %2, %cst_3 [1] : vector<16x1664xf32> to vector<16xf32>
    %4 = vector.shape_cast %3 : vector<16xf32> to vector<16x1xf32>
    %cst_4 = arith.constant 6.37755089E-4 : f32
    %5 = vector.broadcast %cst_4 : f32 to vector<16x1xf32>
    %6 = arith.mulf %4, %5 : vector<16x1xf32>
    %7 = arith.mulf %2, %2 : vector<16x1664xf32>
    %cst_5 = arith.constant dense<0.000000e+00> : vector<16xf32>
    %8 = vector.multi_reduction <add>, %7, %cst_5 [1] : vector<16x1664xf32> to vector<16xf32>
    %9 = vector.shape_cast %8 : vector<16xf32> to vector<16x1xf32>
    %cst_6 = arith.constant 6.37755089E-4 : f32
    %10 = vector.broadcast %cst_6 : f32 to vector<16x1xf32>
    %11 = arith.mulf %9, %10 : vector<16x1xf32>
    %12 = arith.mulf %6, %6 : vector<16x1xf32>
    %13 = arith.subf %11, %12 : vector<16x1xf32>
    %cst_7 = arith.constant 0.000000e+00 : f32
    %14 = vector.broadcast %cst_7 : f32 to vector<16x1xf32>
    %15 = arith.maximumf %13, %14 : vector<16x1xf32>
    %c0_8 = arith.constant 0 : index
    %c0_9 = arith.constant 0 : index
    %16 = vector.load %arg2[%c0_8, %c0_9] : memref<16x1xf32, #tpu.memory_space<vmem>>, vector<16x1xf32>
    %cst_10 = arith.constant 9.99999974E-6 : f32
    %17 = vector.broadcast %cst_10 : f32 to vector<16x1xf32>
    %18 = arith.addf %15, %17 : vector<16x1xf32>
    %19 = math.rsqrt %18 : vector<16x1xf32>
    %20 = arith.mulf %16, %19 : vector<16x1xf32>
    %c0_11 = arith.constant 0 : index
    %c0_12 = arith.constant 0 : index
    %21 = vector.load %arg3[%c0_11, %c0_12] : memref<16x1xf32, #tpu.memory_space<vmem>>, vector<16x1xf32>
    %22 = arith.mulf %6, %20 : vector<16x1xf32>
    %23 = arith.subf %21, %22 : vector<16x1xf32>
    %24 = vector.broadcast %20 : vector<16x1xf32> to vector<16x1664xf32>
    %25 = arith.mulf %2, %24 : vector<16x1664xf32>
    %26 = vector.broadcast %23 : vector<16x1xf32> to vector<16x1664xf32>
    %27 = arith.addf %25, %26 : vector<16x1664xf32>
    %cst_13 = arith.constant 0.000000e+00 : f32
    %28 = vector.broadcast %cst_13 : f32 to vector<16x1664xf32>
    %29 = arith.maximumf %27, %28 : vector<16x1664xf32>
    %c0_14 = arith.constant 0 : index
    %c0_15 = arith.constant 0 : index
    %30 = vector.load %arg4[%c0_14, %c0_15] : memref<16x1664xf32, #tpu.memory_space<vmem>>, vector<16x1664xf32>
    tpu.vector_store %arg4[%c0_14, %c0_15], %29 {strides = array<i32>} : memref<16x1664xf32, #tpu.memory_space<vmem>>, vector<16x1664xf32>,
    return
  }
}

module attributes {stable_mosaic.version = 11 : i64} {
  func.func @_fused_tanh_kernel(%arg0: memref<8x256xbf16, #tpu.memory_space<vmem>>, %arg1: memref<256x1664xbf16, #tpu.memory_space<vmem>>, %arg2: memref<8x1664xf32, #tpu.memory_space<vmem>>) attributes {dimension_semantics = [], scalar_prefetch = 0 : i64, scratch_operands = 0 : i64, tpu.core_type = #tpu.core_type<tc>} {
    %c0 = arith.constant 0 : index
    %c0_0 = arith.constant 0 : index
    %0 = vector.load %arg0[%c0, %c0_0] : memref<8x256xbf16, #tpu.memory_space<vmem>>, vector<8x256xbf16>
    %c0_1 = arith.constant 0 : index
    %c0_2 = arith.constant 0 : index
    %1 = vector.load %arg1[%c0_1, %c0_2] : memref<256x1664xbf16, #tpu.memory_space<vmem>>, vector<256x1664xbf16>
    %cst = arith.constant dense<0.000000e+00> : vector<8x1664xf32>
    %2 = tpu.matmul %0, %1, %cst {dimension_numbers = #tpu.dot_dimension_numbers<[1], [0], [0], [1], [0, 0, 1, 1], [], []>} : vector<8x256xbf16>, vector<256x1664xbf16>, vector<8x1664xf32> -> vector<8x1664xf32>
    %3 = math.tanh %2 : vector<8x1664xf32>
    %c0_3 = arith.constant 0 : index
    %c0_4 = arith.constant 0 : index
    %4 = vector.load %arg2[%c0_3, %c0_4] : memref<8x1664xf32, #tpu.memory_space<vmem>>, vector<8x1664xf32>
    tpu.vector_store %arg2[%c0_3, %c0_4], %3 {strides = array<i32>} : memref<8x1664xf32, #tpu.memory_space<vmem>>, vector<8x1664xf32>,
    return
  }
}

</mosaic_0001>

<bundles_post_ra>
// kernel: generator_forward.4
= control target key start
LH: loop header
LB: loop body
LE: loop exit
PB: predicated region body
PF: predicated region fallthrough
CT: control target
= control target key end

     0   :  { %s2520_s1 = inlined_call_operand.vmem [shape: bf16[1280,128], index: 1, kind: input, shape index: {}]   ;;  %s2521_s0 = inlined_call_operand.vmem [shape: bf16[64,1280], index: 0, kind: input, shape index: {}]   ;;  %s2522_s2 = inlined_call_operand.vmem [shape: f32[64,1], index: 2, kind: input, shape index: {}]   ;;  %s2523_s3 = inlined_call_operand.vmem [shape: f32[64,1], index: 3, kind: input, shape index: {}]   ;;  %s2524_s4 = inlined_call_operand.vmem [shape: f32[64,128], index: 4, kind: output, shape index: {}]  }
   0x1   :  { %v1814_v0 = vld [vmem:[%s2520_s1 + $0x40] sm:$0xff]   ;;  %v1818_v4 = vld [vmem:[%s2520_s1 + $0x48] sm:$0xff]   ;;  %v1822_v8 = vld [vmem:[%s2520_s1 + $0x50] sm:$0xff]  }
   0x2   :  { %v1815_v1 = vld [vmem:[%s2520_s1 + $0xc0] sm:$0xff]   ;;  %1595 = vmatprep.subr.bf16.mxu0 %v1814_v0  ;;  %v1819_v5 = vld [vmem:[%s2520_s1 + $0xc8] sm:$0xff]   ;;  %v1823_v9 = vld [vmem:[%s2520_s1 + $0xd0] sm:$0xff]  }
   0x3   :  { %v1816_v2 = vld [vmem:[%s2520_s1] sm:$0xff]   ;;  %1635 = vmatprep.subr.bf16.mxu1 %v1815_v1  ;;  %v1820_v6 = vld [vmem:[%s2520_s1 + $0x8] sm:$0xff]   ;;  %v1824_v10 = vld [vmem:[%s2520_s1 + $0x10] sm:$0xff]  }
   0x4   :  { %v1817_v3 = vld [vmem:[%s2520_s1 + $0x80] sm:$0xff]   ;;  %1596 = vmatpush3.bf16.msra.mxu0 %v1816_v2  ;;  %v1821_v7 = vld [vmem:[%s2520_s1 + $0x88] sm:$0xff]   ;;  %v1825_v11 = vld [vmem:[%s2520_s1 + $0x90] sm:$0xff]  }
   0x5   :  { %1636 = vmatpush3.bf16.msra.mxu1 %v1817_v3  ;;  %1597 = vmatprep.subr.bf16.mxu0 %v1818_v4  ;;  %v1826_v12 = vld [vmem:[%s2520_s1 + $0x58] sm:$0xff]   ;;  %v1830_v16 = vld [vmem:[%s2520_s1 + $0x60] sm:$0xff]   ;;  %v1834_v20 = vld [vmem:[%s2520_s1 + $0x68] sm:$0xff]  }
   0x6   :  { %1637 = vmatprep.subr.bf16.mxu1 %v1819_v5  ;;  %v1827_v13 = vld [vmem:[%s2520_s1 + $0xd8] sm:$0xff]   ;;  %v1831_v17 = vld [vmem:[%s2520_s1 + $0xe0] sm:$0xff]   ;;  %v1835_v21 = vld [vmem:[%s2520_s1 + $0xe8] sm:$0xff]  }
   0x7   :  { %v1828_v14 = vld [vmem:[%s2520_s1 + $0x18] sm:$0xff]   ;;  %v1832_v18 = vld [vmem:[%s2520_s1 + $0x20] sm:$0xff]   ;;  %v1836_v22 = vld [vmem:[%s2520_s1 + $0x28] sm:$0xff]  }
   0x8   :  { %1598 = vmatpush3.bf16.msra.mxu0 %v1820_v6  ;;  %v1829_v15 = vld [vmem:[%s2520_s1 + $0x98] sm:$0xff]   ;;  %v1833_v19 = vld [vmem:[%s2520_s1 + $0xa0] sm:$0xff]   ;;  %v1837_v23 = vld [vmem:[%s2520_s1 + $0xa8] sm:$0xff]  }
   0x9   :  { %1638 = vmatpush3.bf16.msra.mxu1 %v1821_v7  ;;  %1599 = vmatprep.subr.bf16.mxu0 %v1822_v8  ;;  %v1838_v24 = vld [vmem:[%s2520_s1 + $0x70] sm:$0xff]   ;;  %v1842_v28 = vld [vmem:[%s2520_s1 + $0x78] sm:$0xff]   ;;  %v1846_v32 = vld [vmem:[%s2521_s0] ss:$40 sps:$4 sm:$0xff]  }
   0xa   :  { %1639 = vmatprep.subr.bf16.mxu1 %v1823_v9  ;;  %v1839_v25 = vld [vmem:[%s2520_s1 + $0xf0] sm:$0xff]   ;;  %v1843_v29 = vld [vmem:[%s2520_s1 + $0xf8] sm:$0xff]   ;;  %v1848_v33 = vld [vmem:[%s2521_s0 + $0x4] ss:$40 sps:$4 sm:$0xff]  }
   0xb   :  { %v1840_v26 = vld [vmem:[%s2520_s1 + $0x30] sm:$0xff]   ;;  %v1844_v30 = vld [vmem:[%s2520_s1 + $0x38] sm:$0xff]   ;;  %930 = vmatprep.mubr.bf16.mxu0 %v1848_v33  ;;  %v1852_v36 = vld [vmem:[%s2520_s1 + $0x140] sm:$0xff]  }
   0xc   :  { %1600 = vmatpush3.bf16.msra.mxu0 %v1824_v10  ;;  %v1841_v27 = vld [vmem:[%s2520_s1 + $0xb0] sm:$0xff]   ;;  %v1845_v31 = vld [vmem:[%s2520_s1 + $0xb8] sm:$0xff]   ;;  %v1853_v37 = vld [vmem:[%s2520_s1 + $0x1c0] sm:$0xff]  }
   0xd   :  { %1640 = vmatpush3.bf16.msra.mxu1 %v1825_v11  ;;  %1601 = vmatprep.subr.bf16.mxu0 %v1826_v12  ;;  %v1849_v34 = vld [vmem:[%s2521_s0 + $0x8] ss:$40 sps:$4 sm:$0xff]   ;;  %v1851_v35 = vld [vmem:[%s2521_s0 + $0xc] ss:$40 sps:$4 sm:$0xff]   ;;  %v1854_v38 = vld [vmem:[%s2520_s1 + $0x100] sm:$0xff]  }
   0xe   :  { %1641 = vmatprep.subr.bf16.mxu1 %v1827_v13  ;;  %995 = vmatprep.mubr.bf16.mxu1 %v1851_v35  ;;  %v1855_v39 = vld [vmem:[%s2520_s1 + $0x180] sm:$0xff]   ;;  %v1856_v40 = vld [vmem:[%s2520_s1 + $0x148] sm:$0xff]   ;;  %v1860_v44 = vld [vmem:[%s2521_s0 + $0x54] ss:$40 sps:$4 sm:$0xff]  }
   0xf   :  { %v1857_v41 = vld [vmem:[%s2520_s1 + $0x1c8] sm:$0xff]   ;;  %v1862_v45 = vld [vmem:[%s2521_s0 + $0x5c] ss:$40 sps:$4 sm:$0xff]   ;;  %v1864_v46 = vld [vmem:[%s2521_s0 + $0x50] ss:$40 sps:$4 sm:$0xff]  }
  0x10   :  { %1602 = vmatpush3.bf16.msra.mxu0 %v1828_v14  ;;  %v1858_v42 = vld [vmem:[%s2520_s1 + $0x108] sm:$0xff]   ;;  %v1865_v47 = vld [vmem:[%s2521_s0 + $0x58] ss:$40 sps:$4 sm:$0xff]   ;;  %v1866_v48 = vld [vmem:[%s2520_s1 + $0x150] sm:$0xff]  }
  0x11   :  { %1642 = vmatpush3.bf16.msra.mxu1 %v1829_v15  ;;  %1603 = vmatprep.subr.bf16.mxu0 %v1830_v16  ;;  %v1859_v43 = vld [vmem:[%s2520_s1 + $0x188] sm:$0xff]   ;;  %v1867_v49 = vld [vmem:[%s2520_s1 + $0x1d0] sm:$0xff]   ;;  %v1870_v52 = vld [vmem:[%s2520_s1 + $0x158] sm:$0xff]  }
  0x12   :  { %1643 = vmatprep.subr.bf16.mxu1 %v1831_v17  ;;  %v1868_v50 = vld [vmem:[%s2520_s1 + $0x110] sm:$0xff]   ;;  %v1871_v53 = vld [vmem:[%s2520_s1 + $0x1d8] sm:$0xff]   ;;  %v1874_v56 = vld [vmem:[%s2521_s0 + $0xa4] ss:$40 sps:$4 sm:$0xff]  }
  0x13   :  { %v1869_v51 = vld [vmem:[%s2520_s1 + $0x190] sm:$0xff]   ;;  %v1872_v54 = vld [vmem:[%s2520_s1 + $0x118] sm:$0xff]   ;;  %v1878_v58 = vld [vmem:[%s2521_s0 + $0xa0] ss:$40 sps:$4 sm:$0xff]  }
  0x14   :  { %1604 = vmatpush3.bf16.msra.mxu0 %v1832_v18  ;;  %v1873_v55 = vld [vmem:[%s2520_s1 + $0x198] sm:$0xff]   ;;  %v1876_v57 = vld [vmem:[%s2521_s0 + $0xac] ss:$40 sps:$4 sm:$0xff]   ;;  %v1879_v59 = vld [vmem:[%s2521_s0 + $0xa8] ss:$40 sps:$4 sm:$0xff]  }
  0x15   :  { %1644 = vmatpush3.bf16.msra.mxu1 %v1833_v19  ;;  %1605 = vmatprep.subr.bf16.mxu0 %v1834_v20  ;;  %v1880_v60 = vld [vmem:[%s2520_s1 + $0x160] sm:$0xff]   ;;  %v1884_v0 = vld [vmem:[%s2520_s1 + $0x168] sm:$0xff]   ;;  %v1888_v4 = vld [vmem:[%s2521_s0 + $0xf4] ss:$40 sps:$4 sm:$0xff]  }
  0x16   :  { %1645 = vmatprep.subr.bf16.mxu1 %v1835_v21  ;;  %v1881_v61 = vld [vmem:[%s2520_s1 + $0x1e0] sm:$0xff]   ;;  %v1885_v1 = vld [vmem:[%s2520_s1 + $0x1e8] sm:$0xff]   ;;  %v1892_v6 = vld [vmem:[%s2521_s0 + $0xf0] ss:$40 sps:$4 sm:$0xff]  }
  0x17   :  { %v1882_v62 = vld [vmem:[%s2520_s1 + $0x120] sm:$0xff]   ;;  %v1886_v2 = vld [vmem:[%s2520_s1 + $0x128] sm:$0xff]   ;;  %v1894_v8 = vld [vmem:[%s2520_s1 + $0x170] sm:$0xff]  }
  0x18   :  { %1606 = vmatpush3.bf16.msra.mxu0 %v1836_v22  ;;  %v1883_v63 = vld [vmem:[%s2520_s1 + $0x1a0] sm:$0xff]   ;;  %v1887_v3 = vld [vmem:[%s2520_s1 + $0x1a8] sm:$0xff]   ;;  %v1895_v9 = vld [vmem:[%s2520_s1 + $0x1f0] sm:$0xff]  }
  0x19   :  { %1646 = vmatpush3.bf16.msra.mxu1 %v1837_v23  ;;  %1607 = vmatprep.subr.bf16.mxu0 %v1838_v24  ;;  %v1890_v5 = vld [vmem:[%s2521_s0 + $0xfc] ss:$40 sps:$4 sm:$0xff]   ;;  %v1893_v7 = vld [vmem:[%s2521_s0 + $0xf8] ss:$40 sps:$4 sm:$0xff]   ;;  %v1896_v10 = vld [vmem:[%s2520_s1 + $0x130] sm:$0xff]  }
  0x1a   :  { %1647 = vmatprep.subr.bf16.mxu1 %v1839_v25  ;;  %v1897_v11 = vld [vmem:[%s2520_s1 + $0x1b0] sm:$0xff]   ;;  %v1898_v12 = vld [vmem:[%s2520_s1 + $0x178] sm:$0xff]   ;;  %v1908_v20 = vld [vmem:[%s2520_s1 + $0x240] sm:$0xff]  }
  0x1b   :  { %v1899_v13 = vld [vmem:[%s2520_s1 + $0x1f8] sm:$0xff]   ;;  %v1909_v21 = vld [vmem:[%s2520_s1 + $0x200] sm:$0xff]   ;;  %v1910_v22 = vld [vmem:[%s2520_s1 + $0x248] sm:$0xff]  }
  0x1c   :  { %1608 = vmatpush3.bf16.msra.mxu0 %v1840_v26  ;;  %v1900_v14 = vld [vmem:[%s2520_s1 + $0x138] sm:$0xff]   ;;  %v1911_v23 = vld [vmem:[%s2520_s1 + $0x208] sm:$0xff]   ;;  %v1928_v35 = vld [vmem:[%s2520_s1 + $0x260] sm:$0xff]  }
  0x1d   :  { %1648 = vmatpush3.bf16.msra.mxu1 %v1841_v27  ;;  %1609 = vmatprep.subr.bf16.mxu0 %v1842_v28  ;;  %v1901_v15 = vld [vmem:[%s2520_s1 + $0x1b8] sm:$0xff]   ;;  %v1912_v24 = vld [vmem:[%s2521_s0 + $0x64] ss:$40 sps:$4 sm:$0xff]   ;;  %v1916_v26 = vld [vmem:[%s2521_s0 + $0x60] ss:$40 sps:$4 sm:$0xff]  }
  0x1e   :  { %1649 = vmatprep.subr.bf16.mxu1 %v1843_v29  ;;  %v1902_v16 = vld [vmem:[%s2521_s0 + $0x10] ss:$40 sps:$4 sm:$0xff]   ;;  %v1904_v17 = vld [vmem:[%s2521_s0 + $0x14] ss:$40 sps:$4 sm:$0xff]  }
  0x1f   :  { %v1905_v18 = vld [vmem:[%s2521_s0 + $0x18] ss:$40 sps:$4 sm:$0xff]   ;;  %v1907_v19 = vld [vmem:[%s2521_s0 + $0x1c] ss:$40 sps:$4 sm:$0xff]   ;;  %v1914_v25 = vld [vmem:[%s2521_s0 + $0x6c] ss:$40 sps:$4 sm:$0xff]  }
  0x20   :  { %1610 = vmatpush3.bf16.msra.mxu0 %v1844_v30  ;;  %v1917_v27 = vld [vmem:[%s2521_s0 + $0x68] ss:$40 sps:$4 sm:$0xff]   ;;  %v1920_v30 = vld [vmem:[%s2520_s1 + $0x258] sm:$0xff]  }
  0x21   :  { %1650 = vmatpush3.bf16.msra.mxu1 %v1845_v31  ;;  %1675 = vmatprep.subr.bf16.mxu0 %v1852_v36  ;;  %v1918_v28 = vld [vmem:[%s2520_s1 + $0x250] sm:$0xff]   ;;  %v1921_v31 = vld [vmem:[%s2520_s1 + $0x218] sm:$0xff]  }
  0x22   :  { %1715 = vmatprep.subr.bf16.mxu1 %v1853_v37  ;;  %v1919_v29 = vld [vmem:[%s2520_s1 + $0x210] sm:$0xff]   ;;  %v1924_v33 = vld [vmem:[%s2521_s0 + $0xbc] ss:$40 sps:$4 sm:$0xff]   ;;  %v1927_v36 = vld [vmem:[%s2521_s0 + $0xb8] ss:$40 sps:$4 sm:$0xff]  }
  0x23   :  { %931 = vmatmul.mubr.bf16.vlgmr.msra.gmra.mrb[0].mxu0 %v1846_v32  ;;  %v1922_v32 = vld [vmem:[%s2521_s0 + $0xb4] ss:$40 sps:$4 sm:$0xff]   ;;  %v1929_v37 = vld [vmem:[%s2520_s1 + $0x220] sm:$0xff]  }
  0x24   :  { %996 = vmatmul.mubr.bf16.vlgmr.msra.gmra.mrb[0].mxu1 %v1849_v34  ;;  %1676 = vmatpush3.bf16.msra.mxu0 %v1854_v38  ;;  %v1926_v34 = vld [vmem:[%s2521_s0 + $0xb0] ss:$40 sps:$4 sm:$0xff]   ;;  %v1930_v38 = vld [vmem:[%s2520_s1 + $0x268] sm:$0xff]  }
  0x25   :  { %1716 = vmatpush3.bf16.msra.mxu1 %v1855_v39  ;;  %1677 = vmatprep.subr.bf16.mxu0 %v1856_v40  ;;  %v1932_v39 = vld [vmem:[%s2521_s0 + $0x104] ss:$40 sps:$4 sm:$0xff]  }
  0x26   :  { %1717 = vmatprep.subr.bf16.mxu1 %v1857_v41  ;;  %938 = vmatprep.mubr.bf16.mxu0 %v1860_v44  ;;  %v1934_v40 = vld [vmem:[%s2521_s0 + $0x10c] ss:$40 sps:$4 sm:$0xff]   ;;  %v1937_v44 = vld [vmem:[%s2521_s0 + $0x108] ss:$40 sps:$4 sm:$0xff]  }
  0x27   :  { %1003 = vmatprep.mubr.bf16.mxu1 %v1862_v45  ;;  %v1931_v41 = vld [vmem:[%s2520_s1 + $0x228] sm:$0xff]   ;;  %v1939_v45 = vld [vmem:[%s2520_s1 + $0x230] sm:$0xff]  }
  0x28   :  { %1678 = vmatpush3.bf16.msra.mxu0 %v1858_v42  ;;  %v1936_v42 = vld [vmem:[%s2521_s0 + $0x100] ss:$40 sps:$4 sm:$0xff]  }
  0x29   :  { %1718 = vmatpush3.bf16.msra.mxu1 %v1859_v43  ;;  %1679 = vmatprep.subr.bf16.mxu0 %v1866_v48  ;;  %v1938_v43 = vld [vmem:[%s2520_s1 + $0x270] sm:$0xff]   ;;  %v1947_v48 = vld [vmem:[%s2521_s0 + $0xc4] ss:$40 sps:$4 sm:$0xff]  }
  0x2a   :  { %1719 = vmatprep.subr.bf16.mxu1 %v1867_v49  ;;  %v1941_v49 = vld [vmem:[%s2520_s1 + $0x238] sm:$0xff]  }
  0x2b   :  { %939 = vmatmul.mubr.bf16.gmra.mrb[4].mxu0 %v1864_v46  ;;  %v1940_v46 = vld [vmem:[%s2520_s1 + $0x278] sm:$0xff]  }
  0x2c   :  { %1004 = vmatmul.mubr.bf16.gmra.mrb[4].mxu1 %v1865_v47  ;;  %1680 = vmatpush3.bf16.msra.mxu0 %v1868_v50  ;;  %v1944_v47 = vld [vmem:[%s2521_s0 + $0x24] ss:$40 sps:$4 sm:$0xff]   ;;  %v1942_v50 = vld [vmem:[%s2521_s0 + $0x20] ss:$40 sps:$4 sm:$0xff]  }
  0x2d   :  { %1720 = vmatpush3.bf16.msra.mxu1 %v1869_v51  ;;  %1681 = vmatprep.subr.bf16.mxu0 %v1870_v52  ;;  %v1945_v51 = vld [vmem:[%s2521_s0 + $0xc0] ss:$40 sps:$4 sm:$0xff]   ;;  %v1948_v52 = vld [vmem:[%s2521_s0 + $0x74] ss:$40 sps:$4 sm:$0xff]  }
  0x2e   :  { %1721 = vmatprep.subr.bf16.mxu1 %v1871_v53  ;;  %946 = vmatprep.mubr.bf16.mxu0 %v1874_v56  ;;  %v1950_v53 = vld [vmem:[%s2521_s0 + $0x114] ss:$40 sps:$4 sm:$0xff]  }
  0x2f   :  { %1011 = vmatprep.mubr.bf16.mxu1 %v1876_v57 }
  0x30   :  { %1682 = vmatpush3.bf16.msra.mxu0 %v1872_v54  ;;  %v1952_v54 = vld [vmem:[%s2521_s0 + $0x70] ss:$40 sps:$4 sm:$0xff]  }
  0x31   :  { %1722 = vmatpush3.bf16.msra.mxu1 %v1873_v55  ;;  %1683 = vmatprep.subr.bf16.mxu0 %v1880_v60  ;;  %v1953_v55 = vld [vmem:[%s2521_s0 + $0x110] ss:$40 sps:$4 sm:$0xff]  }
  0x32   :  { %1723 = vmatprep.subr.bf16.mxu1 %v1881_v61 }
  0x33   :  { %947 = vmatmul.mubr.bf16.gmra.mrb[8].mxu0 %v1878_v58 }
  0x34   :  { %1012 = vmatmul.mubr.bf16.gmra.mrb[8].mxu1 %v1879_v59  ;;  %1684 = vmatpush3.bf16.msra.mxu0 %v1882_v62 }
  0x35   :  { %1724 = vmatpush3.bf16.msra.mxu1 %v1883_v63  ;;  %1685 = vmatprep.subr.bf16.mxu0 %v1884_v0 }
  0x36   :  { %1725 = vmatprep.subr.bf16.mxu1 %v1885_v1  ;;  %954 = vmatprep.mubr.bf16.mxu0 %v1888_v4 }
  0x37   :  { %1019 = vmatprep.mubr.bf16.mxu1 %v1890_v5 }
  0x38   :  { %1686 = vmatpush3.bf16.msra.mxu0 %v1886_v2 }
  0x39   :  { %1726 = vmatpush3.bf16.msra.mxu1 %v1887_v3  ;;  %1687 = vmatprep.subr.bf16.mxu0 %v1894_v8 }
  0x3a   :  { %1727 = vmatprep.subr.bf16.mxu1 %v1895_v9 }
  0x3b   :  { %955 = vmatmul.mubr.bf16.gmra.mrb[12].mxu0 %v1892_v6 }
  0x3c   :  { %1020 = vmatmul.mubr.bf16.gmra.mrb[12].mxu1 %v1893_v7  ;;  %1688 = vmatpush3.bf16.msra.mxu0 %v1896_v10 }
  0x3d   :  { %1728 = vmatpush3.bf16.msra.mxu1 %v1897_v11  ;;  %1689 = vmatprep.subr.bf16.mxu0 %v1898_v12 }
  0x3e   :  { %1729 = vmatprep.subr.bf16.mxu1 %v1899_v13  ;;  %1060 = vmatprep.mubr.bf16.mxu0 %v1904_v17 }
  0x3f   :  { %1125 = vmatprep.mubr.bf16.mxu1 %v1907_v19 }
  0x40   :  { %1690 = vmatpush3.bf16.msra.mxu0 %v1900_v14 }
  0x41   :  { %1730 = vmatpush3.bf16.msra.mxu1 %v1901_v15  ;;  %1755 = vmatprep.subr.bf16.mxu0 %v1908_v20 }
  0x42   :  { %1795 = vmatprep.subr.bf16.mxu1 %v1908_v20 }
  0x43   :  { %1061 = vmatmul.mubr.bf16.vlgmr.msra.gmra.mrb[16].mxu0 %v1902_v16 }
  0x44   :  { %1126 = vmatmul.mubr.bf16.vlgmr.msra.gmra.mrb[16].mxu1 %v1905_v18  ;;  %1756 = vmatpush3.bf16.msra.mxu0 %v1909_v21 }
  0x45   :  { %1803 = vmatpush3.bf16.msra.mxu1 %v1909_v21  ;;  %1757 = vmatprep.subr.bf16.mxu0 %v1910_v22 }
  0x46   :  { %1796 = vmatprep.subr.bf16.mxu1 %v1910_v22  ;;  %1068 = vmatprep.mubr.bf16.mxu0 %v1912_v24 }
  0x47   :  { %1133 = vmatprep.mubr.bf16.mxu1 %v1914_v25 }
  0x48   :  { %1758 = vmatpush3.bf16.msra.mxu0 %v1911_v23 }
  0x49   :  { %1804 = vmatpush3.bf16.msra.mxu1 %v1911_v23  ;;  %1759 = vmatprep.subr.bf16.mxu0 %v1918_v28 }
  0x4a   :  { %1797 = vmatprep.subr.bf16.mxu1 %v1918_v28 }
  0x4b   :  { %1069 = vmatmul.mubr.bf16.gmra.mrb[20].mxu0 %v1916_v26 }
  0x4c   :  { %1134 = vmatmul.mubr.bf16.gmra.mrb[20].mxu1 %v1917_v27  ;;  %1760 = vmatpush3.bf16.msra.mxu0 %v1919_v29 }
  0x4d   :  { %1805 = vmatpush3.bf16.msra.mxu1 %v1919_v29  ;;  %1761 = vmatprep.subr.bf16.mxu0 %v1920_v30 }
  0x4e   :  { %1798 = vmatprep.subr.bf16.mxu1 %v1920_v30  ;;  %1076 = vmatprep.mubr.bf16.mxu0 %v1922_v32 }
  0x4f   :  { %1141 = vmatprep.mubr.bf16.mxu1 %v1924_v33 }
  0x50   :  { %1762 = vmatpush3.bf16.msra.mxu0 %v1921_v31 }
  0x51   :  { %1806 = vmatpush3.bf16.msra.mxu1 %v1921_v31  ;;  %1763 = vmatprep.subr.bf16.mxu0 %v1928_v35 }
  0x52   :  { %1799 = vmatprep.subr.bf16.mxu1 %v1928_v35 }
  0x53   :  { %1077 = vmatmul.mubr.bf16.gmra.mrb[24].mxu0 %v1926_v34 }
  0x54   :  { %1142 = vmatmul.mubr.bf16.gmra.mrb[24].mxu1 %v1927_v36  ;;  %1764 = vmatpush3.bf16.msra.mxu0 %v1929_v37 }
  0x55   :  { %1084 = vmatprep.mubr.bf16.mxu0 %v1932_v39  ;;  %1807 = vmatpush3.bf16.msra.mxu1 %v1929_v37 }
  0x56   :  { %1765 = vmatprep.subr.bf16.mxu0 %v1930_v38  ;;  %1800 = vmatprep.subr.bf16.mxu1 %v1930_v38 }
  0x57   :  { %1149 = vmatprep.mubr.bf16.mxu1 %v1934_v40 }
  0x58   :  { %1766 = vmatpush3.bf16.msra.mxu0 %v1931_v41 }
  0x59   :  { %1808 = vmatpush3.bf16.msra.mxu1 %v1931_v41  ;;  %1767 = vmatprep.subr.bf16.mxu0 %v1938_v43 }
  0x5a   :  { %1801 = vmatprep.subr.bf16.mxu1 %v1938_v43 }
  0x5b   :  { %1085 = vmatmul.mubr.bf16.gmra.mrb[28].mxu0 %v1936_v42 }
  0x5c   :  { %1150 = vmatmul.mubr.bf16.gmra.mrb[28].mxu1 %v1937_v44  ;;  %1190 = vmatprep.mubr.bf16.mxu0 %v1944_v47 }
  0x5d   :  { %1768 = vmatpush3.bf16.msra.mxu0 %v1939_v45  ;;  %1206 = vmatprep.mubr.bf16.mxu1 %v1947_v48 }
  0x5e   :  { %1809 = vmatpush3.bf16.msra.mxu1 %v1939_v45  ;;  %1769 = vmatprep.subr.bf16.mxu0 %v1940_v46 }
  0x5f   :  { %1802 = vmatprep.subr.bf16.mxu1 %v1940_v46 }
  0x61   :  { %1770 = vmatpush3.bf16.msra.mxu0 %v1941_v49 }
  0x62   :  { %1810 = vmatpush3.bf16.msra.mxu1 %v1941_v49 }
  0x64   :  { %1191 = vmatmul.mubr.bf16.vlgmr.msra.gmra.mrb[32].mxu0 %v1942_v50 }
  0x65   :  { %1207 = vmatmul.mubr.bf16.vlgmr.msra.gmra.mrb[32].mxu1 %v1945_v51  ;;  %1198 = vmatprep.mubr.bf16.mxu0 %v1948_v52 }
  0x66   :  { %1214 = vmatprep.mubr.bf16.mxu1 %v1950_v53 }
  0x6c   :  { %1199 = vmatmul.mubr.bf16.gmra.mrb[36].mxu0 %v1952_v54 }
  0x6d   :  { %1215 = vmatmul.mubr.bf16.gmra.mrb[36].mxu1 %v1953_v55 }
  0xf6   :  { %v1611_v56 = vpop.f32.mrb[0].mxu0 }
  0xf7   :  { %v1651_v57 = vpop.f32.mrb[0].mxu1  ;;  %v1612_v58 = vpop.f32.mrb[1].mxu0 }
  0xf8   :  { %v1613_v59 = vadd.f32 %v1612_v58, %v1611_v56  ;;  %v1652_v60 = vpop.f32.mrb[1].mxu1  ;;  %v1614_v61 = vpop.f32.mrb[2].mxu0 }
  0xf9   :  { %v1653_v62 = vadd.f32 %v1652_v60, %v1651_v57  ;;  %v1654_v63 = vpop.f32.mrb[2].mxu1  ;;  %v1615_v0 = vpop.f32.mrb[3].mxu0 }
  0xfa   :  { %v1616_v1 = vadd.f32 %v1615_v0, %v1614_v61  ;;  %v1655_v2 = vpop.f32.mrb[3].mxu1 }
  0xfb   :  { %v998_v3 = vadd.f32 %v1653_v62, %v1613_v59  ;;  %v1656_v4 = vadd.f32 %v1655_v2, %v1654_v63 }
  0xfd   :  { %v1001_v5 = vadd.f32 %v1656_v4, %v1616_v1 }
  0xfe   :  { %v1617_v6 = vpop.f32.mrb[4].mxu0 }
  0xff   :  { %v1657_v7 = vpop.f32.mrb[4].mxu1  ;;  %v1618_v8 = vpop.f32.mrb[5].mxu0 }
 0x100   :  { %v1619_v9 = vadd.f32 %v1618_v8, %v1617_v6  ;;  %v1658_v10 = vpop.f32.mrb[5].mxu1  ;;  %v1620_v11 = vpop.f32.mrb[6].mxu0 }
 0x101   :  { %v1659_v12 = vadd.f32 %v1658_v10, %v1657_v7  ;;  %v1660_v13 = vpop.f32.mrb[6].mxu1  ;;  %v1621_v14 = vpop.f32.mrb[7].mxu0 }
 0x102   :  { %v1622_v15 = vadd.f32 %v1621_v14, %v1620_v11  ;;  %v1661_v16 = vpop.f32.mrb[7].mxu1 }
 0x103   :  { %v1006_v17 = vadd.f32 %v1659_v12, %v1619_v9  ;;  %v1662_v18 = vadd.f32 %v1661_v16, %v1660_v13 }
 0x105   :  { %v1009_v19 = vadd.f32 %v1662_v18, %v1622_v15 }
 0x106   :  { %v1623_v20 = vpop.f32.mrb[8].mxu0 }
 0x107   :  { %v1663_v21 = vpop.f32.mrb[8].mxu1  ;;  %v1624_v22 = vpop.f32.mrb[9].mxu0 }
 0x108   :  { %v1625_v23 = vadd.f32 %v1624_v22, %v1623_v20  ;;  %v1664_v24 = vpop.f32.mrb[9].mxu1  ;;  %v1626_v25 = vpop.f32.mrb[10].mxu0 }
 0x109   :  { %v1665_v26 = vadd.f32 %v1664_v24, %v1663_v21  ;;  %v1666_v27 = vpop.f32.mrb[10].mxu1  ;;  %v1627_v28 = vpop.f32.mrb[11].mxu0 }
 0x10a   :  { %v1628_v29 = vadd.f32 %v1627_v28, %v1626_v25  ;;  %v1667_v30 = vpop.f32.mrb[11].mxu1 }
 0x10b   :  { %v1014_v31 = vadd.f32 %v1665_v26, %v1625_v23  ;;  %v1668_v32 = vadd.f32 %v1667_v30, %v1666_v27 }
 0x10d   :  { %v1017_v33 = vadd.f32 %v1668_v32, %v1628_v29 }
 0x10e   :  { %v1629_v34 = vpop.f32.mrb[12].mxu0 }
 0x10f   :  { %v1669_v35 = vpop.f32.mrb[12].mxu1  ;;  %v1630_v36 = vpop.f32.mrb[13].mxu0 }
 0x110   :  { %v1670_v37 = vpop.f32.mrb[13].mxu1  ;;  %v1631_v38 = vadd.f32 %v1630_v36, %v1629_v34  ;;  %v1632_v40 = vpop.f32.mrb[14].mxu0 }
 0x111   :  { %v1671_v39 = vadd.f32 %v1670_v37, %v1669_v35  ;;  %v1672_v41 = vpop.f32.mrb[14].mxu1  ;;  %v1633_v42 = vpop.f32.mrb[15].mxu0 }
 0x112   :  { %v1673_v43 = vpop.f32.mrb[15].mxu1  ;;  %v1634_v45 = vadd.f32 %v1633_v42, %v1632_v40 }
 0x113   :  { %v1022_v44 = vadd.f32 %v1671_v39, %v1631_v38  ;;  %v1674_v46 = vadd.f32 %v1673_v43, %v1672_v41 }
 0x115   :  { %v1025_v47 = vadd.f32 %v1674_v46, %v1634_v45 }
 0x116   :  { %v1691_v48 = vpop.f32.mrb[16].mxu0 }
 0x117   :  { %v1692_v49 = vpop.f32.mrb[17].mxu0  ;;  %v1731_v52 = vpop.f32.mrb[16].mxu1 }
 0x118   :  { %v1693_v50 = vadd.f32 %v1692_v49, %v1691_v48  ;;  %v1694_v51 = vpop.f32.mrb[18].mxu0  ;;  %v1732_v54 = vpop.f32.mrb[17].mxu1 }
 0x119   :  { %v1695_v53 = vpop.f32.mrb[19].mxu0  ;;  %v1733_v57 = vadd.f32 %v1732_v54, %v1731_v52  ;;  %v1734_v58 = vpop.f32.mrb[18].mxu1 }
 0x11a   :  { %v1063_v55 = vadd.f32 %v1693_v50, %v998_v3  ;;  %v1696_v56 = vadd.f32 %v1695_v53, %v1694_v51  ;;  %v1735_v59 = vpop.f32.mrb[19].mxu1 }
 0x11b   :  { %v1736_v62 = vadd.f32 %v1735_v59, %v1734_v58 }
 0x11c   :  { %v1066_v60 = vadd.f32 %v1696_v56, %v1001_v5  ;;  %v1128_v61 = vadd.f32 %v1733_v57, %v1063_v55 }
 0x11e   :  { %v2356_v63 = vadd.f32 %v1736_v62, %v1066_v60  ;;  %v1697_v0 = vpop.f32.mrb[20].mxu0 }
 0x11f   :  { %v1698_v1 = vpop.f32.mrb[21].mxu0  ;;  %v1737_v6 = vpop.f32.mrb[20].mxu1 }
 0x120   :  { %v1699_v2 = vadd.f32 %v1698_v1, %v1697_v0  ;;  %v1700_v4 = vpop.f32.mrb[22].mxu0  ;;  %v1738_v8 = vpop.f32.mrb[21].mxu1 }
 0x121   :  { %v1701_v7 = vpop.f32.mrb[23].mxu0  ;;  %v1739_v11 = vadd.f32 %v1738_v8, %v1737_v6  ;;  %v1740_v3 = vpop.f32.mrb[22].mxu1 }
 0x122   :  { %v1071_v9 = vadd.f32 %v1699_v2, %v1006_v17  ;;  %v1702_v10 = vadd.f32 %v1701_v7, %v1700_v4  ;;  %v1741_v12 = vpop.f32.mrb[23].mxu1 }
 0x123   :  { %v1742_v5 = vadd.f32 %v1741_v12, %v1740_v3 }
 0x124   :  { %v1074_v13 = vadd.f32 %v1702_v10, %v1009_v19  ;;  %v2358_v14 = vadd.f32 %v1739_v11, %v1071_v9 }
 0x126   :  { %v2360_v15 = vadd.f32 %v1742_v5, %v1074_v13  ;;  %v1703_v16 = vpop.f32.mrb[24].mxu0 }
 0x127   :  { %v1704_v18 = vpop.f32.mrb[25].mxu0  ;;  %v1743_v22 = vpop.f32.mrb[24].mxu1 }
 0x128   :  { %v1705_v20 = vadd.f32 %v1704_v18, %v1703_v16  ;;  %v1706_v21 = vpop.f32.mrb[26].mxu0  ;;  %v1744_v24 = vpop.f32.mrb[25].mxu1 }
 0x129   :  { %v1707_v23 = vpop.f32.mrb[27].mxu0  ;;  %v1745_v17 = vadd.f32 %v1744_v24, %v1743_v22  ;;  %v1746_v27 = vpop.f32.mrb[26].mxu1 }
 0x12a   :  { %v1079_v25 = vadd.f32 %v1705_v20, %v1014_v31  ;;  %v1708_v26 = vadd.f32 %v1707_v23, %v1706_v21  ;;  %v1747_v28 = vpop.f32.mrb[27].mxu1 }
 0x12b   :  { %v1748_v19 = vadd.f32 %v1747_v28, %v1746_v27 }
 0x12c   :  { %v1082_v29 = vadd.f32 %v1708_v26, %v1017_v33  ;;  %v1144_v30 = vadd.f32 %v1745_v17, %v1079_v25  ;;  %v1970_v26 = vmov 0  }
 0x12d   :  { %1812 = vset.pattern.permute.xlu0 %v1970_v26  ;;  %1813 = vset.pattern.permute.xlu1 %v1970_v26 }
 0x12e   :  { %v1147_v32 = vadd.f32 %v1748_v19, %v1082_v29  ;;  %v1709_v34 = vpop.f32.mrb[28].mxu0 }
 0x12f   :  { %v1710_v35 = vpop.f32.mrb[29].mxu0  ;;  %v1749_v38 = vpop.f32.mrb[28].mxu1 }
 0x130   :  { %v1711_v36 = vadd.f32 %v1710_v35, %v1709_v34  ;;  %v1712_v37 = vpop.f32.mrb[30].mxu0  ;;  %v1750_v40 = vpop.f32.mrb[29].mxu1 }
 0x131   :  { %v1713_v39 = vpop.f32.mrb[31].mxu0  ;;  %v1751_v43 = vadd.f32 %v1750_v40, %v1749_v38  ;;  %v1752_v45 = vpop.f32.mrb[30].mxu1 }
 0x132   :  { %v1087_v41 = vadd.f32 %v1711_v36, %v1022_v44  ;;  %v1714_v42 = vadd.f32 %v1713_v39, %v1712_v37  ;;  %v1753_v31 = vpop.f32.mrb[31].mxu1 }
 0x133   :  { %v1754_v49 = vadd.f32 %v1753_v31, %v1752_v45 }
 0x134   :  { %v1090_v46 = vadd.f32 %v1714_v42, %v1025_v47  ;;  %v1152_v48 = vadd.f32 %v1751_v43, %v1087_v41 }
 0x136   :  { %v1155_v50 = vadd.f32 %v1754_v49, %v1090_v46 }
 0x137   :  { %v1771_v33 = vpop.f32.mrb[32].mxu0 }
 0x138   :  { %v1783_v51 = vpop.f32.mrb[32].mxu1  ;;  %v1772_v52 = vpop.f32.mrb[33].mxu0 }
 0x139   :  { %v1773_v53 = vadd.f32 %v1772_v52, %v1771_v33  ;;  %v1784_v54 = vpop.f32.mrb[33].mxu1  ;;  %v1774_v55 = vpop.f32.mrb[34].mxu0 }
 0x13a   :  { %v1785_v56 = vadd.f32 %v1784_v54, %v1783_v51  ;;  %v1786_v57 = vpop.f32.mrb[34].mxu1  ;;  %v1775_v58 = vpop.f32.mrb[35].mxu0 }
 0x13b   :  { %v2362_v59 = vadd.f32 %v1773_v53, %v1128_v61  ;;  %v1776_v44 = vadd.f32 %v1775_v58, %v1774_v55  ;;  %v1787_v60 = vpop.f32.mrb[35].mxu1 }
 0x13c   :  { %v2364_v62 = vadd.f32 %v1785_v56, %v1144_v30  ;;  %v1788_v0 = vadd.f32 %v1787_v60, %v1786_v57 }
 0x13d   :  { %v2367_v47 = vadd.f32 %v1776_v44, %v2356_v63  ;;  %1223 = vadd.xlane.f32.xlu0 %v2362_v59 }
 0x13e   :  { %v2370_v1 = vadd.f32 %v1788_v0, %v1147_v32  ;;  %v1251_v22 = vmul.f32 %v2364_v62, %v2364_v62 }
 0x13f   :  { %v1777_v2 = vpop.f32.mrb[36].mxu0  ;;  %v1248_v63 = vmul.f32 %v2367_v47, %v2367_v47 }
 0x140   :  { %v1789_v4 = vpop.f32.mrb[36].mxu1  ;;  %1233 = vadd.xlane.f32.xlu1 %v2370_v1  ;;  %v1778_v6 = vpop.f32.mrb[37].mxu0  ;;  %v1252_v21 = vmul.f32 %v2370_v1, %v2370_v1 }
 0x141   :  { %v1779_v7 = vadd.f32 %v1778_v6, %v1777_v2  ;;  %v1790_v61 = vpop.f32.mrb[37].mxu1  ;;  %v1780_v8 = vpop.f32.mrb[38].mxu0  ;;  %1231 = vadd.xlane.f32.xlu0 %v2364_v62 }
 0x142   :  { %v1791_v9 = vadd.f32 %v1790_v61, %v1789_v4  ;;  %v1792_v10 = vpop.f32.mrb[38].mxu1  ;;  %v1781_v11 = vpop.f32.mrb[39].mxu0  ;;  %v1304_v61 = vld [vmem:[%s2522_s2 + $0x8] sm:$0xff] }
 0x143   :  { %v2377_v3 = vadd.f32 %v1779_v7, %v2358_v14  ;;  %v1782_v12 = vadd.f32 %v1781_v11, %v1780_v8  ;;  %v1793_v13 = vpop.f32.mrb[39].mxu1  ;;  %v1247_v14 = vmul.f32 %v2362_v59, %v2362_v59 }
 0x144   :  { %v2379_v5 = vadd.f32 %v1791_v9, %v1152_v48  ;;  %v1794_v16 = vadd.f32 %v1793_v13, %v1792_v10  ;;  %1257 = vadd.xlane.f32.xlu1 %v1248_v63  ;;  %v1308_v13 = vld [vmem:[%s2522_s2 + $0x28] sm:$0xff] }
 0x145   :  { %v2382_v18 = vadd.f32 %v1782_v12, %v2360_v15  ;;  %1225 = vadd.xlane.f32.xlu0 %v2367_v47  ;;  %v1249_v15 = vmul.f32 %v2377_v3, %v2377_v3 }
 0x146   :  { %v2385_v20 = vadd.f32 %v1794_v16, %v1155_v50  ;;  %v1253_v24 = vmul.f32 %v2379_v5, %v2379_v5 }
 0x147   :  { %v1250_v23 = vmul.f32 %v2382_v18, %v2382_v18 }
 0x148   :  { %1265 = vadd.xlane.f32.xlu1 %v1252_v21  ;;  %v1254_v25 = vmul.f32 %v2385_v20, %v2385_v20 }
 0x149   :  { %1255 = vadd.xlane.f32.xlu0 %v1247_v14 }
 0x14c   :  { %1227 = vadd.xlane.f32.xlu1 %v2377_v3 }
 0x14d   :  { %1263 = vadd.xlane.f32.xlu0 %v1251_v22  ;;  %v1303_v22 = vld [vmem:[%s2522_s2] sm:$0xff] }
 0x150   :  { %1229 = vadd.xlane.f32.xlu1 %v2382_v18 }
 0x151   :  { %1235 = vadd.xlane.f32.xlu0 %v2379_v5 }
 0x154   :  { %1237 = vadd.xlane.f32.xlu1 %v2385_v20 }
 0x155   :  { %1259 = vadd.xlane.f32.xlu0 %v1249_v15 }
 0x158   :  { %1261 = vadd.xlane.f32.xlu1 %v1250_v23 }
 0x159   :  { %1267 = vadd.xlane.f32.xlu0 %v1253_v24 }
 0x15c   :  { %1269 = vadd.xlane.f32.xlu1 %v1254_v25 }
 0x1ca   :  { %v1224_v17 = vpop.xlane.xlu0 %1223 }
 0x1cb   :  { %v2407_v32 = vmul.f32 0.010204081, %v1224_v17 }
 0x1cd   :  { %v1234_v27 = vpop.xlane.xlu1 %1233  ;;  %v1279_v41 = vmul.f32 %v2407_v32, %v2407_v32 }
 0x1ce   :  { %v1232_v28 = vpop.xlane.xlu0 %1231  ;;  %v2405_v30 = vmul.f32 0.010204081, %v1234_v27 }
 0x1cf   :  { %v2413_v42 = vmul.f32 0.010204081, %v1232_v28 }
 0x1d0   :  { %v1284_v38 = vmul.f32 %v2405_v30, %v2405_v30 }
 0x1d1   :  { %v1258_v29 = vpop.xlane.xlu1 %1257  ;;  %v1283_v51 = vmul.f32 %v2413_v42, %v2413_v42 }
 0x1d2   :  { %v1226_v19 = vpop.xlane.xlu0 %1225  ;;  %v1272_v35 = vmul.f32 0.010204081, %v1258_v29 }
 0x1d3   :  { %v1240_v34 = vmul.f32 0.010204081, %v1226_v19 }
 0x1d5   :  { %v1280_v36 = vmul.f32 %v1240_v34, %v1240_v34  ;;  %v1266_v37 = vpop.xlane.xlu1 %1265 }
 0x1d6   :  { %v1276_v39 = vmul.f32 0.010204081, %v1266_v37  ;;  %v1256_v40 = vpop.xlane.xlu0 %1255 }
 0x1d7   :  { %v1288_v43 = vsub.f32 %v1272_v35, %v1280_v36  ;;  %v1271_v45 = vmul.f32 0.010204081, %v1256_v40  ;;  %v1307_v40 = vld [vmem:[%s2522_s2 + $0x20] sm:$0xff] }
 0x1d8   :  { %v1292_v31 = vsub.f32 %v1276_v39, %v1284_v38  ;;  %v1336_v39 = vld [vmem:[%s2523_s3 + $0x8] sm:$0xff] }
 0x1d9   :  { %v1296_v46 = vmax.f32 %v1288_v43, 0.0  ;;  %v1287_v48 = vsub.f32 %v1271_v45, %v1279_v41  ;;  %v1228_v49 = vpop.xlane.xlu1 %1227 }
 0x1da   :  { %v1300_v50 = vmax.f32 %v1292_v31, 0.0  ;;  %v1264_v33 = vpop.xlane.xlu0 %1263  ;;  %v2419_v7 = vmul.f32 0.010204081, %v1228_v49 }
 0x1db   :  { %v1312_v52 = vadd.f32 1e-05, %v1296_v46  ;;  %v1295_v53 = vmax.f32 %v1287_v48, 0.0  ;;  %v1275_v54 = vmul.f32 0.010204081, %v1264_v33  ;;  %v1340_v33 = vld [vmem:[%s2523_s3 + $0x28] sm:$0xff] }
 0x1dc   :  { %v1316_v55 = vadd.f32 1e-05, %v1300_v50  ;;  %v1281_v21 = vmul.f32 %v2419_v7, %v2419_v7 }
 0x1dd   :  { %1954 = vrsqrt.f32 %v1312_v52  ;;  %v1311_v56 = vadd.f32 1e-05, %v1295_v53  ;;  %v1291_v57 = vsub.f32 %v1275_v54, %v1283_v51  ;;  %v1230_v58 = vpop.xlane.xlu1 %1229 }
 0x1de   :  { %1956 = vrsqrt.f32 %v1316_v55  ;;  %v1236_v44 = vpop.xlane.xlu0 %1235  ;;  %v2417_v4 = vmul.f32 0.010204081, %v1230_v58 }
 0x1df   :  { %1958 = vrsqrt.f32 %v1311_v56  ;;  %v1299_v60 = vmax.f32 %v1291_v57, 0.0  ;;  %v2433_v14 = vmul.f32 0.010204081, %v1236_v44  ;;  %v1306_v56 = vld [vmem:[%s2522_s2 + $0x18] sm:$0xff]  ;;  %v1335_v57 = vld [vmem:[%s2523_s3] sm:$0xff] }
 0x1e0   :  { %v1282_v11 = vmul.f32 %v2417_v4, %v2417_v4 }
 0x1e1   :  { %v1315_v0 = vadd.f32 1e-05, %v1299_v60  ;;  %v1238_v2 = vpop.xlane.xlu1 %1237  ;;  %v1285_v38 = vmul.f32 %v2433_v14, %v2433_v14 }
 0x1e2   :  { %v1260_v6 = vpop.xlane.xlu0 %1259  ;;  %v2424_v8 = vmul.f32 0.010204081, %v1238_v2 }
 0x1e3   :  { %1960 = vrsqrt.f32 %v1315_v0  ;;  %v1273_v9 = vmul.f32 0.010204081, %v1260_v6  ;;  %v1338_v0 = vld [vmem:[%s2523_s3 + $0x18] sm:$0xff] }
 0x1e4   :  { %v1286_v26 = vmul.f32 %v2424_v8, %v2424_v8 }
 0x1e5   :  { %v1262_v10 = vpop.xlane.xlu1 %1261  ;;  %v1289_v17 = vsub.f32 %v1273_v9, %v1281_v21 }
 0x1e6   :  { %v1274_v63 = vmul.f32 0.010204081, %v1262_v10  ;;  %v1268_v12 = vpop.xlane.xlu0 %1267 }
 0x1e7   :  { %v1955_v16 = vpop.eup %1954  ;;  %v1277_v27 = vmul.f32 0.010204081, %v1268_v12  ;;  %v1297_v31 = vmax.f32 %v1289_v17, 0.0  ;;  %v1342_v12 = vld [vmem:[%s2523_s3 + $0x38] sm:$0xff]  ;;  %v1341_v17 = vld [vmem:[%s2523_s3 + $0x30] sm:$0xff] }
 0x1e8   :  { %v1957_v15 = vpop.eup %1956  ;;  %v1328_v23 = vmul.f32 %v1955_v16, %v1304_v61  ;;  %v1290_v24 = vsub.f32 %v1274_v63, %v1282_v11  ;;  %v1339_v61 = vld [vmem:[%s2523_s3 + $0x20] sm:$0xff] }
 0x1e9   :  { %v1959_v25 = vpop.eup %1958  ;;  %v1270_v28 = vpop.xlane.xlu1 %1269  ;;  %v1332_v29 = vmul.f32 %v1957_v15, %v1308_v13  ;;  %v1313_v52 = vadd.f32 1e-05, %v1297_v31  ;;  %v1309_v15 = vld [vmem:[%s2522_s2 + $0x30] sm:$0xff] }
 0x1ea   :  { %v1344_v19 = vmul.f32 %v1328_v23, %v1240_v34  ;;  %v1298_v35 = vmax.f32 %v1290_v24, 0.0  ;;  %v1278_v36 = vmul.f32 0.010204081, %v1270_v28  ;;  %v1327_v37 = vmul.f32 %v1959_v25, %v1303_v22 }
 0x1eb   :  { %v1293_v34 = vsub.f32 %v1277_v27, %v1285_v38  ;;  %v1348_v46 = vmul.f32 %v1332_v29, %v2405_v30 }
 0x1ec   :  { %v1314_v41 = vadd.f32 1e-05, %v1298_v35  ;;  %v1294_v43 = vsub.f32 %v1278_v36, %v1286_v26  ;;  %1361 = vperm.xlu0 %1812, %v1327_v37   ;;  %v1352_v49 = vsub.f32 %v1336_v39, %v1344_v19  ;;  %v1343_v30 = vmul.f32 %v1327_v37, %v2407_v32  ;;  %v1310_v32 = vld [vmem:[%s2522_s2 + $0x38] sm:$0xff] }
 0x1ed   :  { %v1961_v45 = vpop.eup %1960  ;;  %v1301_v53 = vmax.f32 %v1293_v34, 0.0  ;;  %v1356_v54 = vsub.f32 %v1340_v33, %v1348_v46 }
 0x1ee   :  { %1962 = vrsqrt.f32 %v1314_v41  ;;  %v1302_v48 = vmax.f32 %v1294_v43, 0.0  ;;  %v1331_v50 = vmul.f32 %v1961_v45, %v1307_v40  ;;  %v1351_v60 = vsub.f32 %v1335_v57, %v1343_v30 }
 0x1ef   :  { %v1317_v55 = vadd.f32 1e-05, %v1301_v53 }
 0x1f0   :  { %v1318_v51 = vadd.f32 1e-05, %v1302_v48  ;;  %1414 = vperm.xlu0 %1812, %v1352_v49   ;;  %1381 = vperm.xlu1 %1813, %v1331_v50   ;;  %v1347_v2 = vmul.f32 %v1331_v50, %v2413_v42 }
 0x1f2   :  { %1964 = vrsqrt.f32 %v1318_v51  ;;  %v1355_v63 = vsub.f32 %v1339_v61, %v1347_v2 }
 0x1f3   :  { %1966 = vrsqrt.f32 %v1313_v52 }
 0x1f4   :  { %1434 = vperm.xlu0 %1812, %v1356_v54   ;;  %1366 = vperm.xlu1 %1813, %v1328_v23   ;;  %1968 = vrsqrt.f32 %v1317_v55 }
 0x1f8   :  { %v1963_v58 = vpop.eup %1962  ;;  %1386 = vperm.xlu1 %1813, %v1332_v29  }
 0x1f9   :  { %v1330_v44 = vmul.f32 %v1963_v58, %v1306_v56 }
 0x1fb   :  { %v1346_v6 = vmul.f32 %v1330_v44, %v2417_v4  ;;  %v1305_v4 = vld [vmem:[%s2522_s2 + $0x10] sm:$0xff] }
 0x1fc   :  { %v1965_v9 = vpop.eup %1964  ;;  %1409 = vperm.xlu1 %1813, %v1351_v60  }
 0x1fd   :  { %v1354_v10 = vsub.f32 %v1338_v0, %v1346_v6  ;;  %v1334_v11 = vmul.f32 %v1965_v9, %v1310_v32  ;;  %v1967_v42 = vpop.eup %1966 }
 0x1fe   :  { %v1329_v21 = vmul.f32 %v1967_v42, %v1305_v4  ;;  %v1969_v22 = vpop.eup %1968 }
 0x1ff   :  { %1424 = vperm.xlu0 %1812, %v1354_v10   ;;  %v1350_v13 = vmul.f32 %v1334_v11, %v2424_v8  ;;  %v1333_v23 = vmul.f32 %v1969_v22, %v1309_v15  ;;  %v1337_v8 = vld [vmem:[%s2523_s3 + $0x10] sm:$0xff] }
 0x200   :  { %1429 = vperm.xlu1 %1813, %v1355_v63   ;;  %v1345_v24 = vmul.f32 %v1329_v21, %v2419_v7 }
 0x201   :  { %v1358_v16 = vsub.f32 %v1342_v12, %v1350_v13  ;;  %v1349_v26 = vmul.f32 %v1333_v23, %v2433_v14 }
 0x202   :  { %v1353_v25 = vsub.f32 %v1337_v8, %v1345_v24 }
 0x203   :  { %1444 = vperm.xlu0 %1812, %v1358_v16   ;;  %v1357_v27 = vsub.f32 %v1341_v17, %v1349_v26 }
 0x204   :  { %1371 = vperm.xlu1 %1813, %v1329_v21  }
 0x208   :  { %1391 = vperm.xlu1 %1813, %v1333_v23  }
 0x20c   :  { %1376 = vperm.xlu1 %1813, %v1330_v44  }
 0x210   :  { %1396 = vperm.xlu1 %1813, %v1334_v11  }
 0x214   :  { %1419 = vperm.xlu1 %1813, %v1353_v25  }
 0x218   :  { %1439 = vperm.xlu1 %1813, %v1357_v27  }
 0x26b   :  { %v1362_v28 = vpop.permute.xlu0 %1361 }
 0x26c   :  { %v1399_v14 = vmul.f32 %v1362_v28, %v2362_v59 }
 0x26f   :  { %v1382_v29 = vpop.permute.xlu1 %1381  ;;  %v1415_v19 = vpop.permute.xlu0 %1414 }
 0x270   :  { %v1403_v34 = vmul.f32 %v1382_v29, %v2364_v62 }
 0x273   :  { %v1367_v35 = vpop.permute.xlu1 %1366  ;;  %v1435_v40 = vpop.permute.xlu0 %1434 }
 0x274   :  { %v1400_v7 = vmul.f32 %v1367_v35, %v2367_v47 }
 0x276   :  { %v1448_v36 = vadd.f32 %v1415_v19, %v1400_v7 }
 0x277   :  { %v1387_v37 = vpop.permute.xlu1 %1386 }
 0x278   :  { %v1456_v38 = vmax.f32 %v1448_v36, 0.0  ;;  %v1404_v39 = vmul.f32 %v1387_v37, %v2370_v1 }
 0x27a   :  { %1464 = vst [vmem:[%s2524_s4 + $0x8] sm:$0xff] %v1456_v38  ;;  %v1452_v41 = vadd.f32 %v1435_v40, %v1404_v39 }
 0x27b   :  { %v1410_v43 = vpop.permute.xlu1 %1409 }
 0x27c   :  { %v1460_v45 = vmax.f32 %v1452_v41, 0.0  ;;  %v1447_v31 = vadd.f32 %v1410_v43, %v1399_v14 }
 0x27e   :  { %1468 = vst [vmem:[%s2524_s4 + $0x28] sm:$0xff] %v1460_v45  ;;  %v1455_v47 = vmax.f32 %v1447_v31, 0.0  ;;  %v1425_v50 = vpop.permute.xlu0 %1424 }
 0x27f   :  { %v1430_v46 = vpop.permute.xlu1 %1429 }
 0x280   :  { %1463 = vst [vmem:[%s2524_s4] sm:$0xff] %v1455_v47  ;;  %v1451_v59 = vadd.f32 %v1430_v46, %v1403_v34 }
 0x282   :  { %v1459_v1 = vmax.f32 %v1451_v59, 0.0  ;;  %v1445_v55 = vpop.permute.xlu0 %1444 }
 0x283   :  { %v1372_v48 = vpop.permute.xlu1 %1371 }
 0x284   :  { %1467 = vst [vmem:[%s2524_s4 + $0x20] sm:$0xff] %v1459_v1  ;;  %v1401_v30 = vmul.f32 %v1372_v48, %v2377_v3 }
 0x287   :  { %v1392_v49 = vpop.permute.xlu1 %1391 }
 0x288   :  { %v1405_v60 = vmul.f32 %v1392_v49, %v2379_v5 }
 0x28b   :  { %v1377_v62 = vpop.permute.xlu1 %1376 }
 0x28c   :  { %v1402_v33 = vmul.f32 %v1377_v62, %v2382_v18 }
 0x28e   :  { %v1450_v51 = vadd.f32 %v1425_v50, %v1402_v33 }
 0x28f   :  { %v1397_v52 = vpop.permute.xlu1 %1396 }
 0x290   :  { %v1458_v53 = vmax.f32 %v1450_v51, 0.0  ;;  %v1406_v54 = vmul.f32 %v1397_v52, %v2385_v20 }
 0x292   :  { %1466 = vst [vmem:[%s2524_s4 + $0x18] sm:$0xff] %v1458_v53  ;;  %v1454_v56 = vadd.f32 %v1445_v55, %v1406_v54 }
 0x293   :  { %v1420_v57 = vpop.permute.xlu1 %1419 }
 0x294   :  { %v1462_v58 = vmax.f32 %v1454_v56, 0.0  ;;  %v1449_v44 = vadd.f32 %v1420_v57, %v1401_v30 }
 0x296   :  { %1470 = vst [vmem:[%s2524_s4 + $0x38] sm:$0xff] %v1462_v58  ;;  %v1457_v18 = vmax.f32 %v1449_v44, 0.0 }
 0x297   :  { %v1440_v0 = vpop.permute.xlu1 %1439 }
 0x298   :  { %1465 = vst [vmem:[%s2524_s4 + $0x10] sm:$0xff] %v1457_v18  ;;  %v1453_v3 = vadd.f32 %v1440_v0, %v1405_v60 }
 0x29a   :  { %v1461_v20 = vmax.f32 %v1453_v3, 0.0 }
 0x29c   :  { %1469 = vst [vmem:[%s2524_s4 + $0x30] sm:$0xff] %v1461_v20 }

// kernel: generator_forward.5
= control target key start
LH: loop header
LB: loop body
LE: loop exit
PB: predicated region body
PF: predicated region fallthrough
CT: control target
= control target key end

     0   :  { %s4034_s1 = inlined_call_operand.vmem [shape: bf16[1024,512], index: 1, kind: input, shape index: {}]   ;;  %s4035_s0 = inlined_call_operand.vmem [shape: bf16[32,1024], index: 0, kind: input, shape index: {}]   ;;  %s4036_s2 = inlined_call_operand.vmem [shape: f32[32,1], index: 2, kind: input, shape index: {}]   ;;  %s4037_s3 = inlined_call_operand.vmem [shape: f32[32,1], index: 3, kind: input, shape index: {}]   ;;  %s4038_s4 = inlined_call_operand.vmem [shape: f32[32,512], index: 4, kind: output, shape index: {}]  }
   0x1   :  { %v2608_v0 = vld [vmem:[%s4034_s1 + $0x4] ss:$16 sps:$4 sm:$0xff]   ;;  %v2610_v1 = vld [vmem:[%s4034_s1 + $0xc] ss:$16 sps:$4 sm:$0xff]   ;;  %v2612_v2 = vld [vmem:[%s4034_s1] ss:$16 sps:$4 sm:$0xff]  }
   0x2   :  { %1649 = vmatprep.subr.bf16.mxu0 %v2608_v0  ;;  %v2613_v3 = vld [vmem:[%s4034_s1 + $0x8] ss:$16 sps:$4 sm:$0xff]   ;;  %1861 = vmatprep.subr.bf16.mxu1 %v2610_v1  ;;  %v2614_v4 = vld [vmem:[%s4034_s1 + $0x24] ss:$16 sps:$4 sm:$0xff]   ;;  %v2616_v5 = vld [vmem:[%s4034_s1 + $0x2c] ss:$16 sps:$4 sm:$0xff]  }
   0x3   :  { %1650 = vmatpush1.bf16.msra.mxu0 %v2612_v2  ;;  %1862 = vmatpush1.bf16.msra.mxu1 %v2613_v3  ;;  %v2618_v6 = vld [vmem:[%s4034_s1 + $0x20] ss:$16 sps:$4 sm:$0xff]   ;;  %v2619_v7 = vld [vmem:[%s4034_s1 + $0x28] ss:$16 sps:$4 sm:$0xff]   ;;  %v2620_v8 = vld [vmem:[%s4034_s1 + $0x44] ss:$16 sps:$4 sm:$0xff]  }
   0x4   :  { %1651 = vmatprep.subr.bf16.mxu0 %v2614_v4  ;;  %1863 = vmatprep.subr.bf16.mxu1 %v2616_v5  ;;  %v2622_v9 = vld [vmem:[%s4034_s1 + $0x4c] ss:$16 sps:$4 sm:$0xff]   ;;  %v2624_v10 = vld [vmem:[%s4034_s1 + $0x40] ss:$16 sps:$4 sm:$0xff]   ;;  %v2625_v11 = vld [vmem:[%s4034_s1 + $0x48] ss:$16 sps:$4 sm:$0xff]  }
   0x5   :  { %v2626_v12 = vld [vmem:[%s4034_s1 + $0x64] ss:$16 sps:$4 sm:$0xff]   ;;  %v2628_v13 = vld [vmem:[%s4034_s1 + $0x6c] ss:$16 sps:$4 sm:$0xff]   ;;  %v2630_v14 = vld [vmem:[%s4034_s1 + $0x60] ss:$16 sps:$4 sm:$0xff]  }
   0x6   :  { %v2631_v15 = vld [vmem:[%s4034_s1 + $0x68] ss:$16 sps:$4 sm:$0xff]   ;;  %v2632_v16 = vld [vmem:[%s4034_s1 + $0x84] ss:$16 sps:$4 sm:$0xff]   ;;  %v2634_v17 = vld [vmem:[%s4034_s1 + $0x8c] ss:$16 sps:$4 sm:$0xff]  }
   0x7   :  { %1652 = vmatpush1.bf16.msra.mxu0 %v2618_v6  ;;  %1864 = vmatpush1.bf16.msra.mxu1 %v2619_v7  ;;  %v2636_v18 = vld [vmem:[%s4034_s1 + $0x80] ss:$16 sps:$4 sm:$0xff]   ;;  %v2637_v19 = vld [vmem:[%s4034_s1 + $0x88] ss:$16 sps:$4 sm:$0xff]   ;;  %v2638_v20 = vld [vmem:[%s4034_s1 + $0xa4] ss:$16 sps:$4 sm:$0xff]  }
   0x8   :  { %1653 = vmatprep.subr.bf16.mxu0 %v2620_v8  ;;  %1865 = vmatprep.subr.bf16.mxu1 %v2622_v9  ;;  %v2640_v21 = vld [vmem:[%s4034_s1 + $0xac] ss:$16 sps:$4 sm:$0xff]   ;;  %v2642_v22 = vld [vmem:[%s4034_s1 + $0xa0] ss:$16 sps:$4 sm:$0xff]   ;;  %v2643_v23 = vld [vmem:[%s4034_s1 + $0xa8] ss:$16 sps:$4 sm:$0xff]  }
   0x9   :  { %v2644_v24 = vld [vmem:[%s4034_s1 + $0xc4] ss:$16 sps:$4 sm:$0xff]   ;;  %v2646_v25 = vld [vmem:[%s4034_s1 + $0xcc] ss:$16 sps:$4 sm:$0xff]   ;;  %v2648_v26 = vld [vmem:[%s4034_s1 + $0xc0] ss:$16 sps:$4 sm:$0xff]  }
   0xa   :  { %v2649_v27 = vld [vmem:[%s4034_s1 + $0xc8] ss:$16 sps:$4 sm:$0xff]   ;;  %v2650_v28 = vld [vmem:[%s4034_s1 + $0xe4] ss:$16 sps:$4 sm:$0xff]   ;;  %v2652_v29 = vld [vmem:[%s4034_s1 + $0xec] ss:$16 sps:$4 sm:$0xff]  }
   0xb   :  { %1654 = vmatpush1.bf16.msra.mxu0 %v2624_v10  ;;  %1866 = vmatpush1.bf16.msra.mxu1 %v2625_v11  ;;  %v2654_v30 = vld [vmem:[%s4034_s1 + $0xe0] ss:$16 sps:$4 sm:$0xff]   ;;  %v2655_v31 = vld [vmem:[%s4034_s1 + $0xe8] ss:$16 sps:$4 sm:$0xff]   ;;  %v2656_v32 = vld [vmem:[%s4034_s1 + $0x104] ss:$16 sps:$4 sm:$0xff]  }
   0xc   :  { %1655 = vmatprep.subr.bf16.mxu0 %v2626_v12  ;;  %1867 = vmatprep.subr.bf16.mxu1 %v2628_v13  ;;  %v2658_v33 = vld [vmem:[%s4034_s1 + $0x10c] ss:$16 sps:$4 sm:$0xff]   ;;  %v2660_v34 = vld [vmem:[%s4034_s1 + $0x100] ss:$16 sps:$4 sm:$0xff]   ;;  %v2661_v35 = vld [vmem:[%s4034_s1 + $0x108] ss:$16 sps:$4 sm:$0xff]  }
   0xd   :  { %v2662_v36 = vld [vmem:[%s4034_s1 + $0x124] ss:$16 sps:$4 sm:$0xff]   ;;  %v2664_v37 = vld [vmem:[%s4034_s1 + $0x12c] ss:$16 sps:$4 sm:$0xff]   ;;  %v2666_v38 = vld [vmem:[%s4034_s1 + $0x120] ss:$16 sps:$4 sm:$0xff]  }
   0xe   :  { %v2667_v39 = vld [vmem:[%s4034_s1 + $0x128] ss:$16 sps:$4 sm:$0xff]   ;;  %v2668_v40 = vld [vmem:[%s4034_s1 + $0x144] ss:$16 sps:$4 sm:$0xff]   ;;  %v2670_v41 = vld [vmem:[%s4034_s1 + $0x14c] ss:$16 sps:$4 sm:$0xff]  }
   0xf   :  { %1656 = vmatpush1.bf16.msra.mxu0 %v2630_v14  ;;  %1868 = vmatpush1.bf16.msra.mxu1 %v2631_v15  ;;  %v2672_v42 = vld [vmem:[%s4034_s1 + $0x140] ss:$16 sps:$4 sm:$0xff]   ;;  %v2673_v43 = vld [vmem:[%s4034_s1 + $0x148] ss:$16 sps:$4 sm:$0xff]   ;;  %v2674_v44 = vld [vmem:[%s4034_s1 + $0x164] ss:$16 sps:$4 sm:$0xff]  }
  0x10   :  { %1657 = vmatprep.subr.bf16.mxu0 %v2632_v16  ;;  %1869 = vmatprep.subr.bf16.mxu1 %v2634_v17  ;;  %v2676_v45 = vld [vmem:[%s4034_s1 + $0x16c] ss:$16 sps:$4 sm:$0xff]   ;;  %v17_v46 = vld [vmem:[%s4035_s0] sm:$0xff]  ;;  %v2679_v49 = vld [vmem:[%s4034_s1 + $0x168] ss:$16 sps:$4 sm:$0xff]  }
  0x11   :  { %v21_v47 = vld [vmem:[%s4035_s0 + $0x20] sm:$0xff]  ;;  %v2682_v52 = vld [vmem:[%s4034_s1 + $0x18c] ss:$16 sps:$4 sm:$0xff]   ;;  %v2685_v54 = vld [vmem:[%s4034_s1 + $0x188] ss:$16 sps:$4 sm:$0xff]  }
  0x12   :  { %v2678_v48 = vld [vmem:[%s4034_s1 + $0x160] ss:$16 sps:$4 sm:$0xff]   ;;  %v2286_v50 = vcombine.high %v17_v46, %v21_v47  ;;  %v2680_v51 = vld [vmem:[%s4034_s1 + $0x184] ss:$16 sps:$4 sm:$0xff]   ;;  %v2688_v56 = vld [vmem:[%s4034_s1 + $0x1ac] ss:$16 sps:$4 sm:$0xff]   ;;  %v2285_v5 = vcombine.low %v17_v46, %v21_v47 }
  0x13   :  { %1658 = vmatpush1.bf16.msra.mxu0 %v2636_v18  ;;  %1870 = vmatpush1.bf16.msra.mxu1 %v2637_v19  ;;  %v2684_v53 = vld [vmem:[%s4034_s1 + $0x180] ss:$16 sps:$4 sm:$0xff]   ;;  %v2686_v55 = vld [vmem:[%s4034_s1 + $0x1a4] ss:$16 sps:$4 sm:$0xff]   ;;  %v2691_v58 = vld [vmem:[%s4034_s1 + $0x1a8] ss:$16 sps:$4 sm:$0xff]  }
  0x14   :  { %1659 = vmatprep.subr.bf16.mxu0 %v2638_v20  ;;  %1871 = vmatprep.subr.bf16.mxu1 %v2640_v21  ;;  %v2690_v57 = vld [vmem:[%s4034_s1 + $0x1a0] ss:$16 sps:$4 sm:$0xff]   ;;  %v2692_v59 = vld [vmem:[%s4034_s1 + $0x1c4] ss:$16 sps:$4 sm:$0xff]   ;;  %v2694_v60 = vld [vmem:[%s4034_s1 + $0x1cc] ss:$16 sps:$4 sm:$0xff]  }
  0x15   :  { %1681 = vmatprep.mubr.bf16.mxu0 %v2286_v50  ;;  %1893 = vmatprep.mubr.bf16.mxu1 %v2286_v50  ;;  %v2696_v61 = vld [vmem:[%s4034_s1 + $0x1c0] ss:$16 sps:$4 sm:$0xff]   ;;  %v2697_v62 = vld [vmem:[%s4034_s1 + $0x1c8] ss:$16 sps:$4 sm:$0xff]   ;;  %v2698_v63 = vld [vmem:[%s4034_s1 + $0x1e4] ss:$16 sps:$4 sm:$0xff]  }
  0x16   :  { %v2700_v0 = vld [vmem:[%s4034_s1 + $0x1ec] ss:$16 sps:$4 sm:$0xff]   ;;  %v2702_v1 = vld [vmem:[%s4034_s1 + $0x1e0] ss:$16 sps:$4 sm:$0xff]   ;;  %v2703_v2 = vld [vmem:[%s4034_s1 + $0x1e8] ss:$16 sps:$4 sm:$0xff]  }
  0x17   :  { %1660 = vmatpush1.bf16.msra.mxu0 %v2642_v22  ;;  %1872 = vmatpush1.bf16.msra.mxu1 %v2643_v23  ;;  %v2706_v3 = vld [vmem:[%s4034_s1 + $0x204] ss:$16 sps:$4 sm:$0xff]   ;;  %v2709_v4 = vld [vmem:[%s4034_s1 + $0x20c] ss:$16 sps:$4 sm:$0xff]   ;;  %v2704_v6 = vld [vmem:[%s4034_s1 + $0x200] ss:$16 sps:$4 sm:$0xff]  }
  0x18   :  { %1661 = vmatprep.subr.bf16.mxu0 %v2644_v24  ;;  %1873 = vmatprep.subr.bf16.mxu1 %v2646_v25  ;;  %v2707_v7 = vld [vmem:[%s4034_s1 + $0x208] ss:$16 sps:$4 sm:$0xff]   ;;  %v2712_v8 = vld [vmem:[%s4034_s1 + $0x224] ss:$16 sps:$4 sm:$0xff]   ;;  %v2715_v9 = vld [vmem:[%s4034_s1 + $0x22c] ss:$16 sps:$4 sm:$0xff]  }
  0x19   :  { %v2710_v10 = vld [vmem:[%s4034_s1 + $0x220] ss:$16 sps:$4 sm:$0xff]   ;;  %v2713_v11 = vld [vmem:[%s4034_s1 + $0x228] ss:$16 sps:$4 sm:$0xff]   ;;  %v2718_v12 = vld [vmem:[%s4034_s1 + $0x244] ss:$16 sps:$4 sm:$0xff]  }
  0x1a   :  { %v2721_v13 = vld [vmem:[%s4034_s1 + $0x24c] ss:$16 sps:$4 sm:$0xff]   ;;  %v2716_v14 = vld [vmem:[%s4034_s1 + $0x240] ss:$16 sps:$4 sm:$0xff]   ;;  %v2719_v15 = vld [vmem:[%s4034_s1 + $0x248] ss:$16 sps:$4 sm:$0xff]  }
  0x1b   :  { %1662 = vmatpush1.bf16.msra.mxu0 %v2648_v26  ;;  %1874 = vmatpush1.bf16.msra.mxu1 %v2649_v27  ;;  %v2724_v16 = vld [vmem:[%s4034_s1 + $0x264] ss:$16 sps:$4 sm:$0xff]   ;;  %v2727_v17 = vld [vmem:[%s4034_s1 + $0x26c] ss:$16 sps:$4 sm:$0xff]   ;;  %v2722_v18 = vld [vmem:[%s4034_s1 + $0x260] ss:$16 sps:$4 sm:$0xff]  }
  0x1c   :  { %1663 = vmatprep.subr.bf16.mxu0 %v2650_v28  ;;  %1875 = vmatprep.subr.bf16.mxu1 %v2652_v29  ;;  %v2725_v19 = vld [vmem:[%s4034_s1 + $0x268] ss:$16 sps:$4 sm:$0xff]   ;;  %v2730_v20 = vld [vmem:[%s4034_s1 + $0x284] ss:$16 sps:$4 sm:$0xff]   ;;  %v2733_v21 = vld [vmem:[%s4034_s1 + $0x28c] ss:$16 sps:$4 sm:$0xff]  }
  0x1d   :  { %v2728_v22 = vld [vmem:[%s4034_s1 + $0x280] ss:$16 sps:$4 sm:$0xff]   ;;  %v2731_v23 = vld [vmem:[%s4034_s1 + $0x288] ss:$16 sps:$4 sm:$0xff]   ;;  %v2736_v24 = vld [vmem:[%s4034_s1 + $0x2a4] ss:$16 sps:$4 sm:$0xff]  }
  0x1e   :  { %v2739_v25 = vld [vmem:[%s4034_s1 + $0x2ac] ss:$16 sps:$4 sm:$0xff]   ;;  %v25_v26 = vld [vmem:[%s4035_s0 + $0x40] sm:$0xff]  ;;  %v2755_v46 = vld [vmem:[%s4034_s1 + $0x308] ss:$16 sps:$4 sm:$0xff]  }
  0x1f   :  { %1664 = vmatpush1.bf16.msra.mxu0 %v2654_v30  ;;  %1876 = vmatpush1.bf16.msra.mxu1 %v2655_v31  ;;  %v29_v27 = vld [vmem:[%s4035_s0 + $0x60] sm:$0xff]  ;;  %v2737_v30 = vld [vmem:[%s4034_s1 + $0x2a8] ss:$16 sps:$4 sm:$0xff]  }
  0x20   :  { %1665 = vmatprep.subr.bf16.mxu0 %v2656_v32  ;;  %1877 = vmatprep.subr.bf16.mxu1 %v2658_v33  ;;  %v2294_v28 = vcombine.high %v25_v26, %v29_v27  ;;  %v2734_v29 = vld [vmem:[%s4034_s1 + $0x2a0] ss:$16 sps:$4 sm:$0xff]   ;;  %v2293_v31 = vcombine.low %v25_v26, %v29_v27  ;;  %v2742_v32 = vld [vmem:[%s4034_s1 + $0x2c4] ss:$16 sps:$4 sm:$0xff]   ;;  %v2745_v33 = vld [vmem:[%s4034_s1 + $0x2cc] ss:$16 sps:$4 sm:$0xff]  }
  0x21   :  { %v2760_v47 = vld [vmem:[%s4034_s1 + $0x324] ss:$16 sps:$4 sm:$0xff]   ;;  %v2761_v50 = vld [vmem:[%s4034_s1 + $0x328] ss:$16 sps:$4 sm:$0xff]  }
  0x22   :  { %v3480_v27 = vld [vmem:[%s4035_s0 + $0x30] sm:$0xff] }
  0x23   :  { %1666 = vmatpush1.bf16.msra.mxu0 %v2660_v34  ;;  %1878 = vmatpush1.bf16.msra.mxu1 %v2661_v35  ;;  %v3311_v34 = vld [vmem:[%s4035_s0 + $0x8] sm:$0xff] }
  0x24   :  { %1667 = vmatprep.subr.bf16.mxu0 %v2662_v36  ;;  %1879 = vmatprep.subr.bf16.mxu1 %v2664_v37  ;;  %v3316_v35 = vld [vmem:[%s4035_s0 + $0x28] sm:$0xff]  ;;  %v2740_v36 = vld [vmem:[%s4034_s1 + $0x2c0] ss:$16 sps:$4 sm:$0xff]  }
  0x25   :  { %v2743_v37 = vld [vmem:[%s4034_s1 + $0x2c8] ss:$16 sps:$4 sm:$0xff]  }
  0x27   :  { %1668 = vmatpush1.bf16.msra.mxu0 %v2666_v38  ;;  %1880 = vmatpush1.bf16.msra.mxu1 %v2667_v39  ;;  %v2288_v38 = vcombine.high %v3311_v34, %v3316_v35  ;;  %v2748_v39 = vld [vmem:[%s4034_s1 + $0x2e4] ss:$16 sps:$4 sm:$0xff]  }
  0x28   :  { %1669 = vmatprep.subr.bf16.mxu0 %v2668_v40  ;;  %1881 = vmatprep.subr.bf16.mxu1 %v2670_v41  ;;  %v2751_v40 = vld [vmem:[%s4034_s1 + $0x2ec] ss:$16 sps:$4 sm:$0xff]   ;;  %v2746_v41 = vld [vmem:[%s4034_s1 + $0x2e0] ss:$16 sps:$4 sm:$0xff]  }
  0x2b   :  { %1670 = vmatpush1.bf16.msra.mxu0 %v2672_v42  ;;  %1882 = vmatpush1.bf16.msra.mxu1 %v2673_v43  ;;  %v2749_v42 = vld [vmem:[%s4034_s1 + $0x2e8] ss:$16 sps:$4 sm:$0xff]   ;;  %v2754_v43 = vld [vmem:[%s4034_s1 + $0x304] ss:$16 sps:$4 sm:$0xff]  }
  0x2c   :  { %1671 = vmatprep.subr.bf16.mxu0 %v2674_v44  ;;  %1883 = vmatprep.subr.bf16.mxu1 %v2676_v45  ;;  %v2757_v44 = vld [vmem:[%s4034_s1 + $0x30c] ss:$16 sps:$4 sm:$0xff]   ;;  %v2752_v45 = vld [vmem:[%s4034_s1 + $0x300] ss:$16 sps:$4 sm:$0xff]  }
  0x2f   :  { %1672 = vmatpush1.bf16.msra.mxu0 %v2678_v48  ;;  %1884 = vmatpush1.bf16.msra.mxu1 %v2679_v49  ;;  %v2763_v48 = vld [vmem:[%s4034_s1 + $0x32c] ss:$16 sps:$4 sm:$0xff]   ;;  %v2758_v49 = vld [vmem:[%s4034_s1 + $0x320] ss:$16 sps:$4 sm:$0xff]  }
  0x30   :  { %1673 = vmatprep.subr.bf16.mxu0 %v2680_v51  ;;  %1885 = vmatprep.subr.bf16.mxu1 %v2682_v52  ;;  %v2766_v51 = vld [vmem:[%s4034_s1 + $0x344] ss:$16 sps:$4 sm:$0xff]   ;;  %v2769_v52 = vld [vmem:[%s4034_s1 + $0x34c] ss:$16 sps:$4 sm:$0xff]  }
  0x33   :  { %1674 = vmatpush1.bf16.msra.mxu0 %v2684_v53  ;;  %1886 = vmatpush1.bf16.msra.mxu1 %v2685_v54  ;;  %v2764_v53 = vld [vmem:[%s4034_s1 + $0x340] ss:$16 sps:$4 sm:$0xff]   ;;  %v2767_v54 = vld [vmem:[%s4034_s1 + $0x348] ss:$16 sps:$4 sm:$0xff]  }
  0x34   :  { %1675 = vmatprep.subr.bf16.mxu0 %v2686_v55  ;;  %1887 = vmatprep.subr.bf16.mxu1 %v2688_v56  ;;  %v2772_v55 = vld [vmem:[%s4034_s1 + $0x364] ss:$16 sps:$4 sm:$0xff]   ;;  %v2775_v56 = vld [vmem:[%s4034_s1 + $0x36c] ss:$16 sps:$4 sm:$0xff]  }
  0x37   :  { %1676 = vmatpush1.bf16.msra.mxu0 %v2690_v57  ;;  %1888 = vmatpush1.bf16.msra.mxu1 %v2691_v58  ;;  %v2770_v57 = vld [vmem:[%s4034_s1 + $0x360] ss:$16 sps:$4 sm:$0xff]   ;;  %v2773_v58 = vld [vmem:[%s4034_s1 + $0x368] ss:$16 sps:$4 sm:$0xff]  }
  0x38   :  { %1677 = vmatprep.subr.bf16.mxu0 %v2692_v59  ;;  %1889 = vmatprep.subr.bf16.mxu1 %v2694_v60  ;;  %v2778_v59 = vld [vmem:[%s4034_s1 + $0x384] ss:$16 sps:$4 sm:$0xff]   ;;  %v2781_v60 = vld [vmem:[%s4034_s1 + $0x38c] ss:$16 sps:$4 sm:$0xff]  }
  0x3b   :  { %1678 = vmatpush1.bf16.msra.mxu0 %v2696_v61  ;;  %1890 = vmatpush1.bf16.msra.mxu1 %v2697_v62  ;;  %v2776_v61 = vld [vmem:[%s4034_s1 + $0x380] ss:$16 sps:$4 sm:$0xff]   ;;  %v2779_v62 = vld [vmem:[%s4034_s1 + $0x388] ss:$16 sps:$4 sm:$0xff]  }
  0x3c   :  { %1679 = vmatprep.subr.bf16.mxu0 %v2698_v63  ;;  %1891 = vmatprep.subr.bf16.mxu1 %v2700_v0  ;;  %v2784_v63 = vld [vmem:[%s4034_s1 + $0x3a4] ss:$16 sps:$4 sm:$0xff]   ;;  %v2787_v0 = vld [vmem:[%s4034_s1 + $0x3ac] ss:$16 sps:$4 sm:$0xff]  }
  0x3f   :  { %1680 = vmatpush1.bf16.msra.mxu0 %v2702_v1  ;;  %1892 = vmatpush1.bf16.msra.mxu1 %v2703_v2  ;;  %v2782_v1 = vld [vmem:[%s4034_s1 + $0x3a0] ss:$16 sps:$4 sm:$0xff]   ;;  %v2785_v2 = vld [vmem:[%s4034_s1 + $0x3a8] ss:$16 sps:$4 sm:$0xff]  }
  0x40   :  { %1702 = vmatprep.subr.bf16.mxu0 %v2706_v3  ;;  %1914 = vmatprep.subr.bf16.mxu1 %v2709_v4  ;;  %v2790_v3 = vld [vmem:[%s4034_s1 + $0x3c4] ss:$16 sps:$4 sm:$0xff]   ;;  %v2793_v4 = vld [vmem:[%s4034_s1 + $0x3cc] ss:$16 sps:$4 sm:$0xff]  }
  0x42   :  { %1682 = vmatmul.mubr.bf16.vlgmr.msra.gmra.mrb[0].mxu0 %v2285_v5  ;;  %1894 = vmatmul.mubr.bf16.vlgmr.msra.gmra.mrb[0].mxu1 %v2285_v5  ;;  %v2788_v5 = vld [vmem:[%s4034_s1 + $0x3c0] ss:$16 sps:$4 sm:$0xff]  }
  0x43   :  { %1703 = vmatpush1.bf16.msra.mxu0 %v2704_v6  ;;  %1915 = vmatpush1.bf16.msra.mxu1 %v2707_v7  ;;  %v2791_v6 = vld [vmem:[%s4034_s1 + $0x3c8] ss:$16 sps:$4 sm:$0xff]   ;;  %v2796_v7 = vld [vmem:[%s4034_s1 + $0x3e4] ss:$16 sps:$4 sm:$0xff]  }
  0x44   :  { %1704 = vmatprep.subr.bf16.mxu0 %v2712_v8  ;;  %1916 = vmatprep.subr.bf16.mxu1 %v2715_v9  ;;  %v2799_v8 = vld [vmem:[%s4034_s1 + $0x3ec] ss:$16 sps:$4 sm:$0xff]   ;;  %v2794_v9 = vld [vmem:[%s4034_s1 + $0x3e0] ss:$16 sps:$4 sm:$0xff]  }
  0x45   :  { %1691 = vmatprep.mubr.bf16.mxu0 %v2294_v28  ;;  %1903 = vmatprep.mubr.bf16.mxu1 %v2294_v28  ;;  %v2812_v28 = vld [vmem:[%s4034_s1 + $0x440] ss:$16 sps:$4 sm:$0xff]  }
  0x47   :  { %1705 = vmatpush1.bf16.msra.mxu0 %v2710_v10  ;;  %1917 = vmatpush1.bf16.msra.mxu1 %v2713_v11  ;;  %v2797_v10 = vld [vmem:[%s4034_s1 + $0x3e8] ss:$16 sps:$4 sm:$0xff]   ;;  %v2802_v11 = vld [vmem:[%s4034_s1 + $0x404] ss:$16 sps:$4 sm:$0xff]  }
  0x48   :  { %1706 = vmatprep.subr.bf16.mxu0 %v2718_v12  ;;  %1918 = vmatprep.subr.bf16.mxu1 %v2721_v13  ;;  %v2805_v12 = vld [vmem:[%s4034_s1 + $0x40c] ss:$16 sps:$4 sm:$0xff]   ;;  %v2800_v13 = vld [vmem:[%s4034_s1 + $0x400] ss:$16 sps:$4 sm:$0xff]  }
  0x4a   :  { %1692 = vmatmul.mubr.bf16.gmra.mrb[4].mxu0 %v2293_v31  ;;  %1904 = vmatmul.mubr.bf16.gmra.mrb[4].mxu1 %v2293_v31  ;;  %v2823_v31 = vld [vmem:[%s4034_s1 + $0x46c] ss:$16 sps:$4 sm:$0xff]  }
  0x4b   :  { %1707 = vmatpush1.bf16.msra.mxu0 %v2716_v14  ;;  %1919 = vmatpush1.bf16.msra.mxu1 %v2719_v15  ;;  %v2803_v14 = vld [vmem:[%s4034_s1 + $0x408] ss:$16 sps:$4 sm:$0xff]   ;;  %v2287_v15 = vcombine.low %v3311_v34, %v3316_v35  ;;  %v2826_v35 = vld [vmem:[%s4034_s1 + $0x484] ss:$16 sps:$4 sm:$0xff]  }
  0x4c   :  { %1708 = vmatprep.subr.bf16.mxu0 %v2724_v16  ;;  %1920 = vmatprep.subr.bf16.mxu1 %v2727_v17  ;;  %v26_v16 = vld [vmem:[%s4035_s0 + $0x48] sm:$0xff] }
  0x4d   :  { %1734 = vmatprep.mubr.bf16.mxu0 %v2288_v38  ;;  %1946 = vmatprep.mubr.bf16.mxu1 %v2288_v38  ;;  %v30_v17 = vld [vmem:[%s4035_s0 + $0x68] sm:$0xff] }
  0x4e   :  { %v2295_v26 = vcombine.low %v26_v16, %v30_v17  ;;  %v2821_v34 = vld [vmem:[%s4034_s1 + $0x468] ss:$16 sps:$4 sm:$0xff]  }
  0x4f   :  { %1709 = vmatpush1.bf16.msra.mxu0 %v2722_v18  ;;  %1921 = vmatpush1.bf16.msra.mxu1 %v2725_v19  ;;  %v2808_v18 = vld [vmem:[%s4034_s1 + $0x424] ss:$16 sps:$4 sm:$0xff]   ;;  %v2811_v19 = vld [vmem:[%s4034_s1 + $0x42c] ss:$16 sps:$4 sm:$0xff]   ;;  %v2827_v38 = vld [vmem:[%s4034_s1 + $0x488] ss:$16 sps:$4 sm:$0xff]  }
  0x50   :  { %1710 = vmatprep.subr.bf16.mxu0 %v2730_v20  ;;  %1922 = vmatprep.subr.bf16.mxu1 %v2733_v21  ;;  %v2296_v20 = vcombine.high %v26_v16, %v30_v17  ;;  %v2806_v21 = vld [vmem:[%s4034_s1 + $0x420] ss:$16 sps:$4 sm:$0xff]   ;;  %v2895_v16 = vld [vmem:[%s4034_s1 + $0x5ec] ss:$16 sps:$4 sm:$0xff]  }
  0x51   :  { %v2890_v17 = vld [vmem:[%s4034_s1 + $0x5e0] ss:$16 sps:$4 sm:$0xff]  }
  0x53   :  { %1711 = vmatpush1.bf16.msra.mxu0 %v2728_v22  ;;  %1923 = vmatpush1.bf16.msra.mxu1 %v2731_v23  ;;  %v2809_v22 = vld [vmem:[%s4034_s1 + $0x428] ss:$16 sps:$4 sm:$0xff]   ;;  %v2814_v23 = vld [vmem:[%s4034_s1 + $0x444] ss:$16 sps:$4 sm:$0xff]  }
  0x54   :  { %1712 = vmatprep.subr.bf16.mxu0 %v2736_v24  ;;  %1924 = vmatprep.subr.bf16.mxu1 %v2739_v25  ;;  %v2817_v24 = vld [vmem:[%s4034_s1 + $0x44c] ss:$16 sps:$4 sm:$0xff]   ;;  %v3475_v25 = vld [vmem:[%s4035_s0 + $0x10] sm:$0xff] }
  0x57   :  { %1713 = vmatpush1.bf16.msra.mxu0 %v2734_v29  ;;  %1925 = vmatpush1.bf16.msra.mxu1 %v2737_v30  ;;  %v2815_v29 = vld [vmem:[%s4034_s1 + $0x448] ss:$16 sps:$4 sm:$0xff]   ;;  %v2820_v30 = vld [vmem:[%s4034_s1 + $0x464] ss:$16 sps:$4 sm:$0xff]  }
  0x58   :  { %1714 = vmatprep.subr.bf16.mxu0 %v2742_v32  ;;  %1926 = vmatprep.subr.bf16.mxu1 %v2745_v33  ;;  %v2290_v32 = vcombine.high %v3475_v25, %v3480_v27  ;;  %v2818_v33 = vld [vmem:[%s4034_s1 + $0x460] ss:$16 sps:$4 sm:$0xff]  }
  0x5b   :  { %1715 = vmatpush1.bf16.msra.mxu0 %v2740_v36  ;;  %1927 = vmatpush1.bf16.msra.mxu1 %v2743_v37  ;;  %v2829_v36 = vld [vmem:[%s4034_s1 + $0x48c] ss:$16 sps:$4 sm:$0xff]   ;;  %v2824_v37 = vld [vmem:[%s4034_s1 + $0x480] ss:$16 sps:$4 sm:$0xff]  }
  0x5c   :  { %1716 = vmatprep.subr.bf16.mxu0 %v2748_v39  ;;  %1928 = vmatprep.subr.bf16.mxu1 %v2751_v40  ;;  %v2832_v39 = vld [vmem:[%s4034_s1 + $0x4a4] ss:$16 sps:$4 sm:$0xff]   ;;  %v2835_v40 = vld [vmem:[%s4034_s1 + $0x4ac] ss:$16 sps:$4 sm:$0xff]  }
  0x5f   :  { %1717 = vmatpush1.bf16.msra.mxu0 %v2746_v41  ;;  %1929 = vmatpush1.bf16.msra.mxu1 %v2749_v42  ;;  %v2830_v41 = vld [vmem:[%s4034_s1 + $0x4a0] ss:$16 sps:$4 sm:$0xff]   ;;  %v2833_v42 = vld [vmem:[%s4034_s1 + $0x4a8] ss:$16 sps:$4 sm:$0xff]  }
  0x60   :  { %1718 = vmatprep.subr.bf16.mxu0 %v2754_v43  ;;  %1930 = vmatprep.subr.bf16.mxu1 %v2757_v44  ;;  %v2838_v43 = vld [vmem:[%s4034_s1 + $0x4c4] ss:$16 sps:$4 sm:$0xff]   ;;  %v2841_v44 = vld [vmem:[%s4034_s1 + $0x4cc] ss:$16 sps:$4 sm:$0xff]  }
  0x63   :  { %1719 = vmatpush1.bf16.msra.mxu0 %v2752_v45  ;;  %1931 = vmatpush1.bf16.msra.mxu1 %v2755_v46  ;;  %v2836_v45 = vld [vmem:[%s4034_s1 + $0x4c0] ss:$16 sps:$4 sm:$0xff]   ;;  %v2839_v46 = vld [vmem:[%s4034_s1 + $0x4c8] ss:$16 sps:$4 sm:$0xff]  }
  0x64   :  { %1720 = vmatprep.subr.bf16.mxu0 %v2760_v47  ;;  %1932 = vmatprep.subr.bf16.mxu1 %v2763_v48  ;;  %v2844_v47 = vld [vmem:[%s4034_s1 + $0x4e4] ss:$16 sps:$4 sm:$0xff]   ;;  %v2847_v48 = vld [vmem:[%s4034_s1 + $0x4ec] ss:$16 sps:$4 sm:$0xff]  }
  0x67   :  { %1721 = vmatpush1.bf16.msra.mxu0 %v2758_v49  ;;  %1933 = vmatpush1.bf16.msra.mxu1 %v2761_v50  ;;  %v2842_v49 = vld [vmem:[%s4034_s1 + $0x4e0] ss:$16 sps:$4 sm:$0xff]   ;;  %v2845_v50 = vld [vmem:[%s4034_s1 + $0x4e8] ss:$16 sps:$4 sm:$0xff]  }
  0x68   :  { %1722 = vmatprep.subr.bf16.mxu0 %v2766_v51  ;;  %1934 = vmatprep.subr.bf16.mxu1 %v2769_v52  ;;  %v2850_v51 = vld [vmem:[%s4034_s1 + $0x504] ss:$16 sps:$4 sm:$0xff]   ;;  %v2853_v52 = vld [vmem:[%s4034_s1 + $0x50c] ss:$16 sps:$4 sm:$0xff]  }
  0x6b   :  { %1723 = vmatpush1.bf16.msra.mxu0 %v2764_v53  ;;  %1935 = vmatpush1.bf16.msra.mxu1 %v2767_v54  ;;  %v2848_v53 = vld [vmem:[%s4034_s1 + $0x500] ss:$16 sps:$4 sm:$0xff]   ;;  %v2851_v54 = vld [vmem:[%s4034_s1 + $0x508] ss:$16 sps:$4 sm:$0xff]  }
  0x6c   :  { %1724 = vmatprep.subr.bf16.mxu0 %v2772_v55  ;;  %1936 = vmatprep.subr.bf16.mxu1 %v2775_v56  ;;  %v2856_v55 = vld [vmem:[%s4034_s1 + $0x524] ss:$16 sps:$4 sm:$0xff]   ;;  %v2859_v56 = vld [vmem:[%s4034_s1 + $0x52c] ss:$16 sps:$4 sm:$0xff]  }
  0x6f   :  { %1725 = vmatpush1.bf16.msra.mxu0 %v2770_v57  ;;  %1937 = vmatpush1.bf16.msra.mxu1 %v2773_v58  ;;  %v2854_v57 = vld [vmem:[%s4034_s1 + $0x520] ss:$16 sps:$4 sm:$0xff]   ;;  %v2857_v58 = vld [vmem:[%s4034_s1 + $0x528] ss:$16 sps:$4 sm:$0xff]  }
  0x70   :  { %1726 = vmatprep.subr.bf16.mxu0 %v2778_v59  ;;  %1938 = vmatprep.subr.bf16.mxu1 %v2781_v60  ;;  %v2862_v59 = vld [vmem:[%s4034_s1 + $0x544] ss:$16 sps:$4 sm:$0xff]   ;;  %v2865_v60 = vld [vmem:[%s4034_s1 + $0x54c] ss:$16 sps:$4 sm:$0xff]  }
  0x73   :  { %1727 = vmatpush1.bf16.msra.mxu0 %v2776_v61  ;;  %1939 = vmatpush1.bf16.msra.mxu1 %v2779_v62  ;;  %v2860_v61 = vld [vmem:[%s4034_s1 + $0x540] ss:$16 sps:$4 sm:$0xff]   ;;  %v2863_v62 = vld [vmem:[%s4034_s1 + $0x548] ss:$16 sps:$4 sm:$0xff]  }
  0x74   :  { %1728 = vmatprep.subr.bf16.mxu0 %v2784_v63  ;;  %1940 = vmatprep.subr.bf16.mxu1 %v2787_v0  ;;  %v2868_v63 = vld [vmem:[%s4034_s1 + $0x564] ss:$16 sps:$4 sm:$0xff]   ;;  %v2871_v0 = vld [vmem:[%s4034_s1 + $0x56c] ss:$16 sps:$4 sm:$0xff]  }
  0x77   :  { %1729 = vmatpush1.bf16.msra.mxu0 %v2782_v1  ;;  %1941 = vmatpush1.bf16.msra.mxu1 %v2785_v2  ;;  %v2866_v1 = vld [vmem:[%s4034_s1 + $0x560] ss:$16 sps:$4 sm:$0xff]   ;;  %v2869_v2 = vld [vmem:[%s4034_s1 + $0x568] ss:$16 sps:$4 sm:$0xff]  }
  0x78   :  { %1730 = vmatprep.subr.bf16.mxu0 %v2790_v3  ;;  %1942 = vmatprep.subr.bf16.mxu1 %v2793_v4  ;;  %v2874_v3 = vld [vmem:[%s4034_s1 + $0x584] ss:$16 sps:$4 sm:$0xff]   ;;  %v2877_v4 = vld [vmem:[%s4034_s1 + $0x58c] ss:$16 sps:$4 sm:$0xff]  }
  0x7b   :  { %1731 = vmatpush1.bf16.msra.mxu0 %v2788_v5  ;;  %1943 = vmatpush1.bf16.msra.mxu1 %v2791_v6  ;;  %v2872_v5 = vld [vmem:[%s4034_s1 + $0x580] ss:$16 sps:$4 sm:$0xff]   ;;  %v2875_v6 = vld [vmem:[%s4034_s1 + $0x588] ss:$16 sps:$4 sm:$0xff]  }
  0x7c   :  { %1732 = vmatprep.subr.bf16.mxu0 %v2796_v7  ;;  %1944 = vmatprep.subr.bf16.mxu1 %v2799_v8  ;;  %v2880_v7 = vld [vmem:[%s4034_s1 + $0x5a4] ss:$16 sps:$4 sm:$0xff]   ;;  %v2883_v8 = vld [vmem:[%s4034_s1 + $0x5ac] ss:$16 sps:$4 sm:$0xff]  }
  0x7f   :  { %1733 = vmatpush1.bf16.msra.mxu0 %v2794_v9  ;;  %1945 = vmatpush1.bf16.msra.mxu1 %v2797_v10  ;;  %v2878_v9 = vld [vmem:[%s4034_s1 + $0x5a0] ss:$16 sps:$4 sm:$0xff]   ;;  %v2881_v10 = vld [vmem:[%s4034_s1 + $0x5a8] ss:$16 sps:$4 sm:$0xff]  }
  0x80   :  { %1755 = vmatprep.subr.bf16.mxu0 %v2802_v11  ;;  %1967 = vmatprep.subr.bf16.mxu1 %v2805_v12  ;;  %v2886_v11 = vld [vmem:[%s4034_s1 + $0x5c4] ss:$16 sps:$4 sm:$0xff]   ;;  %v2889_v12 = vld [vmem:[%s4034_s1 + $0x5cc] ss:$16 sps:$4 sm:$0xff]  }
  0x82   :  { %1735 = vmatmul.mubr.bf16.vlgmr.msra.gmra.mrb[0].mxu0 %v2287_v15  ;;  %1947 = vmatmul.mubr.bf16.vlgmr.msra.gmra.mrb[0].mxu1 %v2287_v15  ;;  %v2892_v15 = vld [vmem:[%s4034_s1 + $0x5e4] ss:$16 sps:$4 sm:$0xff]  }
  0x83   :  { %1756 = vmatpush1.bf16.msra.mxu0 %v2800_v13  ;;  %1968 = vmatpush1.bf16.msra.mxu1 %v2803_v14  ;;  %v2884_v13 = vld [vmem:[%s4034_s1 + $0x5c0] ss:$16 sps:$4 sm:$0xff]   ;;  %v2887_v14 = vld [vmem:[%s4034_s1 + $0x5c8] ss:$16 sps:$4 sm:$0xff]  }
  0x84   :  { %1757 = vmatprep.subr.bf16.mxu0 %v2808_v18  ;;  %1969 = vmatprep.subr.bf16.mxu1 %v2811_v19  ;;  %v2893_v18 = vld [vmem:[%s4034_s1 + $0x5e8] ss:$16 sps:$4 sm:$0xff]   ;;  %v2898_v19 = vld [vmem:[%s4034_s1 + $0x604] ss:$16 sps:$4 sm:$0xff]  }
  0x85   :  { %1744 = vmatprep.mubr.bf16.mxu0 %v2296_v20  ;;  %1956 = vmatprep.mubr.bf16.mxu1 %v2296_v20  ;;  %v2901_v20 = vld [vmem:[%s4034_s1 + $0x60c] ss:$16 sps:$4 sm:$0xff]  }
  0x87   :  { %1758 = vmatpush1.bf16.msra.mxu0 %v2806_v21  ;;  %1970 = vmatpush1.bf16.msra.mxu1 %v2809_v22  ;;  %v2289_v21 = vcombine.low %v3475_v25, %v3480_v27  ;;  %v27_v22 = vld [vmem:[%s4035_s0 + $0x50] sm:$0xff]  ;;  %v2907_v27 = vld [vmem:[%s4034_s1 + $0x62c] ss:$16 sps:$4 sm:$0xff]  }
  0x88   :  { %1759 = vmatprep.subr.bf16.mxu0 %v2814_v23  ;;  %1971 = vmatprep.subr.bf16.mxu1 %v2817_v24  ;;  %v31_v23 = vld [vmem:[%s4035_s0 + $0x70] sm:$0xff] }
  0x89   :  { %v2896_v24 = vld [vmem:[%s4034_s1 + $0x600] ss:$16 sps:$4 sm:$0xff]   ;;  %v2904_v25 = vld [vmem:[%s4034_s1 + $0x624] ss:$16 sps:$4 sm:$0xff]  }
  0x8a   :  { %1745 = vmatmul.mubr.bf16.gmra.mrb[4].mxu0 %v2295_v26  ;;  %1957 = vmatmul.mubr.bf16.gmra.mrb[4].mxu1 %v2295_v26  ;;  %v2899_v26 = vld [vmem:[%s4034_s1 + $0x608] ss:$16 sps:$4 sm:$0xff]  }
  0x8b   :  { %1760 = vmatpush1.bf16.msra.mxu0 %v2812_v28  ;;  %1972 = vmatpush1.bf16.msra.mxu1 %v2815_v29  ;;  %v2298_v28 = vcombine.high %v27_v22, %v31_v23  ;;  %v2902_v29 = vld [vmem:[%s4034_s1 + $0x620] ss:$16 sps:$4 sm:$0xff]  }
  0x8c   :  { %1761 = vmatprep.subr.bf16.mxu0 %v2820_v30  ;;  %1973 = vmatprep.subr.bf16.mxu1 %v2823_v31  ;;  %v2905_v30 = vld [vmem:[%s4034_s1 + $0x628] ss:$16 sps:$4 sm:$0xff]   ;;  %v2910_v31 = vld [vmem:[%s4034_s1 + $0x644] ss:$16 sps:$4 sm:$0xff]  }
  0x8d   :  { %1787 = vmatprep.mubr.bf16.mxu0 %v2290_v32  ;;  %1999 = vmatprep.mubr.bf16.mxu1 %v2290_v32  ;;  %v2913_v32 = vld [vmem:[%s4034_s1 + $0x64c] ss:$16 sps:$4 sm:$0xff]  }
  0x8f   :  { %1762 = vmatpush1.bf16.msra.mxu0 %v2818_v33  ;;  %1974 = vmatpush1.bf16.msra.mxu1 %v2821_v34  ;;  %v2297_v33 = vcombine.low %v27_v22, %v31_v23  ;;  %v3687_v34 = vld [vmem:[%s4035_s0 + $0x18] sm:$0xff]  ;;  %v2988_v23 = vld [vmem:[%s4034_s1 + $0x7e4] ss:$16 sps:$4 sm:$0xff]  }
  0x90   :  { %1763 = vmatprep.subr.bf16.mxu0 %v2826_v35  ;;  %1975 = vmatprep.subr.bf16.mxu1 %v2829_v36  ;;  %v3692_v35 = vld [vmem:[%s4035_s0 + $0x38] sm:$0xff]  ;;  %v2908_v36 = vld [vmem:[%s4034_s1 + $0x640] ss:$16 sps:$4 sm:$0xff]  }
  0x91   :  { %v2983_v22 = vld [vmem:[%s4034_s1 + $0x7c8] ss:$16 sps:$4 sm:$0xff]  }
  0x93   :  { %1764 = vmatpush1.bf16.msra.mxu0 %v2824_v37  ;;  %1976 = vmatpush1.bf16.msra.mxu1 %v2827_v38  ;;  %v2911_v37 = vld [vmem:[%s4034_s1 + $0x648] ss:$16 sps:$4 sm:$0xff]   ;;  %v2916_v38 = vld [vmem:[%s4034_s1 + $0x664] ss:$16 sps:$4 sm:$0xff]  }
  0x94   :  { %1765 = vmatprep.subr.bf16.mxu0 %v2832_v39  ;;  %1977 = vmatprep.subr.bf16.mxu1 %v2835_v40  ;;  %v2919_v39 = vld [vmem:[%s4034_s1 + $0x66c] ss:$16 sps:$4 sm:$0xff]   ;;  %v2292_v40 = vcombine.high %v3687_v34, %v3692_v35 }
  0x97   :  { %1766 = vmatpush1.bf16.msra.mxu0 %v2830_v41  ;;  %1978 = vmatpush1.bf16.msra.mxu1 %v2833_v42  ;;  %v2914_v41 = vld [vmem:[%s4034_s1 + $0x660] ss:$16 sps:$4 sm:$0xff]   ;;  %v2917_v42 = vld [vmem:[%s4034_s1 + $0x668] ss:$16 sps:$4 sm:$0xff]  }
  0x98   :  { %1767 = vmatprep.subr.bf16.mxu0 %v2838_v43  ;;  %1979 = vmatprep.subr.bf16.mxu1 %v2841_v44  ;;  %v2922_v43 = vld [vmem:[%s4034_s1 + $0x684] ss:$16 sps:$4 sm:$0xff]   ;;  %v2925_v44 = vld [vmem:[%s4034_s1 + $0x68c] ss:$16 sps:$4 sm:$0xff]  }
  0x9b   :  { %1768 = vmatpush1.bf16.msra.mxu0 %v2836_v45  ;;  %1980 = vmatpush1.bf16.msra.mxu1 %v2839_v46  ;;  %v2920_v45 = vld [vmem:[%s4034_s1 + $0x680] ss:$16 sps:$4 sm:$0xff]   ;;  %v2923_v46 = vld [vmem:[%s4034_s1 + $0x688] ss:$16 sps:$4 sm:$0xff]  }
  0x9c   :  { %1769 = vmatprep.subr.bf16.mxu0 %v2844_v47  ;;  %1981 = vmatprep.subr.bf16.mxu1 %v2847_v48  ;;  %v2928_v47 = vld [vmem:[%s4034_s1 + $0x6a4] ss:$16 sps:$4 sm:$0xff]   ;;  %v2931_v48 = vld [vmem:[%s4034_s1 + $0x6ac] ss:$16 sps:$4 sm:$0xff]  }
  0x9f   :  { %1770 = vmatpush1.bf16.msra.mxu0 %v2842_v49  ;;  %1982 = vmatpush1.bf16.msra.mxu1 %v2845_v50  ;;  %v2926_v49 = vld [vmem:[%s4034_s1 + $0x6a0] ss:$16 sps:$4 sm:$0xff]   ;;  %v2929_v50 = vld [vmem:[%s4034_s1 + $0x6a8] ss:$16 sps:$4 sm:$0xff]  }
  0xa0   :  { %1771 = vmatprep.subr.bf16.mxu0 %v2850_v51  ;;  %1983 = vmatprep.subr.bf16.mxu1 %v2853_v52  ;;  %v2934_v51 = vld [vmem:[%s4034_s1 + $0x6c4] ss:$16 sps:$4 sm:$0xff]   ;;  %v2937_v52 = vld [vmem:[%s4034_s1 + $0x6cc] ss:$16 sps:$4 sm:$0xff]  }
  0xa3   :  { %1772 = vmatpush1.bf16.msra.mxu0 %v2848_v53  ;;  %1984 = vmatpush1.bf16.msra.mxu1 %v2851_v54  ;;  %v2932_v53 = vld [vmem:[%s4034_s1 + $0x6c0] ss:$16 sps:$4 sm:$0xff]   ;;  %v2935_v54 = vld [vmem:[%s4034_s1 + $0x6c8] ss:$16 sps:$4 sm:$0xff]  }
  0xa4   :  { %1773 = vmatprep.subr.bf16.mxu0 %v2856_v55  ;;  %1985 = vmatprep.subr.bf16.mxu1 %v2859_v56  ;;  %v2940_v55 = vld [vmem:[%s4034_s1 + $0x6e4] ss:$16 sps:$4 sm:$0xff]   ;;  %v2943_v56 = vld [vmem:[%s4034_s1 + $0x6ec] ss:$16 sps:$4 sm:$0xff]  }
  0xa7   :  { %1774 = vmatpush1.bf16.msra.mxu0 %v2854_v57  ;;  %1986 = vmatpush1.bf16.msra.mxu1 %v2857_v58  ;;  %v2938_v57 = vld [vmem:[%s4034_s1 + $0x6e0] ss:$16 sps:$4 sm:$0xff]   ;;  %v2941_v58 = vld [vmem:[%s4034_s1 + $0x6e8] ss:$16 sps:$4 sm:$0xff]  }
  0xa8   :  { %1775 = vmatprep.subr.bf16.mxu0 %v2862_v59  ;;  %1987 = vmatprep.subr.bf16.mxu1 %v2865_v60  ;;  %v2946_v59 = vld [vmem:[%s4034_s1 + $0x704] ss:$16 sps:$4 sm:$0xff]   ;;  %v2949_v60 = vld [vmem:[%s4034_s1 + $0x70c] ss:$16 sps:$4 sm:$0xff]  }
  0xab   :  { %1776 = vmatpush1.bf16.msra.mxu0 %v2860_v61  ;;  %1988 = vmatpush1.bf16.msra.mxu1 %v2863_v62  ;;  %v2944_v61 = vld [vmem:[%s4034_s1 + $0x700] ss:$16 sps:$4 sm:$0xff]   ;;  %v2947_v62 = vld [vmem:[%s4034_s1 + $0x708] ss:$16 sps:$4 sm:$0xff]  }
  0xac   :  { %1777 = vmatprep.subr.bf16.mxu0 %v2868_v63  ;;  %1989 = vmatprep.subr.bf16.mxu1 %v2871_v0  ;;  %v2952_v63 = vld [vmem:[%s4034_s1 + $0x724] ss:$16 sps:$4 sm:$0xff]   ;;  %v2955_v0 = vld [vmem:[%s4034_s1 + $0x72c] ss:$16 sps:$4 sm:$0xff]  }
  0xaf   :  { %1778 = vmatpush1.bf16.msra.mxu0 %v2866_v1  ;;  %1990 = vmatpush1.bf16.msra.mxu1 %v2869_v2  ;;  %v2950_v1 = vld [vmem:[%s4034_s1 + $0x720] ss:$16 sps:$4 sm:$0xff]   ;;  %v2953_v2 = vld [vmem:[%s4034_s1 + $0x728] ss:$16 sps:$4 sm:$0xff]  }
  0xb0   :  { %1779 = vmatprep.subr.bf16.mxu0 %v2874_v3  ;;  %1991 = vmatprep.subr.bf16.mxu1 %v2877_v4  ;;  %v2958_v3 = vld [vmem:[%s4034_s1 + $0x744] ss:$16 sps:$4 sm:$0xff]   ;;  %v2961_v4 = vld [vmem:[%s4034_s1 + $0x74c] ss:$16 sps:$4 sm:$0xff]  }
  0xb3   :  { %1780 = vmatpush1.bf16.msra.mxu0 %v2872_v5  ;;  %1992 = vmatpush1.bf16.msra.mxu1 %v2875_v6  ;;  %v2956_v5 = vld [vmem:[%s4034_s1 + $0x740] ss:$16 sps:$4 sm:$0xff]   ;;  %v2959_v6 = vld [vmem:[%s4034_s1 + $0x748] ss:$16 sps:$4 sm:$0xff]  }
  0xb4   :  { %1781 = vmatprep.subr.bf16.mxu0 %v2880_v7  ;;  %1993 = vmatprep.subr.bf16.mxu1 %v2883_v8  ;;  %v2964_v7 = vld [vmem:[%s4034_s1 + $0x764] ss:$16 sps:$4 sm:$0xff]   ;;  %v2967_v8 = vld [vmem:[%s4034_s1 + $0x76c] ss:$16 sps:$4 sm:$0xff]  }
  0xb7   :  { %1782 = vmatpush1.bf16.msra.mxu0 %v2878_v9  ;;  %1994 = vmatpush1.bf16.msra.mxu1 %v2881_v10  ;;  %v2962_v9 = vld [vmem:[%s4034_s1 + $0x760] ss:$16 sps:$4 sm:$0xff]   ;;  %v2965_v10 = vld [vmem:[%s4034_s1 + $0x768] ss:$16 sps:$4 sm:$0xff]  }
  0xb8   :  { %1783 = vmatprep.subr.bf16.mxu0 %v2886_v11  ;;  %1995 = vmatprep.subr.bf16.mxu1 %v2889_v12  ;;  %v2970_v11 = vld [vmem:[%s4034_s1 + $0x784] ss:$16 sps:$4 sm:$0xff]   ;;  %v2973_v12 = vld [vmem:[%s4034_s1 + $0x78c] ss:$16 sps:$4 sm:$0xff]  }
  0xbb   :  { %1784 = vmatpush1.bf16.msra.mxu0 %v2884_v13  ;;  %1996 = vmatpush1.bf16.msra.mxu1 %v2887_v14  ;;  %v2968_v13 = vld [vmem:[%s4034_s1 + $0x780] ss:$16 sps:$4 sm:$0xff]   ;;  %v2971_v14 = vld [vmem:[%s4034_s1 + $0x788] ss:$16 sps:$4 sm:$0xff]  }
  0xbc   :  { %1785 = vmatprep.subr.bf16.mxu0 %v2892_v15  ;;  %1997 = vmatprep.subr.bf16.mxu1 %v2895_v16  ;;  %v2976_v15 = vld [vmem:[%s4034_s1 + $0x7a4] ss:$16 sps:$4 sm:$0xff]   ;;  %v2979_v16 = vld [vmem:[%s4034_s1 + $0x7ac] ss:$16 sps:$4 sm:$0xff]  }
  0xbf   :  { %1786 = vmatpush1.bf16.msra.mxu0 %v2890_v17  ;;  %1998 = vmatpush1.bf16.msra.mxu1 %v2893_v18  ;;  %v2974_v17 = vld [vmem:[%s4034_s1 + $0x7a0] ss:$16 sps:$4 sm:$0xff]   ;;  %v2977_v18 = vld [vmem:[%s4034_s1 + $0x7a8] ss:$16 sps:$4 sm:$0xff]  }
  0xc0   :  { %1808 = vmatprep.subr.bf16.mxu0 %v2898_v19  ;;  %2020 = vmatprep.subr.bf16.mxu1 %v2901_v20  ;;  %v2982_v19 = vld [vmem:[%s4034_s1 + $0x7c4] ss:$16 sps:$4 sm:$0xff]   ;;  %v2985_v20 = vld [vmem:[%s4034_s1 + $0x7cc] ss:$16 sps:$4 sm:$0xff]  }
  0xc2   :  { %1788 = vmatmul.mubr.bf16.vlgmr.msra.gmra.mrb[0].mxu0 %v2289_v21  ;;  %2000 = vmatmul.mubr.bf16.vlgmr.msra.gmra.mrb[0].mxu1 %v2289_v21  ;;  %v2980_v21 = vld [vmem:[%s4034_s1 + $0x7c0] ss:$16 sps:$4 sm:$0xff]  }
  0xc3   :  { %1809 = vmatpush1.bf16.msra.mxu0 %v2896_v24  ;;  %2021 = vmatpush1.bf16.msra.mxu1 %v2899_v26  ;;  %v2991_v24 = vld [vmem:[%s4034_s1 + $0x7ec] ss:$16 sps:$4 sm:$0xff]   ;;  %v2986_v26 = vld [vmem:[%s4034_s1 + $0x7e0] ss:$16 sps:$4 sm:$0xff]  }
  0xc4   :  { %1810 = vmatprep.subr.bf16.mxu0 %v2904_v25  ;;  %2022 = vmatprep.subr.bf16.mxu1 %v2907_v27  ;;  %v2989_v25 = vld [vmem:[%s4034_s1 + $0x7e8] ss:$16 sps:$4 sm:$0xff]  }
  0xc5   :  { %1797 = vmatprep.mubr.bf16.mxu0 %v2298_v28  ;;  %2009 = vmatprep.mubr.bf16.mxu1 %v2298_v28  ;;  %v28_v27 = vld [vmem:[%s4035_s0 + $0x58] sm:$0xff] }
  0xc6   :  { %v32_v28 = vld [vmem:[%s4035_s0 + $0x78] sm:$0xff] }
  0xc7   :  { %1811 = vmatpush1.bf16.msra.mxu0 %v2902_v29  ;;  %2023 = vmatpush1.bf16.msra.mxu1 %v2905_v30  ;;  %v2291_v29 = vcombine.low %v3687_v34, %v3692_v35  ;;  %v2300_v30 = vcombine.high %v28_v27, %v32_v28 }
  0xc8   :  { %1812 = vmatprep.subr.bf16.mxu0 %v2910_v31  ;;  %2024 = vmatprep.subr.bf16.mxu1 %v2913_v32  ;;  %v2299_v31 = vcombine.low %v28_v27, %v32_v28 }
  0xca   :  { %1798 = vmatmul.mubr.bf16.gmra.mrb[4].mxu0 %v2297_v33  ;;  %2010 = vmatmul.mubr.bf16.gmra.mrb[4].mxu1 %v2297_v33 }
  0xcb   :  { %1813 = vmatpush1.bf16.msra.mxu0 %v2908_v36  ;;  %2025 = vmatpush1.bf16.msra.mxu1 %v2911_v37 }
  0xcc   :  { %1814 = vmatprep.subr.bf16.mxu0 %v2916_v38  ;;  %2026 = vmatprep.subr.bf16.mxu1 %v2919_v39 }
  0xcd   :  { %1840 = vmatprep.mubr.bf16.mxu0 %v2292_v40  ;;  %2052 = vmatprep.mubr.bf16.mxu1 %v2292_v40 }
  0xcf   :  { %1815 = vmatpush1.bf16.msra.mxu0 %v2914_v41  ;;  %2027 = vmatpush1.bf16.msra.mxu1 %v2917_v42 }
  0xd0   :  { %1816 = vmatprep.subr.bf16.mxu0 %v2922_v43  ;;  %2028 = vmatprep.subr.bf16.mxu1 %v2925_v44 }
  0xd3   :  { %1817 = vmatpush1.bf16.msra.mxu0 %v2920_v45  ;;  %2029 = vmatpush1.bf16.msra.mxu1 %v2923_v46 }
  0xd4   :  { %1818 = vmatprep.subr.bf16.mxu0 %v2928_v47  ;;  %2030 = vmatprep.subr.bf16.mxu1 %v2931_v48 }
  0xd7   :  { %1819 = vmatpush1.bf16.msra.mxu0 %v2926_v49  ;;  %2031 = vmatpush1.bf16.msra.mxu1 %v2929_v50 }
  0xd8   :  { %1820 = vmatprep.subr.bf16.mxu0 %v2934_v51  ;;  %2032 = vmatprep.subr.bf16.mxu1 %v2937_v52 }
  0xdb   :  { %1821 = vmatpush1.bf16.msra.mxu0 %v2932_v53  ;;  %2033 = vmatpush1.bf16.msra.mxu1 %v2935_v54 }
  0xdc   :  { %1822 = vmatprep.subr.bf16.mxu0 %v2940_v55  ;;  %2034 = vmatprep.subr.bf16.mxu1 %v2943_v56 }
  0xdf   :  { %1823 = vmatpush1.bf16.msra.mxu0 %v2938_v57  ;;  %2035 = vmatpush1.bf16.msra.mxu1 %v2941_v58 }
  0xe0   :  { %1824 = vmatprep.subr.bf16.mxu0 %v2946_v59  ;;  %2036 = vmatprep.subr.bf16.mxu1 %v2949_v60 }
  0xe3   :  { %1825 = vmatpush1.bf16.msra.mxu0 %v2944_v61  ;;  %2037 = vmatpush1.bf16.msra.mxu1 %v2947_v62 }
  0xe4   :  { %1826 = vmatprep.subr.bf16.mxu0 %v2952_v63  ;;  %2038 = vmatprep.subr.bf16.mxu1 %v2955_v0 }
  0xe7   :  { %1827 = vmatpush1.bf16.msra.mxu0 %v2950_v1  ;;  %2039 = vmatpush1.bf16.msra.mxu1 %v2953_v2 }
  0xe8   :  { %1828 = vmatprep.subr.bf16.mxu0 %v2958_v3  ;;  %2040 = vmatprep.subr.bf16.mxu1 %v2961_v4 }
  0xeb   :  { %1829 = vmatpush1.bf16.msra.mxu0 %v2956_v5  ;;  %2041 = vmatpush1.bf16.msra.mxu1 %v2959_v6 }
  0xec   :  { %1830 = vmatprep.subr.bf16.mxu0 %v2964_v7  ;;  %2042 = vmatprep.subr.bf16.mxu1 %v2967_v8 }
  0xef   :  { %1831 = vmatpush1.bf16.msra.mxu0 %v2962_v9  ;;  %2043 = vmatpush1.bf16.msra.mxu1 %v2965_v10 }
  0xf0   :  { %1832 = vmatprep.subr.bf16.mxu0 %v2970_v11  ;;  %2044 = vmatprep.subr.bf16.mxu1 %v2973_v12 }
  0xf3   :  { %1833 = vmatpush1.bf16.msra.mxu0 %v2968_v13  ;;  %2045 = vmatpush1.bf16.msra.mxu1 %v2971_v14 }
  0xf4   :  { %1834 = vmatprep.subr.bf16.mxu0 %v2976_v15  ;;  %2046 = vmatprep.subr.bf16.mxu1 %v2979_v16 }
  0xf7   :  { %1835 = vmatpush1.bf16.msra.mxu0 %v2974_v17  ;;  %2047 = vmatpush1.bf16.msra.mxu1 %v2977_v18 }
  0xf8   :  { %1836 = vmatprep.subr.bf16.mxu0 %v2982_v19  ;;  %2048 = vmatprep.subr.bf16.mxu1 %v2985_v20 }
  0xfb   :  { %1837 = vmatpush1.bf16.msra.mxu0 %v2980_v21  ;;  %2049 = vmatpush1.bf16.msra.mxu1 %v2983_v22 }
  0xfc   :  { %1838 = vmatprep.subr.bf16.mxu0 %v2988_v23  ;;  %2050 = vmatprep.subr.bf16.mxu1 %v2991_v24  ;;  %v3000_v24 = vmov 0  }
  0xfd   :  { %2607 = vset.pattern.permute.xlu1 %v3000_v24  ;;  %2606 = vset.pattern.permute.xlu0 %v3000_v24 }
  0xff   :  { %1839 = vmatpush1.bf16.msra.mxu0 %v2986_v26  ;;  %2051 = vmatpush1.bf16.msra.mxu1 %v2989_v25 }
 0x102   :  { %1841 = vmatmul.mubr.bf16.vlgmr.msra.gmra.mrb[0].mxu0 %v2291_v29  ;;  %2053 = vmatmul.mubr.bf16.vlgmr.msra.gmra.mrb[0].mxu1 %v2291_v29 }
 0x103   :  { %1850 = vmatprep.mubr.bf16.mxu0 %v2300_v30  ;;  %2062 = vmatprep.mubr.bf16.mxu1 %v2300_v30 }
 0x10a   :  { %1851 = vmatmul.mubr.bf16.gmra.mrb[4].mxu0 %v2299_v31  ;;  %2063 = vmatmul.mubr.bf16.gmra.mrb[4].mxu1 %v2299_v31 }
 0x1d5   :  { %v3866_v32 = vpop.f32.mrb[0].mxu0  ;;  %v3868_v33 = vpop.f32.mrb[0].mxu1 }
 0x1d6   :  { %v2097_v36 = vmul.f32 %v3866_v32, %v3866_v32  ;;  %v3872_v37 = vpop.f32.mrb[1].mxu0  ;;  %v3874_v34 = vpop.f32.mrb[1].mxu1  ;;  %v2099_v47 = vmul.f32 %v3868_v33, %v3868_v33 }
 0x1d7   :  { %v2073_v35 = vadd.f32 %v3872_v37, %v3866_v32  ;;  %v2098_v38 = vmul.f32 %v3872_v37, %v3872_v37  ;;  %v3880_v39 = vpop.f32.mrb[2].mxu0  ;;  %v3882_v40 = vpop.f32.mrb[2].mxu1  ;;  %v2100_v53 = vmul.f32 %v3874_v34, %v3874_v34 }
 0x1d8   :  { %v2101_v41 = vmul.f32 %v3880_v39, %v3880_v39  ;;  %v3886_v42 = vpop.f32.mrb[3].mxu0  ;;  %v3888_v43 = vpop.f32.mrb[3].mxu1  ;;  %v2103_v49 = vmul.f32 %v3882_v40, %v3882_v40 }
 0x1d9   :  { %v2078_v44 = vadd.f32 %v3886_v42, %v3880_v39  ;;  %v2102_v45 = vmul.f32 %v3886_v42, %v3886_v42  ;;  %v2074_v46 = vadd.f32 %v2073_v35, %v3868_v33  ;;  %v2113_v48 = vadd.f32 %v2098_v38, %v2097_v36 }
 0x1da   :  { %v2104_v57 = vmul.f32 %v3888_v43, %v3888_v43 }
 0x1db   :  { %v2075_v50 = vadd.f32 %v2074_v46, %v3874_v34  ;;  %v2118_v51 = vadd.f32 %v2102_v45, %v2101_v41  ;;  %v2079_v52 = vadd.f32 %v2078_v44, %v3882_v40  ;;  %v2114_v54 = vadd.f32 %v2113_v48, %v2099_v47 }
 0x1dd   :  { %v3903_v55 = vpop.f32.mrb[4].mxu1  ;;  %2076 = vadd.xlane.f32.xlu0 %v2075_v50  ;;  %v3905_v56 = vpop.f32.mrb[4].mxu0  ;;  %v2119_v58 = vadd.f32 %v2118_v51, %v2103_v49  ;;  %v2080_v59 = vadd.f32 %v2079_v52, %v3888_v43  ;;  %v2115_v63 = vadd.f32 %v2114_v54, %v2100_v53 }
 0x1de   :  { %v2105_v60 = vmul.f32 %v3905_v56, %v3905_v56  ;;  %v3912_v61 = vpop.f32.mrb[5].mxu0  ;;  %v3914_v62 = vpop.f32.mrb[5].mxu1  ;;  %v2107_v10 = vmul.f32 %v3903_v55, %v3903_v55 }
 0x1df   :  { %v2083_v0 = vadd.f32 %v3912_v61, %v3905_v56  ;;  %v2106_v1 = vmul.f32 %v3912_v61, %v3912_v61  ;;  %v3920_v2 = vpop.f32.mrb[6].mxu0  ;;  %v3922_v3 = vpop.f32.mrb[6].mxu1  ;;  %v2120_v4 = vadd.f32 %v2119_v58, %v2104_v57  ;;  %v2108_v17 = vmul.f32 %v3914_v62, %v3914_v62 }
 0x1e0   :  { %v2109_v5 = vmul.f32 %v3920_v2, %v3920_v2  ;;  %v3926_v6 = vpop.f32.mrb[7].mxu0  ;;  %v3928_v7 = vpop.f32.mrb[7].mxu1  ;;  %v2111_v13 = vmul.f32 %v3922_v3, %v3922_v3 }
 0x1e1   :  { %v2088_v8 = vadd.f32 %v3926_v6, %v3920_v2  ;;  %v2110_v9 = vmul.f32 %v3926_v6, %v3926_v6  ;;  %2121 = vadd.xlane.f32.xlu1 %v2120_v4  ;;  %2081 = vadd.xlane.f32.xlu0 %v2080_v59  ;;  %v2084_v11 = vadd.f32 %v2083_v0, %v3903_v55  ;;  %v2150_v4 = vld [vmem:[%s4036_s2 + $0x8] sm:$0xff] }
 0x1e2   :  { %v2123_v12 = vadd.f32 %v2106_v1, %v2105_v60  ;;  %v2112_v19 = vmul.f32 %v3928_v7, %v3928_v7 }
 0x1e3   :  { %v2128_v14 = vadd.f32 %v2110_v9, %v2109_v5  ;;  %v2089_v15 = vadd.f32 %v2088_v8, %v3922_v3  ;;  %v2085_v16 = vadd.f32 %v2084_v11, %v3914_v62 }
 0x1e4   :  { %v2124_v18 = vadd.f32 %v2123_v12, %v2107_v10  ;;  %v2149_v10 = vld [vmem:[%s4036_s2] sm:$0xff] }
 0x1e5   :  { %2116 = vadd.xlane.f32.xlu0 %v2115_v63  ;;  %v2090_v20 = vadd.f32 %v2089_v15, %v3928_v7  ;;  %v2129_v21 = vadd.f32 %v2128_v14, %v2111_v13  ;;  %2086 = vadd.xlane.f32.xlu1 %v2085_v16  ;;  %v2165_v15 = vld [vmem:[%s4037_s3] sm:$0xff] }
 0x1e6   :  { %v2125_v22 = vadd.f32 %v2124_v18, %v2108_v17 }
 0x1e7   :  { %v2130_v23 = vadd.f32 %v2129_v21, %v2112_v19  ;;  %v2166_v19 = vld [vmem:[%s4037_s3 + $0x8] sm:$0xff] }
 0x1e9   :  { %2126 = vadd.xlane.f32.xlu0 %v2125_v22  ;;  %2091 = vadd.xlane.f32.xlu1 %v2090_v20  ;;  %v2151_v22 = vld [vmem:[%s4036_s2 + $0x10] sm:$0xff] }
 0x1ed   :  { %2131 = vadd.xlane.f32.xlu1 %v2130_v23 }
 0x26a   :  { %v2077_v26 = vpop.xlane.xlu0 %2076 }
 0x26b   :  { %v2093_v28 = vmul.f32 0.0025510204, %v2077_v26  ;;  %v2152_v26 = vld [vmem:[%s4036_s2 + $0x18] sm:$0xff] }
 0x26d   :  { %v2137_v35 = vmul.f32 %v2093_v28, %v2093_v28 }
 0x26e   :  { %v2122_v25 = vpop.xlane.xlu1 %2121  ;;  %v2082_v27 = vpop.xlane.xlu0 %2081 }
 0x26f   :  { %v2094_v29 = vmul.f32 0.0025510204, %v2082_v27  ;;  %v2134_v30 = vmul.f32 0.0025510204, %v2122_v25 }
 0x271   :  { %v2138_v31 = vmul.f32 %v2094_v29, %v2094_v29 }
 0x272   :  { %v2117_v36 = vpop.xlane.xlu0 %2116  ;;  %v2087_v44 = vpop.xlane.xlu1 %2086 }
 0x273   :  { %v2142_v38 = vsub.f32 %v2134_v30, %v2138_v31  ;;  %v2133_v41 = vmul.f32 0.0025510204, %v2117_v36  ;;  %v2095_v45 = vmul.f32 0.0025510204, %v2087_v44  ;;  %v2168_v31 = vld [vmem:[%s4037_s3 + $0x18] sm:$0xff] }
 0x275   :  { %v2146_v46 = vmax.f32 %v2142_v38, 0.0  ;;  %v2141_v47 = vsub.f32 %v2133_v41, %v2137_v35  ;;  %v2139_v51 = vmul.f32 %v2095_v45, %v2095_v45 }
 0x276   :  { %v2127_v48 = vpop.xlane.xlu0 %2126  ;;  %v2092_v53 = vpop.xlane.xlu1 %2091 }
 0x277   :  { %v2154_v49 = vadd.f32 1e-05, %v2146_v46  ;;  %v2145_v50 = vmax.f32 %v2141_v47, 0.0  ;;  %v2135_v52 = vmul.f32 0.0025510204, %v2127_v48 }
 0x278   :  { %v2096_v54 = vmul.f32 0.0025510204, %v2092_v53 }
 0x279   :  { %2992 = vrsqrt.f32 %v2154_v49  ;;  %v2153_v57 = vadd.f32 1e-05, %v2145_v50  ;;  %v2143_v58 = vsub.f32 %v2135_v52, %v2139_v51 }
 0x27a   :  { %v2132_v59 = vpop.xlane.xlu1 %2131  ;;  %v2140_v60 = vmul.f32 %v2096_v54, %v2096_v54 }
 0x27b   :  { %2994 = vrsqrt.f32 %v2153_v57  ;;  %v2136_v63 = vmul.f32 0.0025510204, %v2132_v59  ;;  %v2147_v0 = vmax.f32 %v2143_v58, 0.0 }
 0x27d   :  { %v2144_v1 = vsub.f32 %v2136_v63, %v2140_v60  ;;  %v2155_v5 = vadd.f32 1e-05, %v2147_v0 }
 0x27f   :  { %v2148_v8 = vmax.f32 %v2144_v1, 0.0  ;;  %2996 = vrsqrt.f32 %v2155_v5 }
 0x281   :  { %v2156_v13 = vadd.f32 1e-05, %v2148_v8 }
 0x283   :  { %v2993_v9 = vpop.eup %2992  ;;  %2998 = vrsqrt.f32 %v2156_v13 }
 0x284   :  { %v2162_v11 = vmul.f32 %v2993_v9, %v2150_v4 }
 0x285   :  { %v2995_v12 = vpop.eup %2994 }
 0x286   :  { %2184 = vperm.xlu1 %2607, %v2162_v11   ;;  %v2161_v14 = vmul.f32 %v2995_v12, %v2149_v10  ;;  %v2170_v17 = vmul.f32 %v2162_v11, %v2094_v29 }
 0x288   :  { %2179 = vperm.xlu0 %2606, %v2161_v14   ;;  %v2169_v16 = vmul.f32 %v2161_v14, %v2093_v28  ;;  %v2174_v20 = vsub.f32 %v2166_v19, %v2170_v17  ;;  %v2167_v28 = vld [vmem:[%s4037_s3 + $0x10] sm:$0xff] }
 0x289   :  { %v2997_v21 = vpop.eup %2996 }
 0x28a   :  { %v2173_v18 = vsub.f32 %v2165_v15, %v2169_v16  ;;  %v2163_v23 = vmul.f32 %v2997_v21, %v2151_v22 }
 0x28c   :  { %2215 = vperm.xlu1 %2607, %v2173_v18   ;;  %v2171_v27 = vmul.f32 %v2163_v23, %v2095_v45 }
 0x28d   :  { %v2999_v24 = vpop.eup %2998 }
 0x28e   :  { %v2164_v25 = vmul.f32 %v2999_v24, %v2152_v26  ;;  %v2175_v29 = vsub.f32 %v2167_v28, %v2171_v27 }
 0x290   :  { %2220 = vperm.xlu1 %2607, %v2174_v20   ;;  %v2172_v30 = vmul.f32 %v2164_v25, %v2096_v54 }
 0x292   :  { %v2176_v36 = vsub.f32 %v2168_v31, %v2172_v30 }
 0x294   :  { %2189 = vperm.xlu1 %2607, %v2163_v23  }
 0x298   :  { %2194 = vperm.xlu1 %2607, %v2164_v25  }
 0x29c   :  { %2225 = vperm.xlu1 %2607, %v2175_v29  }
 0x2a0   :  { %2230 = vperm.xlu1 %2607, %v2176_v36  }
 0x305   :  { %v2185_v35 = vpop.permute.xlu1 %2184 }
 0x306   :  { %v2201_v52 = vmul.f32 %v2185_v35, %v3880_v39  ;;  %v2202_v53 = vmul.f32 %v2185_v35, %v3886_v42  ;;  %v2203_v54 = vmul.f32 %v2185_v35, %v3882_v40  ;;  %v2204_v57 = vmul.f32 %v2185_v35, %v3888_v43 }
 0x307   :  { %v2180_v38 = vpop.permute.xlu0 %2179 }
 0x308   :  { %v2197_v41 = vmul.f32 %v2180_v38, %v3866_v32  ;;  %v2198_v44 = vmul.f32 %v2180_v38, %v3872_v37  ;;  %v2199_v45 = vmul.f32 %v2180_v38, %v3868_v33  ;;  %v2200_v46 = vmul.f32 %v2180_v38, %v3874_v34 }
 0x30b   :  { %v2216_v47 = vpop.permute.xlu1 %2215 }
 0x30c   :  { %v2233_v48 = vadd.f32 %v2216_v47, %v2197_v41  ;;  %v2234_v49 = vadd.f32 %v2216_v47, %v2198_v44  ;;  %v2235_v50 = vadd.f32 %v2216_v47, %v2199_v45  ;;  %v2236_v51 = vadd.f32 %v2216_v47, %v2200_v46 }
 0x30e   :  { %v2249_v32 = vmax.f32 %v2233_v48, 0.0  ;;  %v2250_v58 = vmax.f32 %v2234_v49, 0.0  ;;  %v2251_v37 = vmax.f32 %v2235_v50, 0.0  ;;  %v2252_v59 = vmax.f32 %v2236_v51, 0.0 }
 0x30f   :  { %v2221_v33 = vpop.permute.xlu1 %2220 }
 0x310   :  { %2265 = vst [vmem:[%s4038_s4] sm:$0xff] %v2249_v32  ;;  %2266 = vst [vmem:[%s4038_s4 + $0x8] sm:$0xff] %v2250_v58  ;;  %v2237_v34 = vadd.f32 %v2221_v33, %v2201_v52  ;;  %v2238_v39 = vadd.f32 %v2221_v33, %v2202_v53  ;;  %v2239_v40 = vadd.f32 %v2221_v33, %v2203_v54 }
 0x311   :  { %2267 = vst [vmem:[%s4038_s4 + $0x10] sm:$0xff] %v2251_v37  ;;  %2268 = vst [vmem:[%s4038_s4 + $0x18] sm:$0xff] %v2252_v59  ;;  %v2240_v42 = vadd.f32 %v2221_v33, %v2204_v57 }
 0x312   :  { %v2253_v43 = vmax.f32 %v2237_v34, 0.0  ;;  %v2254_v60 = vmax.f32 %v2238_v39, 0.0  ;;  %v2255_v63 = vmax.f32 %v2239_v40, 0.0 }
 0x313   :  { %v2256_v0 = vmax.f32 %v2240_v42, 0.0  ;;  %v2190_v1 = vpop.permute.xlu1 %2189 }
 0x314   :  { %2269 = vst [vmem:[%s4038_s4 + $0x20] sm:$0xff] %v2253_v43  ;;  %2270 = vst [vmem:[%s4038_s4 + $0x28] sm:$0xff] %v2254_v60  ;;  %v2205_v5 = vmul.f32 %v2190_v1, %v3905_v56  ;;  %v2206_v8 = vmul.f32 %v2190_v1, %v3912_v61  ;;  %v2207_v9 = vmul.f32 %v2190_v1, %v3903_v55 }
 0x315   :  { %2271 = vst [vmem:[%s4038_s4 + $0x30] sm:$0xff] %v2255_v63  ;;  %2272 = vst [vmem:[%s4038_s4 + $0x38] sm:$0xff] %v2256_v0  ;;  %v2208_v10 = vmul.f32 %v2190_v1, %v3914_v62 }
 0x317   :  { %v2195_v4 = vpop.permute.xlu1 %2194 }
 0x318   :  { %v2209_v16 = vmul.f32 %v2195_v4, %v3920_v2  ;;  %v2210_v17 = vmul.f32 %v2195_v4, %v3926_v6  ;;  %v2211_v18 = vmul.f32 %v2195_v4, %v3922_v3  ;;  %v2212_v19 = vmul.f32 %v2195_v4, %v3928_v7 }
 0x31b   :  { %v2226_v11 = vpop.permute.xlu1 %2225 }
 0x31c   :  { %v2241_v12 = vadd.f32 %v2226_v11, %v2205_v5  ;;  %v2242_v13 = vadd.f32 %v2226_v11, %v2206_v8  ;;  %v2243_v14 = vadd.f32 %v2226_v11, %v2207_v9  ;;  %v2244_v15 = vadd.f32 %v2226_v11, %v2208_v10 }
 0x31e   :  { %v2257_v56 = vmax.f32 %v2241_v12, 0.0  ;;  %v2258_v20 = vmax.f32 %v2242_v13, 0.0  ;;  %v2259_v61 = vmax.f32 %v2243_v14, 0.0  ;;  %v2260_v21 = vmax.f32 %v2244_v15, 0.0 }
 0x31f   :  { %v2231_v55 = vpop.permute.xlu1 %2230 }
 0x320   :  { %2273 = vst [vmem:[%s4038_s4 + $0x40] sm:$0xff] %v2257_v56  ;;  %2274 = vst [vmem:[%s4038_s4 + $0x48] sm:$0xff] %v2258_v20  ;;  %v2245_v62 = vadd.f32 %v2231_v55, %v2209_v16  ;;  %v2246_v2 = vadd.f32 %v2231_v55, %v2210_v17  ;;  %v2247_v3 = vadd.f32 %v2231_v55, %v2211_v18 }
 0x321   :  { %2275 = vst [vmem:[%s4038_s4 + $0x50] sm:$0xff] %v2259_v61  ;;  %2276 = vst [vmem:[%s4038_s4 + $0x58] sm:$0xff] %v2260_v21  ;;  %v2248_v6 = vadd.f32 %v2231_v55, %v2212_v19 }
 0x322   :  { %v2261_v7 = vmax.f32 %v2245_v62, 0.0  ;;  %v2262_v22 = vmax.f32 %v2246_v2, 0.0  ;;  %v2263_v23 = vmax.f32 %v2247_v3, 0.0 }
 0x323   :  { %v2264_v24 = vmax.f32 %v2248_v6, 0.0 }
 0x324   :  { %2277 = vst [vmem:[%s4038_s4 + $0x60] sm:$0xff] %v2261_v7  ;;  %2278 = vst [vmem:[%s4038_s4 + $0x68] sm:$0xff] %v2262_v22 }
 0x325   :  { %2279 = vst [vmem:[%s4038_s4 + $0x70] sm:$0xff] %v2263_v23  ;;  %2280 = vst [vmem:[%s4038_s4 + $0x78] sm:$0xff] %v2264_v24 }

// kernel: generator_forward.6
= control target key start
LH: loop header
LB: loop body
LE: loop exit
PB: predicated region body
PF: predicated region fallthrough
CT: control target
= control target key end

     0   :  { %s6142_s1 = inlined_call_operand.vmem [shape: bf16[512,1664], index: 1, kind: input, shape index: {}]   ;;  %s6143_s0 = inlined_call_operand.vmem [shape: bf16[16,512], index: 0, kind: input, shape index: {}]   ;;  %s6144_s2 = inlined_call_operand.vmem [shape: f32[16,1], index: 2, kind: input, shape index: {}]   ;;  %s6145_s3 = inlined_call_operand.vmem [shape: f32[16,1], index: 3, kind: input, shape index: {}]   ;;  %s6146_s4 = inlined_call_operand.vmem [shape: f32[16,1664], index: 4, kind: output, shape index: {}]  }
   0x1   :  { %v3925_v0 = vld [vmem:[%s6142_s1 + $0x4] ss:$52 sps:$4 sm:$0xff]   ;;  %v3927_v1 = vld [vmem:[%s6142_s1 + $0xc] ss:$52 sps:$4 sm:$0xff]   ;;  %v3930_v3 = vld [vmem:[%s6142_s1 + $0x8] ss:$52 sps:$4 sm:$0xff]  }
   0x2   :  { %2602 = vmatprep.subr.bf16.mxu0 %v3925_v0  ;;  %v3929_v2 = vld [vmem:[%s6142_s1] ss:$52 sps:$4 sm:$0xff]   ;;  %2688 = vmatprep.subr.bf16.mxu1 %v3927_v1  ;;  %v3935_v6 = vld [vmem:[%s6142_s1 + $0x68] ss:$52 sps:$4 sm:$0xff]   ;;  %v3936_v7 = vld [vmem:[%s6142_s1 + $0x70] ss:$52 sps:$4 sm:$0xff]  }
   0x3   :  { %v3931_v4 = vld [vmem:[%s6142_s1 + $0x6c] ss:$52 sps:$4 sm:$0xff]   ;;  %2603 = vmatpush1.bf16.msra.mxu0 %v3929_v2  ;;  %2689 = vmatpush1.bf16.msra.mxu1 %v3930_v3  ;;  %v3933_v5 = vld [vmem:[%s6142_s1 + $0x74] ss:$52 sps:$4 sm:$0xff]   ;;  %v3939_v9 = vld [vmem:[%s6142_s1 + $0xdc] ss:$52 sps:$4 sm:$0xff]  }
   0x4   :  { %2604 = vmatprep.subr.bf16.mxu0 %v3931_v4  ;;  %2690 = vmatprep.subr.bf16.mxu1 %v3933_v5  ;;  %v3937_v8 = vld [vmem:[%s6142_s1 + $0xd4] ss:$52 sps:$4 sm:$0xff]   ;;  %v3941_v10 = vld [vmem:[%s6142_s1 + $0xd0] ss:$52 sps:$4 sm:$0xff]   ;;  %v3942_v11 = vld [vmem:[%s6142_s1 + $0xd8] ss:$52 sps:$4 sm:$0xff]  }
   0x5   :  { %v3943_v12 = vld [vmem:[%s6142_s1 + $0x13c] ss:$52 sps:$4 sm:$0xff]   ;;  %v3945_v13 = vld [vmem:[%s6142_s1 + $0x144] ss:$52 sps:$4 sm:$0xff]   ;;  %v3948_v15 = vld [vmem:[%s6142_s1 + $0x140] ss:$52 sps:$4 sm:$0xff]  }
   0x6   :  { %v3947_v14 = vld [vmem:[%s6142_s1 + $0x138] ss:$52 sps:$4 sm:$0xff]   ;;  %v3953_v18 = vld [vmem:[%s6142_s1 + $0x1a0] ss:$52 sps:$4 sm:$0xff]   ;;  %v3954_v19 = vld [vmem:[%s6142_s1 + $0x1a8] ss:$52 sps:$4 sm:$0xff]  }
   0x7   :  { %2605 = vmatpush1.bf16.msra.mxu0 %v3935_v6  ;;  %2691 = vmatpush1.bf16.msra.mxu1 %v3936_v7  ;;  %v3949_v16 = vld [vmem:[%s6142_s1 + $0x1a4] ss:$52 sps:$4 sm:$0xff]   ;;  %v3951_v17 = vld [vmem:[%s6142_s1 + $0x1ac] ss:$52 sps:$4 sm:$0xff]   ;;  %v3957_v21 = vld [vmem:[%s6142_s1 + $0x214] ss:$52 sps:$4 sm:$0xff]  }
   0x8   :  { %2606 = vmatprep.subr.bf16.mxu0 %v3937_v8  ;;  %2692 = vmatprep.subr.bf16.mxu1 %v3939_v9  ;;  %v3955_v20 = vld [vmem:[%s6142_s1 + $0x20c] ss:$52 sps:$4 sm:$0xff]   ;;  %v3959_v22 = vld [vmem:[%s6142_s1 + $0x208] ss:$52 sps:$4 sm:$0xff]   ;;  %v3960_v23 = vld [vmem:[%s6142_s1 + $0x210] ss:$52 sps:$4 sm:$0xff]  }
   0x9   :  { %v3961_v24 = vld [vmem:[%s6142_s1 + $0x274] ss:$52 sps:$4 sm:$0xff]   ;;  %v3963_v25 = vld [vmem:[%s6142_s1 + $0x27c] ss:$52 sps:$4 sm:$0xff]   ;;  %v3966_v27 = vld [vmem:[%s6142_s1 + $0x278] ss:$52 sps:$4 sm:$0xff]  }
   0xa   :  { %v3965_v26 = vld [vmem:[%s6142_s1 + $0x270] ss:$52 sps:$4 sm:$0xff]   ;;  %v3971_v30 = vld [vmem:[%s6142_s1 + $0x2d8] ss:$52 sps:$4 sm:$0xff]   ;;  %v3972_v31 = vld [vmem:[%s6142_s1 + $0x2e0] ss:$52 sps:$4 sm:$0xff]  }
   0xb   :  { %2607 = vmatpush1.bf16.msra.mxu0 %v3941_v10  ;;  %2693 = vmatpush1.bf16.msra.mxu1 %v3942_v11  ;;  %v3967_v28 = vld [vmem:[%s6142_s1 + $0x2dc] ss:$52 sps:$4 sm:$0xff]   ;;  %v3969_v29 = vld [vmem:[%s6142_s1 + $0x2e4] ss:$52 sps:$4 sm:$0xff]   ;;  %v3975_v33 = vld [vmem:[%s6142_s1 + $0x34c] ss:$52 sps:$4 sm:$0xff]  }
   0xc   :  { %2608 = vmatprep.subr.bf16.mxu0 %v3943_v12  ;;  %2694 = vmatprep.subr.bf16.mxu1 %v3945_v13  ;;  %v3973_v32 = vld [vmem:[%s6142_s1 + $0x344] ss:$52 sps:$4 sm:$0xff]   ;;  %v3977_v34 = vld [vmem:[%s6142_s1 + $0x340] ss:$52 sps:$4 sm:$0xff]   ;;  %v3978_v35 = vld [vmem:[%s6142_s1 + $0x348] ss:$52 sps:$4 sm:$0xff]  }
   0xd   :  { %v3979_v36 = vld [vmem:[%s6142_s1 + $0x3ac] ss:$52 sps:$4 sm:$0xff]   ;;  %v3981_v37 = vld [vmem:[%s6142_s1 + $0x3b4] ss:$52 sps:$4 sm:$0xff]   ;;  %v3984_v39 = vld [vmem:[%s6142_s1 + $0x3b0] ss:$52 sps:$4 sm:$0xff]  }
   0xe   :  { %v3983_v38 = vld [vmem:[%s6142_s1 + $0x3a8] ss:$52 sps:$4 sm:$0xff]   ;;  %v3989_v42 = vld [vmem:[%s6142_s1 + $0x410] ss:$52 sps:$4 sm:$0xff]   ;;  %v3990_v43 = vld [vmem:[%s6142_s1 + $0x418] ss:$52 sps:$4 sm:$0xff]  }
   0xf   :  { %2609 = vmatpush1.bf16.msra.mxu0 %v3947_v14  ;;  %2695 = vmatpush1.bf16.msra.mxu1 %v3948_v15  ;;  %v3985_v40 = vld [vmem:[%s6142_s1 + $0x414] ss:$52 sps:$4 sm:$0xff]   ;;  %v3987_v41 = vld [vmem:[%s6142_s1 + $0x41c] ss:$52 sps:$4 sm:$0xff]   ;;  %v3993_v45 = vld [vmem:[%s6142_s1 + $0x484] ss:$52 sps:$4 sm:$0xff]  }
  0x10   :  { %2610 = vmatprep.subr.bf16.mxu0 %v3949_v16  ;;  %2696 = vmatprep.subr.bf16.mxu1 %v3951_v17  ;;  %v3991_v44 = vld [vmem:[%s6142_s1 + $0x47c] ss:$52 sps:$4 sm:$0xff]   ;;  %v3995_v46 = vld [vmem:[%s6142_s1 + $0x478] ss:$52 sps:$4 sm:$0xff]   ;;  %v4717_v47 = vld [vmem:[%s6143_s0 + $0x4] ss:$16 sps:$4 sm:$0xff]  }
  0x11   :  { %v3996_v48 = vld [vmem:[%s6142_s1 + $0x480] ss:$52 sps:$4 sm:$0xff]   ;;  %v3997_v49 = vld [vmem:[%s6142_s1 + $0x4e4] ss:$52 sps:$4 sm:$0xff]   ;;  %2634 = vmatprep.mubr.bf16.mxu0 %v4717_v47  ;;  %2720 = vmatprep.mubr.bf16.mxu1 %v4717_v47  ;;  %v4002_v52 = vld [vmem:[%s6142_s1 + $0x4e8] ss:$52 sps:$4 sm:$0xff]  }
  0x12   :  { %v3999_v50 = vld [vmem:[%s6142_s1 + $0x4ec] ss:$52 sps:$4 sm:$0xff]   ;;  %v4005_v54 = vld [vmem:[%s6142_s1 + $0x554] ss:$52 sps:$4 sm:$0xff]   ;;  %v4008_v56 = vld [vmem:[%s6142_s1 + $0x550] ss:$52 sps:$4 sm:$0xff]  }
  0x13   :  { %2611 = vmatpush1.bf16.msra.mxu0 %v3953_v18  ;;  %2697 = vmatpush1.bf16.msra.mxu1 %v3954_v19  ;;  %v4001_v51 = vld [vmem:[%s6142_s1 + $0x4e0] ss:$52 sps:$4 sm:$0xff]   ;;  %v4007_v55 = vld [vmem:[%s6142_s1 + $0x548] ss:$52 sps:$4 sm:$0xff]   ;;  %v4013_v59 = vld [vmem:[%s6142_s1 + $0x5b0] ss:$52 sps:$4 sm:$0xff]  }
  0x14   :  { %2612 = vmatprep.subr.bf16.mxu0 %v3955_v20  ;;  %2698 = vmatprep.subr.bf16.mxu1 %v3957_v21  ;;  %v4003_v53 = vld [vmem:[%s6142_s1 + $0x54c] ss:$52 sps:$4 sm:$0xff]   ;;  %v4009_v57 = vld [vmem:[%s6142_s1 + $0x5b4] ss:$52 sps:$4 sm:$0xff]   ;;  %v4011_v58 = vld [vmem:[%s6142_s1 + $0x5bc] ss:$52 sps:$4 sm:$0xff]  }
  0x15   :  { %v4014_v60 = vld [vmem:[%s6142_s1 + $0x5b8] ss:$52 sps:$4 sm:$0xff]   ;;  %v4015_v61 = vld [vmem:[%s6142_s1 + $0x61c] ss:$52 sps:$4 sm:$0xff]   ;;  %v4020_v0 = vld [vmem:[%s6142_s1 + $0x620] ss:$52 sps:$4 sm:$0xff]  }
  0x16   :  { %v4017_v62 = vld [vmem:[%s6142_s1 + $0x624] ss:$52 sps:$4 sm:$0xff]   ;;  %v4028_v2 = vld [vmem:[%s6142_s1 + $0x68c] ss:$52 sps:$4 sm:$0xff]   ;;  %v4026_v4 = vld [vmem:[%s6142_s1 + $0x688] ss:$52 sps:$4 sm:$0xff]  }
  0x17   :  { %2613 = vmatpush1.bf16.msra.mxu0 %v3959_v22  ;;  %2699 = vmatpush1.bf16.msra.mxu1 %v3960_v23  ;;  %v4019_v63 = vld [vmem:[%s6142_s1 + $0x618] ss:$52 sps:$4 sm:$0xff]   ;;  %v4023_v3 = vld [vmem:[%s6142_s1 + $0x680] ss:$52 sps:$4 sm:$0xff]   ;;  %v4030_v8 = vld [vmem:[%s6142_s1 + $0x6e8] ss:$52 sps:$4 sm:$0xff]  }
  0x18   :  { %2614 = vmatprep.subr.bf16.mxu0 %v3961_v24  ;;  %2700 = vmatprep.subr.bf16.mxu1 %v3963_v25  ;;  %v4025_v1 = vld [vmem:[%s6142_s1 + $0x684] ss:$52 sps:$4 sm:$0xff]   ;;  %v4787_v5 = vld [vmem:[%s6143_s0] ss:$16 sps:$4 sm:$0xff]   ;;  %v4035_v7 = vld [vmem:[%s6142_s1 + $0x6f4] ss:$52 sps:$4 sm:$0xff]  }
  0x19   :  { %v4032_v6 = vld [vmem:[%s6142_s1 + $0x6ec] ss:$52 sps:$4 sm:$0xff]   ;;  %v4033_v9 = vld [vmem:[%s6142_s1 + $0x6f0] ss:$52 sps:$4 sm:$0xff]   ;;  %v4038_v10 = vld [vmem:[%s6142_s1 + $0x754] ss:$52 sps:$4 sm:$0xff]  }
  0x1a   :  { %v4041_v11 = vld [vmem:[%s6142_s1 + $0x75c] ss:$52 sps:$4 sm:$0xff]   ;;  %v4039_v13 = vld [vmem:[%s6142_s1 + $0x758] ss:$52 sps:$4 sm:$0xff]   ;;  %v4045_v17 = vld [vmem:[%s6142_s1 + $0x7c0] ss:$52 sps:$4 sm:$0xff]  }
  0x1b   :  { %2615 = vmatpush1.bf16.msra.mxu0 %v3965_v26  ;;  %2701 = vmatpush1.bf16.msra.mxu1 %v3966_v27  ;;  %v4036_v12 = vld [vmem:[%s6142_s1 + $0x750] ss:$52 sps:$4 sm:$0xff]   ;;  %v4042_v16 = vld [vmem:[%s6142_s1 + $0x7b8] ss:$52 sps:$4 sm:$0xff]   ;;  %v4048_v20 = vld [vmem:[%s6142_s1 + $0x820] ss:$52 sps:$4 sm:$0xff]  }
  0x1c   :  { %2616 = vmatprep.subr.bf16.mxu0 %v3967_v28  ;;  %2702 = vmatprep.subr.bf16.mxu1 %v3969_v29  ;;  %v4044_v14 = vld [vmem:[%s6142_s1 + $0x7bc] ss:$52 sps:$4 sm:$0xff]   ;;  %v4047_v15 = vld [vmem:[%s6142_s1 + $0x7c4] ss:$52 sps:$4 sm:$0xff]   ;;  %v4053_v19 = vld [vmem:[%s6142_s1 + $0x82c] ss:$52 sps:$4 sm:$0xff]  }
  0x1d   :  { %v4050_v18 = vld [vmem:[%s6142_s1 + $0x824] ss:$52 sps:$4 sm:$0xff]   ;;  %v4051_v21 = vld [vmem:[%s6142_s1 + $0x828] ss:$52 sps:$4 sm:$0xff]   ;;  %v4056_v22 = vld [vmem:[%s6142_s1 + $0x88c] ss:$52 sps:$4 sm:$0xff]  }
  0x1e   :  { %v4059_v23 = vld [vmem:[%s6142_s1 + $0x894] ss:$52 sps:$4 sm:$0xff]   ;;  %v4057_v25 = vld [vmem:[%s6142_s1 + $0x890] ss:$52 sps:$4 sm:$0xff]   ;;  %v4063_v29 = vld [vmem:[%s6142_s1 + $0x8f8] ss:$52 sps:$4 sm:$0xff]  }
  0x1f   :  { %2617 = vmatpush1.bf16.msra.mxu0 %v3971_v30  ;;  %2703 = vmatpush1.bf16.msra.mxu1 %v3972_v31  ;;  %v4054_v24 = vld [vmem:[%s6142_s1 + $0x888] ss:$52 sps:$4 sm:$0xff]   ;;  %v4060_v28 = vld [vmem:[%s6142_s1 + $0x8f0] ss:$52 sps:$4 sm:$0xff]  }
  0x20   :  { %2618 = vmatprep.subr.bf16.mxu0 %v3973_v32  ;;  %2704 = vmatprep.subr.bf16.mxu1 %v3975_v33  ;;  %v4062_v26 = vld [vmem:[%s6142_s1 + $0x8f4] ss:$52 sps:$4 sm:$0xff]   ;;  %v4065_v27 = vld [vmem:[%s6142_s1 + $0x8fc] ss:$52 sps:$4 sm:$0xff]   ;;  %v4071_v32 = vld [vmem:[%s6142_s1 + $0x964] ss:$52 sps:$4 sm:$0xff]  }
  0x21   :  { %v4866_v30 = vld [vmem:[%s6143_s0 + $0xc] ss:$16 sps:$4 sm:$0xff]  }
  0x22   :  { %v4068_v31 = vld [vmem:[%s6142_s1 + $0x95c] ss:$52 sps:$4 sm:$0xff]   ;;  %v4066_v33 = vld [vmem:[%s6142_s1 + $0x958] ss:$52 sps:$4 sm:$0xff]  }
  0x23   :  { %2619 = vmatpush1.bf16.msra.mxu0 %v3977_v34  ;;  %2705 = vmatpush1.bf16.msra.mxu1 %v3978_v35  ;;  %v4069_v34 = vld [vmem:[%s6142_s1 + $0x960] ss:$52 sps:$4 sm:$0xff]   ;;  %v4074_v35 = vld [vmem:[%s6142_s1 + $0x9c4] ss:$52 sps:$4 sm:$0xff]  }
  0x24   :  { %2620 = vmatprep.subr.bf16.mxu0 %v3979_v36  ;;  %2706 = vmatprep.subr.bf16.mxu1 %v3981_v37  ;;  %v4077_v36 = vld [vmem:[%s6142_s1 + $0x9cc] ss:$52 sps:$4 sm:$0xff]  }
  0x25   :  { %v4072_v37 = vld [vmem:[%s6142_s1 + $0x9c0] ss:$52 sps:$4 sm:$0xff]  }
  0x27   :  { %2621 = vmatpush1.bf16.msra.mxu0 %v3983_v38  ;;  %2707 = vmatpush1.bf16.msra.mxu1 %v3984_v39  ;;  %v4075_v38 = vld [vmem:[%s6142_s1 + $0x9c8] ss:$52 sps:$4 sm:$0xff]   ;;  %v4080_v39 = vld [vmem:[%s6142_s1 + $0xa2c] ss:$52 sps:$4 sm:$0xff]  }
  0x28   :  { %2622 = vmatprep.subr.bf16.mxu0 %v3985_v40  ;;  %2708 = vmatprep.subr.bf16.mxu1 %v3987_v41  ;;  %v4083_v40 = vld [vmem:[%s6142_s1 + $0xa34] ss:$52 sps:$4 sm:$0xff]  }
  0x29   :  { %v4078_v41 = vld [vmem:[%s6142_s1 + $0xa28] ss:$52 sps:$4 sm:$0xff]  }
  0x2b   :  { %2623 = vmatpush1.bf16.msra.mxu0 %v3989_v42  ;;  %2709 = vmatpush1.bf16.msra.mxu1 %v3990_v43  ;;  %v4081_v42 = vld [vmem:[%s6142_s1 + $0xa30] ss:$52 sps:$4 sm:$0xff]   ;;  %v4086_v43 = vld [vmem:[%s6142_s1 + $0xa94] ss:$52 sps:$4 sm:$0xff]  }
  0x2c   :  { %2624 = vmatprep.subr.bf16.mxu0 %v3991_v44  ;;  %2710 = vmatprep.subr.bf16.mxu1 %v3993_v45  ;;  %v4089_v44 = vld [vmem:[%s6142_s1 + $0xa9c] ss:$52 sps:$4 sm:$0xff]  }
  0x2d   :  { %v4084_v45 = vld [vmem:[%s6142_s1 + $0xa90] ss:$52 sps:$4 sm:$0xff]  }
  0x2f   :  { %2625 = vmatpush1.bf16.msra.mxu0 %v3995_v46  ;;  %2711 = vmatpush1.bf16.msra.mxu1 %v3996_v48  ;;  %v4087_v46 = vld [vmem:[%s6142_s1 + $0xa98] ss:$52 sps:$4 sm:$0xff]   ;;  %v4092_v48 = vld [vmem:[%s6142_s1 + $0xafc] ss:$52 sps:$4 sm:$0xff]  }
  0x30   :  { %2626 = vmatprep.subr.bf16.mxu0 %v3997_v49  ;;  %2712 = vmatprep.subr.bf16.mxu1 %v3999_v50  ;;  %v4095_v49 = vld [vmem:[%s6142_s1 + $0xb04] ss:$52 sps:$4 sm:$0xff]  }
  0x31   :  { %v4090_v50 = vld [vmem:[%s6142_s1 + $0xaf8] ss:$52 sps:$4 sm:$0xff]  }
  0x33   :  { %2627 = vmatpush1.bf16.msra.mxu0 %v4001_v51  ;;  %2713 = vmatpush1.bf16.msra.mxu1 %v4002_v52  ;;  %v4093_v51 = vld [vmem:[%s6142_s1 + $0xb00] ss:$52 sps:$4 sm:$0xff]   ;;  %v4098_v52 = vld [vmem:[%s6142_s1 + $0xb64] ss:$52 sps:$4 sm:$0xff]  }
  0x34   :  { %2628 = vmatprep.subr.bf16.mxu0 %v4003_v53  ;;  %2714 = vmatprep.subr.bf16.mxu1 %v4005_v54  ;;  %v4101_v53 = vld [vmem:[%s6142_s1 + $0xb6c] ss:$52 sps:$4 sm:$0xff]  }
  0x35   :  { %v4096_v54 = vld [vmem:[%s6142_s1 + $0xb60] ss:$52 sps:$4 sm:$0xff]  }
  0x37   :  { %2629 = vmatpush1.bf16.msra.mxu0 %v4007_v55  ;;  %2715 = vmatpush1.bf16.msra.mxu1 %v4008_v56  ;;  %v4099_v55 = vld [vmem:[%s6142_s1 + $0xb68] ss:$52 sps:$4 sm:$0xff]   ;;  %v4104_v56 = vld [vmem:[%s6142_s1 + $0xbcc] ss:$52 sps:$4 sm:$0xff]  }
  0x38   :  { %2630 = vmatprep.subr.bf16.mxu0 %v4009_v57  ;;  %2716 = vmatprep.subr.bf16.mxu1 %v4011_v58  ;;  %v4107_v57 = vld [vmem:[%s6142_s1 + $0xbd4] ss:$52 sps:$4 sm:$0xff]  }
  0x39   :  { %v4102_v58 = vld [vmem:[%s6142_s1 + $0xbc8] ss:$52 sps:$4 sm:$0xff]  }
  0x3b   :  { %2631 = vmatpush1.bf16.msra.mxu0 %v4013_v59  ;;  %2717 = vmatpush1.bf16.msra.mxu1 %v4014_v60  ;;  %v4105_v59 = vld [vmem:[%s6142_s1 + $0xbd0] ss:$52 sps:$4 sm:$0xff]   ;;  %v4110_v60 = vld [vmem:[%s6142_s1 + $0xc34] ss:$52 sps:$4 sm:$0xff]  }
  0x3c   :  { %2632 = vmatprep.subr.bf16.mxu0 %v4015_v61  ;;  %2718 = vmatprep.subr.bf16.mxu1 %v4017_v62  ;;  %v4113_v61 = vld [vmem:[%s6142_s1 + $0xc3c] ss:$52 sps:$4 sm:$0xff]  }
  0x3d   :  { %v4108_v62 = vld [vmem:[%s6142_s1 + $0xc30] ss:$52 sps:$4 sm:$0xff]  }
  0x3f   :  { %2633 = vmatpush1.bf16.msra.mxu0 %v4019_v63  ;;  %2719 = vmatpush1.bf16.msra.mxu1 %v4020_v0  ;;  %v4111_v63 = vld [vmem:[%s6142_s1 + $0xc38] ss:$52 sps:$4 sm:$0xff]   ;;  %v4116_v0 = vld [vmem:[%s6142_s1 + $0xc9c] ss:$52 sps:$4 sm:$0xff]  }
  0x40   :  { %2645 = vmatprep.subr.bf16.mxu0 %v4025_v1  ;;  %2731 = vmatprep.subr.bf16.mxu1 %v4028_v2  ;;  %v4119_v1 = vld [vmem:[%s6142_s1 + $0xca4] ss:$52 sps:$4 sm:$0xff]  }
  0x41   :  { %v4114_v2 = vld [vmem:[%s6142_s1 + $0xc98] ss:$52 sps:$4 sm:$0xff]  }
  0x42   :  { %2635 = vmatmul.mubr.bf16.vlgmr.msra.gmra.mrb[0].mxu0 %v4787_v5  ;;  %2721 = vmatmul.mubr.bf16.vlgmr.msra.gmra.mrb[0].mxu1 %v4787_v5 }
  0x43   :  { %2646 = vmatpush1.bf16.msra.mxu0 %v4023_v3  ;;  %2732 = vmatpush1.bf16.msra.mxu1 %v4026_v4  ;;  %v4117_v3 = vld [vmem:[%s6142_s1 + $0xca0] ss:$52 sps:$4 sm:$0xff]  }
  0x44   :  { %2647 = vmatprep.subr.bf16.mxu0 %v4032_v6  ;;  %2733 = vmatprep.subr.bf16.mxu1 %v4035_v7  ;;  %v4125_v4 = vld [vmem:[%s6142_s1 + $0x14] ss:$52 sps:$4 sm:$0xff]   ;;  %v4128_v6 = vld [vmem:[%s6142_s1 + $0x1c] ss:$52 sps:$4 sm:$0xff]  }
  0x45   :  { %2677 = vmatprep.mubr.bf16.mxu0 %v4866_v30  ;;  %2763 = vmatprep.mubr.bf16.mxu1 %v4866_v30  ;;  %v4987_v7 = vld [vmem:[%s6143_s0 + $0x8] ss:$16 sps:$4 sm:$0xff]  }
  0x47   :  { %2648 = vmatpush1.bf16.msra.mxu0 %v4030_v8  ;;  %2734 = vmatpush1.bf16.msra.mxu1 %v4033_v9  ;;  %v4123_v8 = vld [vmem:[%s6142_s1 + $0x10] ss:$52 sps:$4 sm:$0xff]   ;;  %v4126_v9 = vld [vmem:[%s6142_s1 + $0x18] ss:$52 sps:$4 sm:$0xff]  }
  0x48   :  { %2649 = vmatprep.subr.bf16.mxu0 %v4038_v10  ;;  %2735 = vmatprep.subr.bf16.mxu1 %v4041_v11  ;;  %v4131_v10 = vld [vmem:[%s6142_s1 + $0x7c] ss:$52 sps:$4 sm:$0xff]   ;;  %v4134_v11 = vld [vmem:[%s6142_s1 + $0x84] ss:$52 sps:$4 sm:$0xff]  }
  0x4b   :  { %2650 = vmatpush1.bf16.msra.mxu0 %v4036_v12  ;;  %2736 = vmatpush1.bf16.msra.mxu1 %v4039_v13  ;;  %v4129_v12 = vld [vmem:[%s6142_s1 + $0x78] ss:$52 sps:$4 sm:$0xff]   ;;  %v4132_v13 = vld [vmem:[%s6142_s1 + $0x80] ss:$52 sps:$4 sm:$0xff]  }
  0x4c   :  { %2651 = vmatprep.subr.bf16.mxu0 %v4044_v14  ;;  %2737 = vmatprep.subr.bf16.mxu1 %v4047_v15  ;;  %v4137_v14 = vld [vmem:[%s6142_s1 + $0xe4] ss:$52 sps:$4 sm:$0xff]   ;;  %v4140_v15 = vld [vmem:[%s6142_s1 + $0xec] ss:$52 sps:$4 sm:$0xff]  }
  0x4f   :  { %2652 = vmatpush1.bf16.msra.mxu0 %v4042_v16  ;;  %2738 = vmatpush1.bf16.msra.mxu1 %v4045_v17  ;;  %v4135_v16 = vld [vmem:[%s6142_s1 + $0xe0] ss:$52 sps:$4 sm:$0xff]   ;;  %v4138_v17 = vld [vmem:[%s6142_s1 + $0xe8] ss:$52 sps:$4 sm:$0xff]  }
  0x50   :  { %2653 = vmatprep.subr.bf16.mxu0 %v4050_v18  ;;  %2739 = vmatprep.subr.bf16.mxu1 %v4053_v19  ;;  %v4143_v18 = vld [vmem:[%s6142_s1 + $0x14c] ss:$52 sps:$4 sm:$0xff]   ;;  %v4141_v19 = vld [vmem:[%s6142_s1 + $0x148] ss:$52 sps:$4 sm:$0xff]  }
  0x53   :  { %2654 = vmatpush1.bf16.msra.mxu0 %v4048_v20  ;;  %2740 = vmatpush1.bf16.msra.mxu1 %v4051_v21  ;;  %v4144_v20 = vld [vmem:[%s6142_s1 + $0x150] ss:$52 sps:$4 sm:$0xff]   ;;  %v4149_v21 = vld [vmem:[%s6142_s1 + $0x1b4] ss:$52 sps:$4 sm:$0xff]  }
  0x54   :  { %2655 = vmatprep.subr.bf16.mxu0 %v4056_v22  ;;  %2741 = vmatprep.subr.bf16.mxu1 %v4059_v23  ;;  %v4152_v22 = vld [vmem:[%s6142_s1 + $0x1bc] ss:$52 sps:$4 sm:$0xff]  }
  0x55   :  { %v4147_v23 = vld [vmem:[%s6142_s1 + $0x1b0] ss:$52 sps:$4 sm:$0xff]  }
  0x57   :  { %2656 = vmatpush1.bf16.msra.mxu0 %v4054_v24  ;;  %2742 = vmatpush1.bf16.msra.mxu1 %v4057_v25  ;;  %v4150_v24 = vld [vmem:[%s6142_s1 + $0x1b8] ss:$52 sps:$4 sm:$0xff]   ;;  %v4155_v25 = vld [vmem:[%s6142_s1 + $0x21c] ss:$52 sps:$4 sm:$0xff]  }
  0x58   :  { %2657 = vmatprep.subr.bf16.mxu0 %v4062_v26  ;;  %2743 = vmatprep.subr.bf16.mxu1 %v4065_v27  ;;  %v4158_v26 = vld [vmem:[%s6142_s1 + $0x224] ss:$52 sps:$4 sm:$0xff]  }
  0x59   :  { %v4153_v27 = vld [vmem:[%s6142_s1 + $0x218] ss:$52 sps:$4 sm:$0xff]  }
  0x5b   :  { %2658 = vmatpush1.bf16.msra.mxu0 %v4060_v28  ;;  %2744 = vmatpush1.bf16.msra.mxu1 %v4063_v29  ;;  %v4156_v28 = vld [vmem:[%s6142_s1 + $0x220] ss:$52 sps:$4 sm:$0xff]   ;;  %v4161_v29 = vld [vmem:[%s6142_s1 + $0x284] ss:$52 sps:$4 sm:$0xff]  }
  0x5c   :  { %2659 = vmatprep.subr.bf16.mxu0 %v4068_v31  ;;  %2745 = vmatprep.subr.bf16.mxu1 %v4071_v32  ;;  %v4164_v31 = vld [vmem:[%s6142_s1 + $0x28c] ss:$52 sps:$4 sm:$0xff]  }
  0x5d   :  { %v4159_v32 = vld [vmem:[%s6142_s1 + $0x280] ss:$52 sps:$4 sm:$0xff]  }
  0x5f   :  { %2660 = vmatpush1.bf16.msra.mxu0 %v4066_v33  ;;  %2746 = vmatpush1.bf16.msra.mxu1 %v4069_v34  ;;  %v4162_v33 = vld [vmem:[%s6142_s1 + $0x288] ss:$52 sps:$4 sm:$0xff]   ;;  %v4167_v34 = vld [vmem:[%s6142_s1 + $0x2ec] ss:$52 sps:$4 sm:$0xff]  }
  0x60   :  { %2661 = vmatprep.subr.bf16.mxu0 %v4074_v35  ;;  %2747 = vmatprep.subr.bf16.mxu1 %v4077_v36  ;;  %v4170_v35 = vld [vmem:[%s6142_s1 + $0x2f4] ss:$52 sps:$4 sm:$0xff]  }
  0x61   :  { %v4165_v36 = vld [vmem:[%s6142_s1 + $0x2e8] ss:$52 sps:$4 sm:$0xff]  }
  0x63   :  { %2662 = vmatpush1.bf16.msra.mxu0 %v4072_v37  ;;  %2748 = vmatpush1.bf16.msra.mxu1 %v4075_v38  ;;  %v4168_v37 = vld [vmem:[%s6142_s1 + $0x2f0] ss:$52 sps:$4 sm:$0xff]   ;;  %v4173_v38 = vld [vmem:[%s6142_s1 + $0x354] ss:$52 sps:$4 sm:$0xff]  }
  0x64   :  { %2663 = vmatprep.subr.bf16.mxu0 %v4080_v39  ;;  %2749 = vmatprep.subr.bf16.mxu1 %v4083_v40  ;;  %v4176_v39 = vld [vmem:[%s6142_s1 + $0x35c] ss:$52 sps:$4 sm:$0xff]  }
  0x65   :  { %v4171_v40 = vld [vmem:[%s6142_s1 + $0x350] ss:$52 sps:$4 sm:$0xff]  }
  0x67   :  { %2664 = vmatpush1.bf16.msra.mxu0 %v4078_v41  ;;  %2750 = vmatpush1.bf16.msra.mxu1 %v4081_v42  ;;  %v4174_v41 = vld [vmem:[%s6142_s1 + $0x358] ss:$52 sps:$4 sm:$0xff]   ;;  %v4179_v42 = vld [vmem:[%s6142_s1 + $0x3bc] ss:$52 sps:$4 sm:$0xff]  }
  0x68   :  { %2665 = vmatprep.subr.bf16.mxu0 %v4086_v43  ;;  %2751 = vmatprep.subr.bf16.mxu1 %v4089_v44  ;;  %v4182_v43 = vld [vmem:[%s6142_s1 + $0x3c4] ss:$52 sps:$4 sm:$0xff]  }
  0x69   :  { %v4177_v44 = vld [vmem:[%s6142_s1 + $0x3b8] ss:$52 sps:$4 sm:$0xff]  }
  0x6b   :  { %2666 = vmatpush1.bf16.msra.mxu0 %v4084_v45  ;;  %2752 = vmatpush1.bf16.msra.mxu1 %v4087_v46  ;;  %v4180_v45 = vld [vmem:[%s6142_s1 + $0x3c0] ss:$52 sps:$4 sm:$0xff]   ;;  %v4185_v46 = vld [vmem:[%s6142_s1 + $0x424] ss:$52 sps:$4 sm:$0xff]  }
  0x6c   :  { %2667 = vmatprep.subr.bf16.mxu0 %v4092_v48  ;;  %2753 = vmatprep.subr.bf16.mxu1 %v4095_v49  ;;  %v4188_v48 = vld [vmem:[%s6142_s1 + $0x42c] ss:$52 sps:$4 sm:$0xff]  }
  0x6d   :  { %v4183_v49 = vld [vmem:[%s6142_s1 + $0x420] ss:$52 sps:$4 sm:$0xff]  }
  0x6f   :  { %2668 = vmatpush1.bf16.msra.mxu0 %v4090_v50  ;;  %2754 = vmatpush1.bf16.msra.mxu1 %v4093_v51  ;;  %v4186_v50 = vld [vmem:[%s6142_s1 + $0x428] ss:$52 sps:$4 sm:$0xff]   ;;  %v4191_v51 = vld [vmem:[%s6142_s1 + $0x48c] ss:$52 sps:$4 sm:$0xff]  }
  0x70   :  { %2669 = vmatprep.subr.bf16.mxu0 %v4098_v52  ;;  %2755 = vmatprep.subr.bf16.mxu1 %v4101_v53  ;;  %v4194_v52 = vld [vmem:[%s6142_s1 + $0x494] ss:$52 sps:$4 sm:$0xff]  }
  0x71   :  { %v4189_v53 = vld [vmem:[%s6142_s1 + $0x488] ss:$52 sps:$4 sm:$0xff]  }
  0x73   :  { %2670 = vmatpush1.bf16.msra.mxu0 %v4096_v54  ;;  %2756 = vmatpush1.bf16.msra.mxu1 %v4099_v55  ;;  %v4192_v54 = vld [vmem:[%s6142_s1 + $0x490] ss:$52 sps:$4 sm:$0xff]   ;;  %v4197_v55 = vld [vmem:[%s6142_s1 + $0x4f4] ss:$52 sps:$4 sm:$0xff]  }
  0x74   :  { %2671 = vmatprep.subr.bf16.mxu0 %v4104_v56  ;;  %2757 = vmatprep.subr.bf16.mxu1 %v4107_v57  ;;  %v4200_v56 = vld [vmem:[%s6142_s1 + $0x4fc] ss:$52 sps:$4 sm:$0xff]  }
  0x75   :  { %v4195_v57 = vld [vmem:[%s6142_s1 + $0x4f0] ss:$52 sps:$4 sm:$0xff]  }
  0x77   :  { %2672 = vmatpush1.bf16.msra.mxu0 %v4102_v58  ;;  %2758 = vmatpush1.bf16.msra.mxu1 %v4105_v59  ;;  %v4198_v58 = vld [vmem:[%s6142_s1 + $0x4f8] ss:$52 sps:$4 sm:$0xff]   ;;  %v4203_v59 = vld [vmem:[%s6142_s1 + $0x55c] ss:$52 sps:$4 sm:$0xff]  }
  0x78   :  { %2673 = vmatprep.subr.bf16.mxu0 %v4110_v60  ;;  %2759 = vmatprep.subr.bf16.mxu1 %v4113_v61  ;;  %v4206_v60 = vld [vmem:[%s6142_s1 + $0x564] ss:$52 sps:$4 sm:$0xff]  }
  0x79   :  { %v4201_v61 = vld [vmem:[%s6142_s1 + $0x558] ss:$52 sps:$4 sm:$0xff]  }
  0x7b   :  { %2674 = vmatpush1.bf16.msra.mxu0 %v4108_v62  ;;  %2760 = vmatpush1.bf16.msra.mxu1 %v4111_v63  ;;  %v4204_v62 = vld [vmem:[%s6142_s1 + $0x560] ss:$52 sps:$4 sm:$0xff]   ;;  %v4209_v63 = vld [vmem:[%s6142_s1 + $0x5c4] ss:$52 sps:$4 sm:$0xff]  }
  0x7c   :  { %2675 = vmatprep.subr.bf16.mxu0 %v4116_v0  ;;  %2761 = vmatprep.subr.bf16.mxu1 %v4119_v1  ;;  %v4212_v0 = vld [vmem:[%s6142_s1 + $0x5cc] ss:$52 sps:$4 sm:$0xff]  }
  0x7d   :  { %v4207_v1 = vld [vmem:[%s6142_s1 + $0x5c0] ss:$52 sps:$4 sm:$0xff]  }
  0x7f   :  { %2676 = vmatpush1.bf16.msra.mxu0 %v4114_v2  ;;  %2762 = vmatpush1.bf16.msra.mxu1 %v4117_v3  ;;  %v4210_v2 = vld [vmem:[%s6142_s1 + $0x5c8] ss:$52 sps:$4 sm:$0xff]   ;;  %v4215_v3 = vld [vmem:[%s6142_s1 + $0x62c] ss:$52 sps:$4 sm:$0xff]  }
  0x80   :  { %2774 = vmatprep.subr.bf16.mxu0 %v4125_v4  ;;  %2860 = vmatprep.subr.bf16.mxu1 %v4128_v6  ;;  %v4218_v4 = vld [vmem:[%s6142_s1 + $0x634] ss:$52 sps:$4 sm:$0xff]  }
  0x81   :  { %v4213_v6 = vld [vmem:[%s6142_s1 + $0x628] ss:$52 sps:$4 sm:$0xff]  }
  0x82   :  { %2678 = vmatmul.mubr.bf16.vlgmr.msra.gmra.mrb[0].mxu0 %v4987_v7  ;;  %2764 = vmatmul.mubr.bf16.vlgmr.msra.gmra.mrb[0].mxu1 %v4987_v7 }
  0x83   :  { %2775 = vmatpush1.bf16.msra.mxu0 %v4123_v8  ;;  %2861 = vmatpush1.bf16.msra.mxu1 %v4126_v9  ;;  %v4216_v8 = vld [vmem:[%s6142_s1 + $0x630] ss:$52 sps:$4 sm:$0xff]   ;;  %v4221_v9 = vld [vmem:[%s6142_s1 + $0x694] ss:$52 sps:$4 sm:$0xff]  }
  0x84   :  { %2776 = vmatprep.subr.bf16.mxu0 %v4131_v10  ;;  %2862 = vmatprep.subr.bf16.mxu1 %v4134_v11  ;;  %v4224_v10 = vld [vmem:[%s6142_s1 + $0x69c] ss:$52 sps:$4 sm:$0xff]  }
  0x85   :  { %2806 = vmatprep.mubr.bf16.mxu0 %v4717_v47  ;;  %2892 = vmatprep.mubr.bf16.mxu1 %v4717_v47  ;;  %v4146_v47 = vld [vmem:[%s6142_s1 + $0x154] ss:$52 sps:$4 sm:$0xff]   ;;  %v4219_v11 = vld [vmem:[%s6142_s1 + $0x690] ss:$52 sps:$4 sm:$0xff]  }
  0x87   :  { %2777 = vmatpush1.bf16.msra.mxu0 %v4129_v12  ;;  %2863 = vmatpush1.bf16.msra.mxu1 %v4132_v13  ;;  %v4222_v12 = vld [vmem:[%s6142_s1 + $0x698] ss:$52 sps:$4 sm:$0xff]   ;;  %v4227_v13 = vld [vmem:[%s6142_s1 + $0x6fc] ss:$52 sps:$4 sm:$0xff]  }
  0x88   :  { %2778 = vmatprep.subr.bf16.mxu0 %v4137_v14  ;;  %2864 = vmatprep.subr.bf16.mxu1 %v4140_v15  ;;  %v4230_v14 = vld [vmem:[%s6142_s1 + $0x704] ss:$52 sps:$4 sm:$0xff]  }
  0x89   :  { %v4225_v15 = vld [vmem:[%s6142_s1 + $0x6f8] ss:$52 sps:$4 sm:$0xff]  }
  0x8b   :  { %2779 = vmatpush1.bf16.msra.mxu0 %v4135_v16  ;;  %2865 = vmatpush1.bf16.msra.mxu1 %v4138_v17  ;;  %v4228_v16 = vld [vmem:[%s6142_s1 + $0x700] ss:$52 sps:$4 sm:$0xff]   ;;  %v4233_v17 = vld [vmem:[%s6142_s1 + $0x764] ss:$52 sps:$4 sm:$0xff]  }
  0x8c   :  { %2780 = vmatprep.subr.bf16.mxu0 %v4143_v18  ;;  %2866 = vmatprep.subr.bf16.mxu1 %v4146_v47  ;;  %v4231_v18 = vld [vmem:[%s6142_s1 + $0x760] ss:$52 sps:$4 sm:$0xff]   ;;  %v4234_v47 = vld [vmem:[%s6142_s1 + $0x768] ss:$52 sps:$4 sm:$0xff]  }
  0x8f   :  { %2781 = vmatpush1.bf16.msra.mxu0 %v4141_v19  ;;  %2867 = vmatpush1.bf16.msra.mxu1 %v4144_v20  ;;  %v4239_v19 = vld [vmem:[%s6142_s1 + $0x7cc] ss:$52 sps:$4 sm:$0xff]   ;;  %v4237_v20 = vld [vmem:[%s6142_s1 + $0x7c8] ss:$52 sps:$4 sm:$0xff]  }
  0x90   :  { %2782 = vmatprep.subr.bf16.mxu0 %v4149_v21  ;;  %2868 = vmatprep.subr.bf16.mxu1 %v4152_v22  ;;  %v4240_v21 = vld [vmem:[%s6142_s1 + $0x7d0] ss:$52 sps:$4 sm:$0xff]   ;;  %v4245_v22 = vld [vmem:[%s6142_s1 + $0x834] ss:$52 sps:$4 sm:$0xff]  }
  0x93   :  { %2783 = vmatpush1.bf16.msra.mxu0 %v4147_v23  ;;  %2869 = vmatpush1.bf16.msra.mxu1 %v4150_v24  ;;  %v4248_v23 = vld [vmem:[%s6142_s1 + $0x83c] ss:$52 sps:$4 sm:$0xff]  }
  0x94   :  { %2784 = vmatprep.subr.bf16.mxu0 %v4155_v25  ;;  %2870 = vmatprep.subr.bf16.mxu1 %v4158_v26  ;;  %v4243_v24 = vld [vmem:[%s6142_s1 + $0x830] ss:$52 sps:$4 sm:$0xff]   ;;  %v4246_v25 = vld [vmem:[%s6142_s1 + $0x838] ss:$52 sps:$4 sm:$0xff]  }
  0x95   :  { %v4251_v26 = vld [vmem:[%s6142_s1 + $0x89c] ss:$52 sps:$4 sm:$0xff]  }
  0x97   :  { %2785 = vmatpush1.bf16.msra.mxu0 %v4153_v27  ;;  %2871 = vmatpush1.bf16.msra.mxu1 %v4156_v28  ;;  %v4254_v27 = vld [vmem:[%s6142_s1 + $0x8a4] ss:$52 sps:$4 sm:$0xff]  }
  0x98   :  { %2786 = vmatprep.subr.bf16.mxu0 %v4161_v29  ;;  %2872 = vmatprep.subr.bf16.mxu1 %v4164_v31  ;;  %v4249_v28 = vld [vmem:[%s6142_s1 + $0x898] ss:$52 sps:$4 sm:$0xff]   ;;  %v4252_v29 = vld [vmem:[%s6142_s1 + $0x8a0] ss:$52 sps:$4 sm:$0xff]  }
  0x99   :  { %v4257_v31 = vld [vmem:[%s6142_s1 + $0x904] ss:$52 sps:$4 sm:$0xff]  }
  0x9b   :  { %2787 = vmatpush1.bf16.msra.mxu0 %v4159_v32  ;;  %2873 = vmatpush1.bf16.msra.mxu1 %v4162_v33  ;;  %v4260_v32 = vld [vmem:[%s6142_s1 + $0x90c] ss:$52 sps:$4 sm:$0xff]  }
  0x9c   :  { %2788 = vmatprep.subr.bf16.mxu0 %v4167_v34  ;;  %2874 = vmatprep.subr.bf16.mxu1 %v4170_v35  ;;  %v4255_v33 = vld [vmem:[%s6142_s1 + $0x900] ss:$52 sps:$4 sm:$0xff]   ;;  %v4258_v34 = vld [vmem:[%s6142_s1 + $0x908] ss:$52 sps:$4 sm:$0xff]  }
  0x9d   :  { %v4263_v35 = vld [vmem:[%s6142_s1 + $0x96c] ss:$52 sps:$4 sm:$0xff]  }
  0x9f   :  { %2789 = vmatpush1.bf16.msra.mxu0 %v4165_v36  ;;  %2875 = vmatpush1.bf16.msra.mxu1 %v4168_v37  ;;  %v4266_v36 = vld [vmem:[%s6142_s1 + $0x974] ss:$52 sps:$4 sm:$0xff]  }
  0xa0   :  { %2790 = vmatprep.subr.bf16.mxu0 %v4173_v38  ;;  %2876 = vmatprep.subr.bf16.mxu1 %v4176_v39  ;;  %v4261_v37 = vld [vmem:[%s6142_s1 + $0x968] ss:$52 sps:$4 sm:$0xff]   ;;  %v4264_v38 = vld [vmem:[%s6142_s1 + $0x970] ss:$52 sps:$4 sm:$0xff]  }
  0xa1   :  { %v4269_v39 = vld [vmem:[%s6142_s1 + $0x9d4] ss:$52 sps:$4 sm:$0xff]  }
  0xa3   :  { %2791 = vmatpush1.bf16.msra.mxu0 %v4171_v40  ;;  %2877 = vmatpush1.bf16.msra.mxu1 %v4174_v41  ;;  %v4272_v40 = vld [vmem:[%s6142_s1 + $0x9dc] ss:$52 sps:$4 sm:$0xff]  }
  0xa4   :  { %2792 = vmatprep.subr.bf16.mxu0 %v4179_v42  ;;  %2878 = vmatprep.subr.bf16.mxu1 %v4182_v43  ;;  %v4267_v41 = vld [vmem:[%s6142_s1 + $0x9d0] ss:$52 sps:$4 sm:$0xff]   ;;  %v4270_v42 = vld [vmem:[%s6142_s1 + $0x9d8] ss:$52 sps:$4 sm:$0xff]  }
  0xa5   :  { %v4275_v43 = vld [vmem:[%s6142_s1 + $0xa3c] ss:$52 sps:$4 sm:$0xff]  }
  0xa7   :  { %2793 = vmatpush1.bf16.msra.mxu0 %v4177_v44  ;;  %2879 = vmatpush1.bf16.msra.mxu1 %v4180_v45  ;;  %v4278_v44 = vld [vmem:[%s6142_s1 + $0xa44] ss:$52 sps:$4 sm:$0xff]  }
  0xa8   :  { %2794 = vmatprep.subr.bf16.mxu0 %v4185_v46  ;;  %2880 = vmatprep.subr.bf16.mxu1 %v4188_v48  ;;  %v4273_v45 = vld [vmem:[%s6142_s1 + $0xa38] ss:$52 sps:$4 sm:$0xff]   ;;  %v4276_v46 = vld [vmem:[%s6142_s1 + $0xa40] ss:$52 sps:$4 sm:$0xff]  }
  0xa9   :  { %v4281_v48 = vld [vmem:[%s6142_s1 + $0xaa4] ss:$52 sps:$4 sm:$0xff]  }
  0xab   :  { %2795 = vmatpush1.bf16.msra.mxu0 %v4183_v49  ;;  %2881 = vmatpush1.bf16.msra.mxu1 %v4186_v50  ;;  %v4284_v49 = vld [vmem:[%s6142_s1 + $0xaac] ss:$52 sps:$4 sm:$0xff]  }
  0xac   :  { %2796 = vmatprep.subr.bf16.mxu0 %v4191_v51  ;;  %2882 = vmatprep.subr.bf16.mxu1 %v4194_v52  ;;  %v4279_v50 = vld [vmem:[%s6142_s1 + $0xaa0] ss:$52 sps:$4 sm:$0xff]   ;;  %v4282_v51 = vld [vmem:[%s6142_s1 + $0xaa8] ss:$52 sps:$4 sm:$0xff]  }
  0xad   :  { %v4287_v52 = vld [vmem:[%s6142_s1 + $0xb0c] ss:$52 sps:$4 sm:$0xff]  }
  0xaf   :  { %2797 = vmatpush1.bf16.msra.mxu0 %v4189_v53  ;;  %2883 = vmatpush1.bf16.msra.mxu1 %v4192_v54  ;;  %v4290_v53 = vld [vmem:[%s6142_s1 + $0xb14] ss:$52 sps:$4 sm:$0xff]  }
  0xb0   :  { %2798 = vmatprep.subr.bf16.mxu0 %v4197_v55  ;;  %2884 = vmatprep.subr.bf16.mxu1 %v4200_v56  ;;  %v4285_v54 = vld [vmem:[%s6142_s1 + $0xb08] ss:$52 sps:$4 sm:$0xff]   ;;  %v4288_v55 = vld [vmem:[%s6142_s1 + $0xb10] ss:$52 sps:$4 sm:$0xff]  }
  0xb1   :  { %v4293_v56 = vld [vmem:[%s6142_s1 + $0xb74] ss:$52 sps:$4 sm:$0xff]  }
  0xb3   :  { %2799 = vmatpush1.bf16.msra.mxu0 %v4195_v57  ;;  %2885 = vmatpush1.bf16.msra.mxu1 %v4198_v58  ;;  %v4296_v57 = vld [vmem:[%s6142_s1 + $0xb7c] ss:$52 sps:$4 sm:$0xff]  }
  0xb4   :  { %2800 = vmatprep.subr.bf16.mxu0 %v4203_v59  ;;  %2886 = vmatprep.subr.bf16.mxu1 %v4206_v60  ;;  %v4291_v58 = vld [vmem:[%s6142_s1 + $0xb70] ss:$52 sps:$4 sm:$0xff]   ;;  %v4294_v59 = vld [vmem:[%s6142_s1 + $0xb78] ss:$52 sps:$4 sm:$0xff]  }
  0xb5   :  { %v4299_v60 = vld [vmem:[%s6142_s1 + $0xbdc] ss:$52 sps:$4 sm:$0xff]  }
  0xb7   :  { %2801 = vmatpush1.bf16.msra.mxu0 %v4201_v61  ;;  %2887 = vmatpush1.bf16.msra.mxu1 %v4204_v62  ;;  %v4302_v61 = vld [vmem:[%s6142_s1 + $0xbe4] ss:$52 sps:$4 sm:$0xff]  }
  0xb8   :  { %2802 = vmatprep.subr.bf16.mxu0 %v4209_v63  ;;  %2888 = vmatprep.subr.bf16.mxu1 %v4212_v0  ;;  %v4297_v62 = vld [vmem:[%s6142_s1 + $0xbd8] ss:$52 sps:$4 sm:$0xff]   ;;  %v4300_v63 = vld [vmem:[%s6142_s1 + $0xbe0] ss:$52 sps:$4 sm:$0xff]  }
  0xb9   :  { %v4305_v0 = vld [vmem:[%s6142_s1 + $0xc44] ss:$52 sps:$4 sm:$0xff]  }
  0xbb   :  { %2803 = vmatpush1.bf16.msra.mxu0 %v4207_v1  ;;  %2889 = vmatpush1.bf16.msra.mxu1 %v4210_v2  ;;  %v4308_v1 = vld [vmem:[%s6142_s1 + $0xc4c] ss:$52 sps:$4 sm:$0xff]  }
  0xbc   :  { %2804 = vmatprep.subr.bf16.mxu0 %v4215_v3  ;;  %2890 = vmatprep.subr.bf16.mxu1 %v4218_v4  ;;  %v4303_v2 = vld [vmem:[%s6142_s1 + $0xc40] ss:$52 sps:$4 sm:$0xff]   ;;  %v4306_v3 = vld [vmem:[%s6142_s1 + $0xc48] ss:$52 sps:$4 sm:$0xff]  }
  0xbd   :  { %v4311_v4 = vld [vmem:[%s6142_s1 + $0xcac] ss:$52 sps:$4 sm:$0xff]  }
  0xbf   :  { %2805 = vmatpush1.bf16.msra.mxu0 %v4213_v6  ;;  %2891 = vmatpush1.bf16.msra.mxu1 %v4216_v8  ;;  %v4314_v6 = vld [vmem:[%s6142_s1 + $0xcb4] ss:$52 sps:$4 sm:$0xff]  }
  0xc0   :  { %2817 = vmatprep.subr.bf16.mxu0 %v4221_v9  ;;  %2903 = vmatprep.subr.bf16.mxu1 %v4224_v10  ;;  %v4309_v8 = vld [vmem:[%s6142_s1 + $0xca8] ss:$52 sps:$4 sm:$0xff]   ;;  %v4312_v9 = vld [vmem:[%s6142_s1 + $0xcb0] ss:$52 sps:$4 sm:$0xff]  }
  0xc1   :  { %v4317_v10 = vld [vmem:[%s6142_s1 + $0x24] ss:$52 sps:$4 sm:$0xff]  }
  0xc2   :  { %2807 = vmatmul.mubr.bf16.vlgmr.msra.gmra.mrb[4].mxu0 %v4787_v5  ;;  %2893 = vmatmul.mubr.bf16.vlgmr.msra.gmra.mrb[4].mxu1 %v4787_v5  ;;  %v4236_v5 = vld [vmem:[%s6142_s1 + $0x76c] ss:$52 sps:$4 sm:$0xff]  }
  0xc3   :  { %2818 = vmatpush1.bf16.msra.mxu0 %v4219_v11  ;;  %2904 = vmatpush1.bf16.msra.mxu1 %v4222_v12  ;;  %v4320_v11 = vld [vmem:[%s6142_s1 + $0x2c] ss:$52 sps:$4 sm:$0xff]  }
  0xc4   :  { %2819 = vmatprep.subr.bf16.mxu0 %v4227_v13  ;;  %2905 = vmatprep.subr.bf16.mxu1 %v4230_v14  ;;  %v4315_v12 = vld [vmem:[%s6142_s1 + $0x20] ss:$52 sps:$4 sm:$0xff]   ;;  %v4318_v13 = vld [vmem:[%s6142_s1 + $0x28] ss:$52 sps:$4 sm:$0xff]  }
  0xc5   :  { %2849 = vmatprep.mubr.bf16.mxu0 %v4866_v30  ;;  %2935 = vmatprep.mubr.bf16.mxu1 %v4866_v30  ;;  %v4242_v30 = vld [vmem:[%s6142_s1 + $0x7d4] ss:$52 sps:$4 sm:$0xff]   ;;  %v4323_v14 = vld [vmem:[%s6142_s1 + $0x8c] ss:$52 sps:$4 sm:$0xff]  }
  0xc7   :  { %2820 = vmatpush1.bf16.msra.mxu0 %v4225_v15  ;;  %2906 = vmatpush1.bf16.msra.mxu1 %v4228_v16  ;;  %v4326_v15 = vld [vmem:[%s6142_s1 + $0x94] ss:$52 sps:$4 sm:$0xff]  }
  0xc8   :  { %2821 = vmatprep.subr.bf16.mxu0 %v4233_v17  ;;  %2907 = vmatprep.subr.bf16.mxu1 %v4236_v5  ;;  %v4321_v16 = vld [vmem:[%s6142_s1 + $0x88] ss:$52 sps:$4 sm:$0xff]   ;;  %v4324_v17 = vld [vmem:[%s6142_s1 + $0x90] ss:$52 sps:$4 sm:$0xff]  }
  0xc9   :  { %v4329_v5 = vld [vmem:[%s6142_s1 + $0xf4] ss:$52 sps:$4 sm:$0xff]  }
  0xcb   :  { %2822 = vmatpush1.bf16.msra.mxu0 %v4231_v18  ;;  %2908 = vmatpush1.bf16.msra.mxu1 %v4234_v47  ;;  %v4332_v18 = vld [vmem:[%s6142_s1 + $0xfc] ss:$52 sps:$4 sm:$0xff]   ;;  %v5413_v47 = vld [vmem:[%s6143_s0 + $0x4] ss:$16 sps:$4 sm:$0xff]  }
  0xcc   :  { %2823 = vmatprep.subr.bf16.mxu0 %v4239_v19  ;;  %2909 = vmatprep.subr.bf16.mxu1 %v4242_v30  ;;  %v4330_v19 = vld [vmem:[%s6142_s1 + $0xf8] ss:$52 sps:$4 sm:$0xff]   ;;  %v4335_v30 = vld [vmem:[%s6142_s1 + $0x15c] ss:$52 sps:$4 sm:$0xff]  }
  0xcf   :  { %2824 = vmatpush1.bf16.msra.mxu0 %v4237_v20  ;;  %2910 = vmatpush1.bf16.msra.mxu1 %v4240_v21  ;;  %v4338_v20 = vld [vmem:[%s6142_s1 + $0x164] ss:$52 sps:$4 sm:$0xff]  }
  0xd0   :  { %2825 = vmatprep.subr.bf16.mxu0 %v4245_v22  ;;  %2911 = vmatprep.subr.bf16.mxu1 %v4248_v23  ;;  %v4333_v21 = vld [vmem:[%s6142_s1 + $0x158] ss:$52 sps:$4 sm:$0xff]   ;;  %v4336_v22 = vld [vmem:[%s6142_s1 + $0x160] ss:$52 sps:$4 sm:$0xff]  }
  0xd1   :  { %v4341_v23 = vld [vmem:[%s6142_s1 + $0x1c4] ss:$52 sps:$4 sm:$0xff]  }
  0xd3   :  { %2826 = vmatpush1.bf16.msra.mxu0 %v4243_v24  ;;  %2912 = vmatpush1.bf16.msra.mxu1 %v4246_v25  ;;  %v4344_v24 = vld [vmem:[%s6142_s1 + $0x1cc] ss:$52 sps:$4 sm:$0xff]  }
  0xd4   :  { %2827 = vmatprep.subr.bf16.mxu0 %v4251_v26  ;;  %2913 = vmatprep.subr.bf16.mxu1 %v4254_v27  ;;  %v4339_v25 = vld [vmem:[%s6142_s1 + $0x1c0] ss:$52 sps:$4 sm:$0xff]   ;;  %v4342_v26 = vld [vmem:[%s6142_s1 + $0x1c8] ss:$52 sps:$4 sm:$0xff]  }
  0xd5   :  { %v4347_v27 = vld [vmem:[%s6142_s1 + $0x22c] ss:$52 sps:$4 sm:$0xff]  }
  0xd7   :  { %2828 = vmatpush1.bf16.msra.mxu0 %v4249_v28  ;;  %2914 = vmatpush1.bf16.msra.mxu1 %v4252_v29  ;;  %v4350_v28 = vld [vmem:[%s6142_s1 + $0x234] ss:$52 sps:$4 sm:$0xff]  }
  0xd8   :  { %2829 = vmatprep.subr.bf16.mxu0 %v4257_v31  ;;  %2915 = vmatprep.subr.bf16.mxu1 %v4260_v32  ;;  %v4345_v29 = vld [vmem:[%s6142_s1 + $0x228] ss:$52 sps:$4 sm:$0xff]   ;;  %v4348_v31 = vld [vmem:[%s6142_s1 + $0x230] ss:$52 sps:$4 sm:$0xff]  }
  0xd9   :  { %v4353_v32 = vld [vmem:[%s6142_s1 + $0x294] ss:$52 sps:$4 sm:$0xff]  }
  0xdb   :  { %2830 = vmatpush1.bf16.msra.mxu0 %v4255_v33  ;;  %2916 = vmatpush1.bf16.msra.mxu1 %v4258_v34  ;;  %v4356_v33 = vld [vmem:[%s6142_s1 + $0x29c] ss:$52 sps:$4 sm:$0xff]  }
  0xdc   :  { %2831 = vmatprep.subr.bf16.mxu0 %v4263_v35  ;;  %2917 = vmatprep.subr.bf16.mxu1 %v4266_v36  ;;  %v4351_v34 = vld [vmem:[%s6142_s1 + $0x290] ss:$52 sps:$4 sm:$0xff]   ;;  %v4354_v35 = vld [vmem:[%s6142_s1 + $0x298] ss:$52 sps:$4 sm:$0xff]  }
  0xdd   :  { %v4359_v36 = vld [vmem:[%s6142_s1 + $0x2fc] ss:$52 sps:$4 sm:$0xff]  }
  0xdf   :  { %2832 = vmatpush1.bf16.msra.mxu0 %v4261_v37  ;;  %2918 = vmatpush1.bf16.msra.mxu1 %v4264_v38  ;;  %v4362_v37 = vld [vmem:[%s6142_s1 + $0x304] ss:$52 sps:$4 sm:$0xff]  }
  0xe0   :  { %2833 = vmatprep.subr.bf16.mxu0 %v4269_v39  ;;  %2919 = vmatprep.subr.bf16.mxu1 %v4272_v40  ;;  %v4357_v38 = vld [vmem:[%s6142_s1 + $0x2f8] ss:$52 sps:$4 sm:$0xff]   ;;  %v4360_v39 = vld [vmem:[%s6142_s1 + $0x300] ss:$52 sps:$4 sm:$0xff]  }
  0xe1   :  { %v4365_v40 = vld [vmem:[%s6142_s1 + $0x364] ss:$52 sps:$4 sm:$0xff]  }
  0xe3   :  { %2834 = vmatpush1.bf16.msra.mxu0 %v4267_v41  ;;  %2920 = vmatpush1.bf16.msra.mxu1 %v4270_v42  ;;  %v4368_v41 = vld [vmem:[%s6142_s1 + $0x36c] ss:$52 sps:$4 sm:$0xff]  }
  0xe4   :  { %2835 = vmatprep.subr.bf16.mxu0 %v4275_v43  ;;  %2921 = vmatprep.subr.bf16.mxu1 %v4278_v44  ;;  %v4363_v42 = vld [vmem:[%s6142_s1 + $0x360] ss:$52 sps:$4 sm:$0xff]   ;;  %v4366_v43 = vld [vmem:[%s6142_s1 + $0x368] ss:$52 sps:$4 sm:$0xff]  }
  0xe5   :  { %v4371_v44 = vld [vmem:[%s6142_s1 + $0x3cc] ss:$52 sps:$4 sm:$0xff]  }
  0xe7   :  { %2836 = vmatpush1.bf16.msra.mxu0 %v4273_v45  ;;  %2922 = vmatpush1.bf16.msra.mxu1 %v4276_v46  ;;  %v4374_v45 = vld [vmem:[%s6142_s1 + $0x3d4] ss:$52 sps:$4 sm:$0xff]  }
  0xe8   :  { %2837 = vmatprep.subr.bf16.mxu0 %v4281_v48  ;;  %2923 = vmatprep.subr.bf16.mxu1 %v4284_v49  ;;  %v4369_v46 = vld [vmem:[%s6142_s1 + $0x3c8] ss:$52 sps:$4 sm:$0xff]   ;;  %v4372_v48 = vld [vmem:[%s6142_s1 + $0x3d0] ss:$52 sps:$4 sm:$0xff]  }
  0xe9   :  { %v4377_v49 = vld [vmem:[%s6142_s1 + $0x434] ss:$52 sps:$4 sm:$0xff]  }
  0xeb   :  { %2838 = vmatpush1.bf16.msra.mxu0 %v4279_v50  ;;  %2924 = vmatpush1.bf16.msra.mxu1 %v4282_v51  ;;  %v4380_v50 = vld [vmem:[%s6142_s1 + $0x43c] ss:$52 sps:$4 sm:$0xff]  }
  0xec   :  { %2839 = vmatprep.subr.bf16.mxu0 %v4287_v52  ;;  %2925 = vmatprep.subr.bf16.mxu1 %v4290_v53  ;;  %v4375_v51 = vld [vmem:[%s6142_s1 + $0x430] ss:$52 sps:$4 sm:$0xff]   ;;  %v4378_v52 = vld [vmem:[%s6142_s1 + $0x438] ss:$52 sps:$4 sm:$0xff]  }
  0xed   :  { %v4383_v53 = vld [vmem:[%s6142_s1 + $0x49c] ss:$52 sps:$4 sm:$0xff]  }
  0xef   :  { %2840 = vmatpush1.bf16.msra.mxu0 %v4285_v54  ;;  %2926 = vmatpush1.bf16.msra.mxu1 %v4288_v55  ;;  %v4386_v54 = vld [vmem:[%s6142_s1 + $0x4a4] ss:$52 sps:$4 sm:$0xff]  }
  0xf0   :  { %2841 = vmatprep.subr.bf16.mxu0 %v4293_v56  ;;  %2927 = vmatprep.subr.bf16.mxu1 %v4296_v57  ;;  %v4381_v55 = vld [vmem:[%s6142_s1 + $0x498] ss:$52 sps:$4 sm:$0xff]   ;;  %v4384_v56 = vld [vmem:[%s6142_s1 + $0x4a0] ss:$52 sps:$4 sm:$0xff]  }
  0xf1   :  { %v4389_v57 = vld [vmem:[%s6142_s1 + $0x504] ss:$52 sps:$4 sm:$0xff]  }
  0xf3   :  { %2842 = vmatpush1.bf16.msra.mxu0 %v4291_v58  ;;  %2928 = vmatpush1.bf16.msra.mxu1 %v4294_v59  ;;  %v4392_v58 = vld [vmem:[%s6142_s1 + $0x50c] ss:$52 sps:$4 sm:$0xff]  }
  0xf4   :  { %2843 = vmatprep.subr.bf16.mxu0 %v4299_v60  ;;  %2929 = vmatprep.subr.bf16.mxu1 %v4302_v61  ;;  %v4387_v59 = vld [vmem:[%s6142_s1 + $0x500] ss:$52 sps:$4 sm:$0xff]   ;;  %v4390_v60 = vld [vmem:[%s6142_s1 + $0x508] ss:$52 sps:$4 sm:$0xff]  }
  0xf5   :  { %v4395_v61 = vld [vmem:[%s6142_s1 + $0x56c] ss:$52 sps:$4 sm:$0xff]  }
  0xf7   :  { %2844 = vmatpush1.bf16.msra.mxu0 %v4297_v62  ;;  %2930 = vmatpush1.bf16.msra.mxu1 %v4300_v63  ;;  %v4398_v62 = vld [vmem:[%s6142_s1 + $0x574] ss:$52 sps:$4 sm:$0xff]  }
  0xf8   :  { %2845 = vmatprep.subr.bf16.mxu0 %v4305_v0  ;;  %2931 = vmatprep.subr.bf16.mxu1 %v4308_v1  ;;  %v4393_v63 = vld [vmem:[%s6142_s1 + $0x568] ss:$52 sps:$4 sm:$0xff]   ;;  %v4396_v0 = vld [vmem:[%s6142_s1 + $0x570] ss:$52 sps:$4 sm:$0xff]  }
  0xf9   :  { %v4401_v1 = vld [vmem:[%s6142_s1 + $0x5d4] ss:$52 sps:$4 sm:$0xff]  }
  0xfb   :  { %2846 = vmatpush1.bf16.msra.mxu0 %v4303_v2  ;;  %2932 = vmatpush1.bf16.msra.mxu1 %v4306_v3  ;;  %v4404_v2 = vld [vmem:[%s6142_s1 + $0x5dc] ss:$52 sps:$4 sm:$0xff]  }
  0xfc   :  { %2847 = vmatprep.subr.bf16.mxu0 %v4311_v4  ;;  %2933 = vmatprep.subr.bf16.mxu1 %v4314_v6  ;;  %v4399_v3 = vld [vmem:[%s6142_s1 + $0x5d0] ss:$52 sps:$4 sm:$0xff]   ;;  %v4402_v4 = vld [vmem:[%s6142_s1 + $0x5d8] ss:$52 sps:$4 sm:$0xff]  }
  0xfd   :  { %v4407_v6 = vld [vmem:[%s6142_s1 + $0x63c] ss:$52 sps:$4 sm:$0xff]  }
  0xff   :  { %2848 = vmatpush1.bf16.msra.mxu0 %v4309_v8  ;;  %2934 = vmatpush1.bf16.msra.mxu1 %v4312_v9  ;;  %v4410_v8 = vld [vmem:[%s6142_s1 + $0x644] ss:$52 sps:$4 sm:$0xff]  }
 0x100   :  { %2946 = vmatprep.subr.bf16.mxu0 %v4317_v10  ;;  %3032 = vmatprep.subr.bf16.mxu1 %v4320_v11  ;;  %v4405_v9 = vld [vmem:[%s6142_s1 + $0x638] ss:$52 sps:$4 sm:$0xff]   ;;  %v4408_v10 = vld [vmem:[%s6142_s1 + $0x640] ss:$52 sps:$4 sm:$0xff]  }
 0x101   :  { %v4413_v11 = vld [vmem:[%s6142_s1 + $0x6a4] ss:$52 sps:$4 sm:$0xff]  }
 0x102   :  { %2850 = vmatmul.mubr.bf16.vlgmr.msra.gmra.mrb[4].mxu0 %v4987_v7  ;;  %2936 = vmatmul.mubr.bf16.vlgmr.msra.gmra.mrb[4].mxu1 %v4987_v7  ;;  %v4327_v7 = vld [vmem:[%s6142_s1 + $0xf0] ss:$52 sps:$4 sm:$0xff]  }
 0x103   :  { %2947 = vmatpush1.bf16.msra.mxu0 %v4315_v12  ;;  %3033 = vmatpush1.bf16.msra.mxu1 %v4318_v13  ;;  %v4416_v12 = vld [vmem:[%s6142_s1 + $0x6ac] ss:$52 sps:$4 sm:$0xff]  }
 0x104   :  { %2948 = vmatprep.subr.bf16.mxu0 %v4323_v14  ;;  %3034 = vmatprep.subr.bf16.mxu1 %v4326_v15  ;;  %v4411_v13 = vld [vmem:[%s6142_s1 + $0x6a0] ss:$52 sps:$4 sm:$0xff]   ;;  %v4414_v14 = vld [vmem:[%s6142_s1 + $0x6a8] ss:$52 sps:$4 sm:$0xff]  }
 0x105   :  { %2978 = vmatprep.mubr.bf16.mxu0 %v5413_v47  ;;  %3064 = vmatprep.mubr.bf16.mxu1 %v5413_v47  ;;  %v4419_v15 = vld [vmem:[%s6142_s1 + $0x70c] ss:$52 sps:$4 sm:$0xff]  }
 0x107   :  { %2949 = vmatpush1.bf16.msra.mxu0 %v4321_v16  ;;  %3035 = vmatpush1.bf16.msra.mxu1 %v4324_v17  ;;  %v4422_v16 = vld [vmem:[%s6142_s1 + $0x714] ss:$52 sps:$4 sm:$0xff]   ;;  %v5597_v17 = vld [vmem:[%s6143_s0] ss:$16 sps:$4 sm:$0xff]  }
 0x108   :  { %2950 = vmatprep.subr.bf16.mxu0 %v4329_v5  ;;  %3036 = vmatprep.subr.bf16.mxu1 %v4332_v18  ;;  %v4417_v5 = vld [vmem:[%s6142_s1 + $0x708] ss:$52 sps:$4 sm:$0xff]   ;;  %v4420_v18 = vld [vmem:[%s6142_s1 + $0x710] ss:$52 sps:$4 sm:$0xff]  }
 0x10b   :  { %2951 = vmatpush1.bf16.msra.mxu0 %v4327_v7  ;;  %3037 = vmatpush1.bf16.msra.mxu1 %v4330_v19  ;;  %v4425_v7 = vld [vmem:[%s6142_s1 + $0x774] ss:$52 sps:$4 sm:$0xff]   ;;  %v4428_v19 = vld [vmem:[%s6142_s1 + $0x77c] ss:$52 sps:$4 sm:$0xff]  }
 0x10c   :  { %2952 = vmatprep.subr.bf16.mxu0 %v4335_v30  ;;  %3038 = vmatprep.subr.bf16.mxu1 %v4338_v20  ;;  %v5616_v30 = vld [vmem:[%s6143_s0 + $0xc] ss:$16 sps:$4 sm:$0xff]   ;;  %v4423_v20 = vld [vmem:[%s6142_s1 + $0x770] ss:$52 sps:$4 sm:$0xff]  }
 0x10f   :  { %2953 = vmatpush1.bf16.msra.mxu0 %v4333_v21  ;;  %3039 = vmatpush1.bf16.msra.mxu1 %v4336_v22  ;;  %v4426_v21 = vld [vmem:[%s6142_s1 + $0x778] ss:$52 sps:$4 sm:$0xff]   ;;  %v4431_v22 = vld [vmem:[%s6142_s1 + $0x7dc] ss:$52 sps:$4 sm:$0xff]  }
 0x110   :  { %2954 = vmatprep.subr.bf16.mxu0 %v4341_v23  ;;  %3040 = vmatprep.subr.bf16.mxu1 %v4344_v24  ;;  %v4434_v23 = vld [vmem:[%s6142_s1 + $0x7e4] ss:$52 sps:$4 sm:$0xff]  }
 0x111   :  { %v4429_v24 = vld [vmem:[%s6142_s1 + $0x7d8] ss:$52 sps:$4 sm:$0xff]  }
 0x113   :  { %2955 = vmatpush1.bf16.msra.mxu0 %v4339_v25  ;;  %3041 = vmatpush1.bf16.msra.mxu1 %v4342_v26  ;;  %v4432_v25 = vld [vmem:[%s6142_s1 + $0x7e0] ss:$52 sps:$4 sm:$0xff]   ;;  %v4437_v26 = vld [vmem:[%s6142_s1 + $0x844] ss:$52 sps:$4 sm:$0xff]  }
 0x114   :  { %2956 = vmatprep.subr.bf16.mxu0 %v4347_v27  ;;  %3042 = vmatprep.subr.bf16.mxu1 %v4350_v28  ;;  %v4440_v27 = vld [vmem:[%s6142_s1 + $0x84c] ss:$52 sps:$4 sm:$0xff]  }
 0x115   :  { %v4435_v28 = vld [vmem:[%s6142_s1 + $0x840] ss:$52 sps:$4 sm:$0xff]  }
 0x117   :  { %2957 = vmatpush1.bf16.msra.mxu0 %v4345_v29  ;;  %3043 = vmatpush1.bf16.msra.mxu1 %v4348_v31  ;;  %v4438_v29 = vld [vmem:[%s6142_s1 + $0x848] ss:$52 sps:$4 sm:$0xff]   ;;  %v4443_v31 = vld [vmem:[%s6142_s1 + $0x8ac] ss:$52 sps:$4 sm:$0xff]  }
 0x118   :  { %2958 = vmatprep.subr.bf16.mxu0 %v4353_v32  ;;  %3044 = vmatprep.subr.bf16.mxu1 %v4356_v33  ;;  %v4446_v32 = vld [vmem:[%s6142_s1 + $0x8b4] ss:$52 sps:$4 sm:$0xff]  }
 0x119   :  { %v4441_v33 = vld [vmem:[%s6142_s1 + $0x8a8] ss:$52 sps:$4 sm:$0xff]  }
 0x11b   :  { %2959 = vmatpush1.bf16.msra.mxu0 %v4351_v34  ;;  %3045 = vmatpush1.bf16.msra.mxu1 %v4354_v35  ;;  %v4444_v34 = vld [vmem:[%s6142_s1 + $0x8b0] ss:$52 sps:$4 sm:$0xff]   ;;  %v4449_v35 = vld [vmem:[%s6142_s1 + $0x914] ss:$52 sps:$4 sm:$0xff]  }
 0x11c   :  { %2960 = vmatprep.subr.bf16.mxu0 %v4359_v36  ;;  %3046 = vmatprep.subr.bf16.mxu1 %v4362_v37  ;;  %v4452_v36 = vld [vmem:[%s6142_s1 + $0x91c] ss:$52 sps:$4 sm:$0xff]  }
 0x11f   :  { %2961 = vmatpush1.bf16.msra.mxu0 %v4357_v38  ;;  %3047 = vmatpush1.bf16.msra.mxu1 %v4360_v39 }
 0x120   :  { %2962 = vmatprep.subr.bf16.mxu0 %v4365_v40  ;;  %3048 = vmatprep.subr.bf16.mxu1 %v4368_v41 }
 0x123   :  { %2963 = vmatpush1.bf16.msra.mxu0 %v4363_v42  ;;  %3049 = vmatpush1.bf16.msra.mxu1 %v4366_v43 }
 0x124   :  { %2964 = vmatprep.subr.bf16.mxu0 %v4371_v44  ;;  %3050 = vmatprep.subr.bf16.mxu1 %v4374_v45 }
 0x127   :  { %2965 = vmatpush1.bf16.msra.mxu0 %v4369_v46  ;;  %3051 = vmatpush1.bf16.msra.mxu1 %v4372_v48  ;;  %v4447_v46 = vld [vmem:[%s6142_s1 + $0x910] ss:$52 sps:$4 sm:$0xff]  }
 0x128   :  { %2966 = vmatprep.subr.bf16.mxu0 %v4377_v49  ;;  %3052 = vmatprep.subr.bf16.mxu1 %v4380_v50 }
 0x12b   :  { %2967 = vmatpush1.bf16.msra.mxu0 %v4375_v51  ;;  %3053 = vmatpush1.bf16.msra.mxu1 %v4378_v52  ;;  %v4450_v52 = vld [vmem:[%s6142_s1 + $0x918] ss:$52 sps:$4 sm:$0xff]  }
 0x12c   :  { %2968 = vmatprep.subr.bf16.mxu0 %v4383_v53  ;;  %3054 = vmatprep.subr.bf16.mxu1 %v4386_v54  ;;  %v4455_v53 = vld [vmem:[%s6142_s1 + $0x97c] ss:$52 sps:$4 sm:$0xff]  }
 0x12f   :  { %2969 = vmatpush1.bf16.msra.mxu0 %v4381_v55  ;;  %3055 = vmatpush1.bf16.msra.mxu1 %v4384_v56 }
 0x130   :  { %2970 = vmatprep.subr.bf16.mxu0 %v4389_v57  ;;  %3056 = vmatprep.subr.bf16.mxu1 %v4392_v58  ;;  %v4458_v58 = vld [vmem:[%s6142_s1 + $0x984] ss:$52 sps:$4 sm:$0xff]  }
 0x133   :  { %2971 = vmatpush1.bf16.msra.mxu0 %v4387_v59  ;;  %3057 = vmatpush1.bf16.msra.mxu1 %v4390_v60 }
 0x134   :  { %2972 = vmatprep.subr.bf16.mxu0 %v4395_v61  ;;  %3058 = vmatprep.subr.bf16.mxu1 %v4398_v62 }
 0x137   :  { %2973 = vmatpush1.bf16.msra.mxu0 %v4393_v63  ;;  %3059 = vmatpush1.bf16.msra.mxu1 %v4396_v0 }
 0x138   :  { %2974 = vmatprep.subr.bf16.mxu0 %v4401_v1  ;;  %3060 = vmatprep.subr.bf16.mxu1 %v4404_v2  ;;  %v4453_v1 = vld [vmem:[%s6142_s1 + $0x978] ss:$52 sps:$4 sm:$0xff]   ;;  %v4456_v2 = vld [vmem:[%s6142_s1 + $0x980] ss:$52 sps:$4 sm:$0xff]  }
 0x13b   :  { %2975 = vmatpush1.bf16.msra.mxu0 %v4399_v3  ;;  %3061 = vmatpush1.bf16.msra.mxu1 %v4402_v4  ;;  %v4461_v3 = vld [vmem:[%s6142_s1 + $0x9e4] ss:$52 sps:$4 sm:$0xff]  }
 0x13c   :  { %2976 = vmatprep.subr.bf16.mxu0 %v4407_v6  ;;  %3062 = vmatprep.subr.bf16.mxu1 %v4410_v8 }
 0x13f   :  { %2977 = vmatpush1.bf16.msra.mxu0 %v4405_v9  ;;  %3063 = vmatpush1.bf16.msra.mxu1 %v4408_v10  ;;  %v4464_v10 = vld [vmem:[%s6142_s1 + $0x9ec] ss:$52 sps:$4 sm:$0xff]  }
 0x140   :  { %2989 = vmatprep.subr.bf16.mxu0 %v4413_v11  ;;  %3075 = vmatprep.subr.bf16.mxu1 %v4416_v12  ;;  %v4459_v12 = vld [vmem:[%s6142_s1 + $0x9e0] ss:$52 sps:$4 sm:$0xff]  }
 0x142   :  { %2979 = vmatmul.mubr.bf16.vlgmr.msra.gmra.mrb[8].mxu0 %v5597_v17  ;;  %3065 = vmatmul.mubr.bf16.vlgmr.msra.gmra.mrb[8].mxu1 %v5597_v17 }
 0x143   :  { %2990 = vmatpush1.bf16.msra.mxu0 %v4411_v13  ;;  %3076 = vmatpush1.bf16.msra.mxu1 %v4414_v14  ;;  %v4462_v13 = vld [vmem:[%s6142_s1 + $0x9e8] ss:$52 sps:$4 sm:$0xff]   ;;  %v4467_v14 = vld [vmem:[%s6142_s1 + $0xa4c] ss:$52 sps:$4 sm:$0xff]  }
 0x144   :  { %2991 = vmatprep.subr.bf16.mxu0 %v4419_v15  ;;  %3077 = vmatprep.subr.bf16.mxu1 %v4422_v16  ;;  %v4470_v15 = vld [vmem:[%s6142_s1 + $0xa54] ss:$52 sps:$4 sm:$0xff]  }
 0x145   :  { %3021 = vmatprep.mubr.bf16.mxu0 %v5616_v30  ;;  %3107 = vmatprep.mubr.bf16.mxu1 %v5616_v30  ;;  %v4465_v16 = vld [vmem:[%s6142_s1 + $0xa48] ss:$52 sps:$4 sm:$0xff]  }
 0x147   :  { %2992 = vmatpush1.bf16.msra.mxu0 %v4417_v5  ;;  %3078 = vmatpush1.bf16.msra.mxu1 %v4420_v18  ;;  %v4468_v5 = vld [vmem:[%s6142_s1 + $0xa50] ss:$52 sps:$4 sm:$0xff]   ;;  %v4473_v18 = vld [vmem:[%s6142_s1 + $0xab4] ss:$52 sps:$4 sm:$0xff]  }
 0x148   :  { %2993 = vmatprep.subr.bf16.mxu0 %v4425_v7  ;;  %3079 = vmatprep.subr.bf16.mxu1 %v4428_v19  ;;  %v4476_v7 = vld [vmem:[%s6142_s1 + $0xabc] ss:$52 sps:$4 sm:$0xff]  }
 0x149   :  { %v4471_v19 = vld [vmem:[%s6142_s1 + $0xab0] ss:$52 sps:$4 sm:$0xff]  }
 0x14b   :  { %2994 = vmatpush1.bf16.msra.mxu0 %v4423_v20  ;;  %3080 = vmatpush1.bf16.msra.mxu1 %v4426_v21  ;;  %v4474_v20 = vld [vmem:[%s6142_s1 + $0xab8] ss:$52 sps:$4 sm:$0xff]   ;;  %v4479_v21 = vld [vmem:[%s6142_s1 + $0xb1c] ss:$52 sps:$4 sm:$0xff]  }
 0x14c   :  { %2995 = vmatprep.subr.bf16.mxu0 %v4431_v22  ;;  %3081 = vmatprep.subr.bf16.mxu1 %v4434_v23  ;;  %v4482_v22 = vld [vmem:[%s6142_s1 + $0xb24] ss:$52 sps:$4 sm:$0xff]  }
 0x14d   :  { %v4477_v23 = vld [vmem:[%s6142_s1 + $0xb18] ss:$52 sps:$4 sm:$0xff]  }
 0x14f   :  { %2996 = vmatpush1.bf16.msra.mxu0 %v4429_v24  ;;  %3082 = vmatpush1.bf16.msra.mxu1 %v4432_v25  ;;  %v4480_v24 = vld [vmem:[%s6142_s1 + $0xb20] ss:$52 sps:$4 sm:$0xff]   ;;  %v4485_v25 = vld [vmem:[%s6142_s1 + $0xb84] ss:$52 sps:$4 sm:$0xff]  }
 0x150   :  { %2997 = vmatprep.subr.bf16.mxu0 %v4437_v26  ;;  %3083 = vmatprep.subr.bf16.mxu1 %v4440_v27  ;;  %v4488_v26 = vld [vmem:[%s6142_s1 + $0xb8c] ss:$52 sps:$4 sm:$0xff]  }
 0x151   :  { %v4483_v27 = vld [vmem:[%s6142_s1 + $0xb80] ss:$52 sps:$4 sm:$0xff]  }
 0x153   :  { %2998 = vmatpush1.bf16.msra.mxu0 %v4435_v28  ;;  %3084 = vmatpush1.bf16.msra.mxu1 %v4438_v29  ;;  %v4486_v28 = vld [vmem:[%s6142_s1 + $0xb88] ss:$52 sps:$4 sm:$0xff]   ;;  %v4491_v29 = vld [vmem:[%s6142_s1 + $0xbec] ss:$52 sps:$4 sm:$0xff]  }
 0x154   :  { %2999 = vmatprep.subr.bf16.mxu0 %v4443_v31  ;;  %3085 = vmatprep.subr.bf16.mxu1 %v4446_v32  ;;  %v4494_v31 = vld [vmem:[%s6142_s1 + $0xbf4] ss:$52 sps:$4 sm:$0xff]  }
 0x155   :  { %v5668_v37 = vpop.f32.mrb[0].mxu0  ;;  %v5670_v38 = vpop.f32.mrb[0].mxu1  ;;  %v4489_v32 = vld [vmem:[%s6142_s1 + $0xbe8] ss:$52 sps:$4 sm:$0xff]  }
 0x156   :  { %v3230_v39 = vmul.f32 %v5668_v37, %v5668_v37  ;;  %v5674_v40 = vpop.f32.mrb[1].mxu0  ;;  %v5676_v41 = vpop.f32.mrb[1].mxu1  ;;  %v3232_v48 = vmul.f32 %v5670_v38, %v5670_v38 }
 0x157   :  { %v3200_v42 = vadd.f32 %v5674_v40, %v5668_v37  ;;  %v3231_v43 = vmul.f32 %v5674_v40, %v5674_v40  ;;  %v5682_v44 = vpop.f32.mrb[2].mxu0  ;;  %v5684_v45 = vpop.f32.mrb[2].mxu1  ;;  %3000 = vmatpush1.bf16.msra.mxu0 %v4441_v33  ;;  %3086 = vmatpush1.bf16.msra.mxu1 %v4444_v34  ;;  %v3233_v59 = vmul.f32 %v5676_v41, %v5676_v41  ;;  %v4492_v33 = vld [vmem:[%s6142_s1 + $0xbf0] ss:$52 sps:$4 sm:$0xff]   ;;  %v4497_v34 = vld [vmem:[%s6142_s1 + $0xc54] ss:$52 sps:$4 sm:$0xff]  }
 0x158   :  { %v3243_v49 = vmul.f32 %v5682_v44, %v5682_v44  ;;  %v5693_v50 = vpop.f32.mrb[3].mxu0  ;;  %v5695_v51 = vpop.f32.mrb[3].mxu1  ;;  %3001 = vmatprep.subr.bf16.mxu0 %v4449_v35  ;;  %3087 = vmatprep.subr.bf16.mxu1 %v4452_v36  ;;  %v3245_v60 = vmul.f32 %v5684_v45, %v5684_v45  ;;  %v4500_v35 = vld [vmem:[%s6142_s1 + $0xc5c] ss:$52 sps:$4 sm:$0xff]  }
 0x159   :  { %v3256_v54 = vadd.f32 %v3231_v43, %v3230_v39  ;;  %v3201_v55 = vadd.f32 %v3200_v42, %v5670_v38  ;;  %v3214_v56 = vadd.f32 %v5693_v50, %v5682_v44  ;;  %v3244_v57 = vmul.f32 %v5693_v50, %v5693_v50  ;;  %v4495_v36 = vld [vmem:[%s6142_s1 + $0xc50] ss:$52 sps:$4 sm:$0xff]   ;;  %v4498_v39 = vld [vmem:[%s6142_s1 + $0xc58] ss:$52 sps:$4 sm:$0xff]  }
 0x15a   :  { %v3246_v8 = vmul.f32 %v5695_v51, %v5695_v51  ;;  %v4503_v42 = vld [vmem:[%s6142_s1 + $0xcbc] ss:$52 sps:$4 sm:$0xff]   ;;  %v4506_v43 = vld [vmem:[%s6142_s1 + $0xcc4] ss:$52 sps:$4 sm:$0xff]  }
 0x15b   :  { %v5716_v61 = vadd.f32 %v3201_v55, %v5676_v41  ;;  %v3257_v62 = vadd.f32 %v3256_v54, %v3232_v48  ;;  %v3270_v63 = vadd.f32 %v3244_v57, %v3243_v49  ;;  %v3215_v0 = vadd.f32 %v3214_v56, %v5684_v45  ;;  %3002 = vmatpush1.bf16.msra.mxu0 %v4447_v46  ;;  %v4501_v46 = vld [vmem:[%s6142_s1 + $0xcb8] ss:$52 sps:$4 sm:$0xff]   ;;  %v4504_v48 = vld [vmem:[%s6142_s1 + $0xcc0] ss:$52 sps:$4 sm:$0xff]   ;;  %v4507_v49 = vld [vmem:[%s6142_s1 + $0x370] ss:$52 sps:$4 sm:$0xff]  }
 0x15c   :  { %3088 = vmatpush1.bf16.msra.mxu1 %v4450_v52  ;;  %3003 = vmatprep.subr.bf16.mxu0 %v4455_v53  ;;  %v4508_v52 = vld [vmem:[%s6142_s1 + $0x9f0] ss:$52 sps:$4 sm:$0xff]   ;;  %v4511_v55 = vld [vmem:[%s6142_s1 + $0x3d8] ss:$52 sps:$4 sm:$0xff]  }
 0x15d   :  { %v5728_v4 = vadd.f32 %v3257_v62, %v3233_v59  ;;  %v5731_v6 = vadd.f32 %v3215_v0, %v5695_v51  ;;  %v3271_v9 = vadd.f32 %v3270_v63, %v3245_v60  ;;  %3089 = vmatprep.subr.bf16.mxu1 %v4458_v58  ;;  %v4509_v53 = vld [vmem:[%s6142_s1 + $0x30] ss:$52 sps:$4 sm:$0xff]   ;;  %v4512_v56 = vld [vmem:[%s6142_s1 + $0xa58] ss:$52 sps:$4 sm:$0xff]   ;;  %v4515_v60 = vld [vmem:[%s6142_s1 + $0x440] ss:$52 sps:$4 sm:$0xff]  }
 0x15e   :  { %v4510_v54 = vld [vmem:[%s6142_s1 + $0x6b0] ss:$52 sps:$4 sm:$0xff]   ;;  %v4546_v57 = vld [vmem:[%s6143_s0 + $0x8] ss:$16 sps:$4 sm:$0xff]   ;;  %v4516_v62 = vld [vmem:[%s6142_s1 + $0xac0] ss:$52 sps:$4 sm:$0xff]  }
 0x15f   :  { %v5738_v11 = vadd.f32 %v3271_v9, %v3246_v8  ;;  %3004 = vmatpush1.bf16.msra.mxu0 %v4453_v1  ;;  %v4513_v58 = vld [vmem:[%s6142_s1 + $0x98] ss:$52 sps:$4 sm:$0xff]   ;;  %v4517_v63 = vld [vmem:[%s6142_s1 + $0x100] ss:$52 sps:$4 sm:$0xff]   ;;  %v4519_v1 = vld [vmem:[%s6142_s1 + $0x4a8] ss:$52 sps:$4 sm:$0xff]  }
 0x160   :  { %3090 = vmatpush1.bf16.msra.mxu1 %v4456_v2  ;;  %3005 = vmatprep.subr.bf16.mxu0 %v4461_v3  ;;  %v4514_v59 = vld [vmem:[%s6142_s1 + $0x718] ss:$52 sps:$4 sm:$0xff]   ;;  %v4518_v0 = vld [vmem:[%s6142_s1 + $0x780] ss:$52 sps:$4 sm:$0xff]   ;;  %v4522_v2 = vld [vmem:[%s6142_s1 + $0x7e8] ss:$52 sps:$4 sm:$0xff]  }
 0x161   :  { %3091 = vmatprep.subr.bf16.mxu1 %v4464_v10  ;;  %v4523_v3 = vld [vmem:[%s6142_s1 + $0x510] ss:$52 sps:$4 sm:$0xff]  }
 0x162   :  { %v4524_v8 = vld [vmem:[%s6142_s1 + $0xb90] ss:$52 sps:$4 sm:$0xff]  }
 0x163   :  { %3006 = vmatpush1.bf16.msra.mxu0 %v4459_v12  ;;  %v4525_v9 = vld [vmem:[%s6142_s1 + $0x1d0] ss:$52 sps:$4 sm:$0xff]   ;;  %v4527_v12 = vld [vmem:[%s6142_s1 + $0x578] ss:$52 sps:$4 sm:$0xff]  }
 0x164   :  { %3092 = vmatpush1.bf16.msra.mxu1 %v4462_v13  ;;  %3007 = vmatprep.subr.bf16.mxu0 %v4467_v14  ;;  %v4526_v10 = vld [vmem:[%s6142_s1 + $0x850] ss:$52 sps:$4 sm:$0xff]   ;;  %v4528_v13 = vld [vmem:[%s6142_s1 + $0xbf8] ss:$52 sps:$4 sm:$0xff]  }
 0x165   :  { %3093 = vmatprep.subr.bf16.mxu1 %v4470_v15  ;;  %v4529_v14 = vld [vmem:[%s6142_s1 + $0x238] ss:$52 sps:$4 sm:$0xff]  }
 0x166   :  { %v4530_v15 = vld [vmem:[%s6142_s1 + $0x8b8] ss:$52 sps:$4 sm:$0xff]  }
 0x167   :  { %3008 = vmatpush1.bf16.msra.mxu0 %v4465_v16  ;;  %v4531_v16 = vld [vmem:[%s6142_s1 + $0x5e0] ss:$52 sps:$4 sm:$0xff]  }
 0x168   :  { %3094 = vmatpush1.bf16.msra.mxu1 %v4468_v5  ;;  %3009 = vmatprep.subr.bf16.mxu0 %v4473_v18  ;;  %v4532_v5 = vld [vmem:[%s6142_s1 + $0xc60] ss:$52 sps:$4 sm:$0xff]  }
 0x169   :  { %3095 = vmatprep.subr.bf16.mxu1 %v4476_v7  ;;  %v4533_v18 = vld [vmem:[%s6142_s1 + $0x2a0] ss:$52 sps:$4 sm:$0xff]  }
 0x16a   :  { %v4534_v7 = vld [vmem:[%s6142_s1 + $0x920] ss:$52 sps:$4 sm:$0xff]  }
 0x16b   :  { %3010 = vmatpush1.bf16.msra.mxu0 %v4471_v19  ;;  %v4535_v19 = vld [vmem:[%s6142_s1 + $0x648] ss:$52 sps:$4 sm:$0xff]  }
 0x16c   :  { %3096 = vmatpush1.bf16.msra.mxu1 %v4474_v20  ;;  %3011 = vmatprep.subr.bf16.mxu0 %v4479_v21  ;;  %v4536_v20 = vld [vmem:[%s6142_s1 + $0xcc8] ss:$52 sps:$4 sm:$0xff]  }
 0x16d   :  { %3097 = vmatprep.subr.bf16.mxu1 %v4482_v22  ;;  %v4537_v21 = vld [vmem:[%s6142_s1 + $0x308] ss:$52 sps:$4 sm:$0xff]  }
 0x16e   :  { %v4538_v22 = vld [vmem:[%s6142_s1 + $0x988] ss:$52 sps:$4 sm:$0xff]  }
 0x16f   :  { %3012 = vmatpush1.bf16.msra.mxu0 %v4477_v23 }
 0x170   :  { %3098 = vmatpush1.bf16.msra.mxu1 %v4480_v24  ;;  %3013 = vmatprep.subr.bf16.mxu0 %v4485_v25 }
 0x171   :  { %3099 = vmatprep.subr.bf16.mxu1 %v4488_v26 }
 0x173   :  { %3014 = vmatpush1.bf16.msra.mxu0 %v4483_v27 }
 0x174   :  { %3100 = vmatpush1.bf16.msra.mxu1 %v4486_v28  ;;  %3015 = vmatprep.subr.bf16.mxu0 %v4491_v29 }
 0x175   :  { %3101 = vmatprep.subr.bf16.mxu1 %v4494_v31 }
 0x177   :  { %3016 = vmatpush1.bf16.msra.mxu0 %v4489_v32 }
 0x178   :  { %3102 = vmatpush1.bf16.msra.mxu1 %v4492_v33  ;;  %3017 = vmatprep.subr.bf16.mxu0 %v4497_v34 }
 0x179   :  { %3103 = vmatprep.subr.bf16.mxu1 %v4500_v35 }
 0x17b   :  { %3018 = vmatpush1.bf16.msra.mxu0 %v4495_v36 }
 0x17c   :  { %3104 = vmatpush1.bf16.msra.mxu1 %v4498_v39  ;;  %3019 = vmatprep.subr.bf16.mxu0 %v4503_v42 }
 0x17d   :  { %3105 = vmatprep.subr.bf16.mxu1 %v4506_v43 }
 0x17f   :  { %3020 = vmatpush1.bf16.msra.mxu0 %v4501_v46 }
 0x180   :  { %3106 = vmatpush1.bf16.msra.mxu1 %v4504_v48  ;;  %3854 = vmatprep.subr.bf16.mxu0 %v4507_v49 }
 0x181   :  { %3876 = vmatprep.subr.bf16.mxu1 %v4508_v52 }
 0x182   :  { %3022 = vmatmul.mubr.bf16.vlgmr.msra.gmra.mrb[8].mxu0 %v4546_v57 }
 0x183   :  { %3108 = vmatmul.mubr.bf16.vlgmr.msra.gmra.mrb[8].mxu1 %v4546_v57  ;;  %3855 = vmatpush3.bf16.msra.mxu0 %v4509_v53 }
 0x184   :  { %3877 = vmatpush3.bf16.msra.mxu1 %v4510_v54  ;;  %3856 = vmatprep.subr.bf16.mxu0 %v4511_v55 }
 0x185   :  { %3878 = vmatprep.subr.bf16.mxu1 %v4512_v56  ;;  %3150 = vmatprep.mubr.bf16.mxu0 %v5413_v47  ;;  %v4520_v47 = vld [vmem:[%s6142_s1 + $0xb28] ss:$52 sps:$4 sm:$0xff]  }
 0x186   :  { %3191 = vmatprep.mubr.bf16.mxu1 %v5616_v30  ;;  %v4521_v30 = vld [vmem:[%s6142_s1 + $0x168] ss:$52 sps:$4 sm:$0xff]  }
 0x187   :  { %3857 = vmatpush3.bf16.msra.mxu0 %v4513_v58 }
 0x188   :  { %3879 = vmatpush3.bf16.msra.mxu1 %v4514_v59  ;;  %3858 = vmatprep.subr.bf16.mxu0 %v4515_v60 }
 0x189   :  { %3880 = vmatprep.subr.bf16.mxu1 %v4516_v62 }
 0x18b   :  { %3859 = vmatpush3.bf16.msra.mxu0 %v4517_v63 }
 0x18c   :  { %3881 = vmatpush3.bf16.msra.mxu1 %v4518_v0  ;;  %3860 = vmatprep.subr.bf16.mxu0 %v4519_v1 }
 0x18d   :  { %3882 = vmatprep.subr.bf16.mxu1 %v4520_v47 }
 0x18f   :  { %3861 = vmatpush3.bf16.msra.mxu0 %v4521_v30 }
 0x190   :  { %3883 = vmatpush3.bf16.msra.mxu1 %v4522_v2  ;;  %3862 = vmatprep.subr.bf16.mxu0 %v4523_v3 }
 0x191   :  { %3884 = vmatprep.subr.bf16.mxu1 %v4524_v8 }
 0x193   :  { %3863 = vmatpush3.bf16.msra.mxu0 %v4525_v9 }
 0x194   :  { %3885 = vmatpush3.bf16.msra.mxu1 %v4526_v10  ;;  %3864 = vmatprep.subr.bf16.mxu0 %v4527_v12 }
 0x195   :  { %3886 = vmatprep.subr.bf16.mxu1 %v4528_v13 }
 0x197   :  { %3865 = vmatpush3.bf16.msra.mxu0 %v4529_v14 }
 0x198   :  { %3887 = vmatpush3.bf16.msra.mxu1 %v4530_v15  ;;  %3866 = vmatprep.subr.bf16.mxu0 %v4531_v16 }
 0x199   :  { %3888 = vmatprep.subr.bf16.mxu1 %v4532_v5 }
 0x19b   :  { %3867 = vmatpush3.bf16.msra.mxu0 %v4533_v18 }
 0x19c   :  { %3889 = vmatpush3.bf16.msra.mxu1 %v4534_v7  ;;  %3868 = vmatprep.subr.bf16.mxu0 %v4535_v19 }
 0x19d   :  { %3890 = vmatprep.subr.bf16.mxu1 %v4536_v20 }
 0x19f   :  { %3869 = vmatpush3.bf16.msra.mxu0 %v4537_v21 }
 0x1a0   :  { %3891 = vmatpush3.bf16.msra.mxu1 %v4538_v22 }
 0x1a2   :  { %3151 = vmatmul.mubr.bf16.vlgmr.msra.gmra.mrb[12].mxu0 %v5597_v17 }
 0x1a3   :  { %3192 = vmatmul.mubr.bf16.vlgmr.msra.gmra.mrb[12].mxu1 %v4546_v57 }
 0x1d5   :  { %v5932_v23 = vpop.f32.mrb[4].mxu0  ;;  %v5934_v24 = vpop.f32.mrb[4].mxu1 }
 0x1d6   :  { %v3203_v25 = vadd.f32 %v5716_v61, %v5932_v23  ;;  %v3234_v26 = vmul.f32 %v5932_v23, %v5932_v23  ;;  %v5940_v27 = vpop.f32.mrb[5].mxu0  ;;  %v5942_v28 = vpop.f32.mrb[5].mxu1  ;;  %v3236_v39 = vmul.f32 %v5934_v24, %v5934_v24 }
 0x1d7   :  { %v3235_v29 = vmul.f32 %v5940_v27, %v5940_v27  ;;  %v5946_v31 = vpop.f32.mrb[6].mxu0  ;;  %v5948_v17 = vpop.f32.mrb[6].mxu1  ;;  %v3237_v48 = vmul.f32 %v5942_v28, %v5942_v28 }
 0x1d8   :  { %v3259_v32 = vadd.f32 %v5728_v4, %v3234_v26  ;;  %v3204_v33 = vadd.f32 %v3203_v25, %v5940_v27  ;;  %v3217_v61 = vadd.f32 %v5731_v6, %v5946_v31  ;;  %v3247_v34 = vmul.f32 %v5946_v31, %v5946_v31  ;;  %v5956_v35 = vpop.f32.mrb[7].mxu0  ;;  %v5958_v36 = vpop.f32.mrb[7].mxu1 }
 0x1d9   :  { %v3248_v42 = vmul.f32 %v5956_v35, %v5956_v35  ;;  %v3249_v49 = vmul.f32 %v5948_v17, %v5948_v17 }
 0x1da   :  { %v3260_v43 = vadd.f32 %v3259_v32, %v3235_v29  ;;  %v3205_v4 = vadd.f32 %v3204_v33, %v5934_v24  ;;  %v3273_v46 = vadd.f32 %v5738_v11, %v3247_v34  ;;  %v3218_v6 = vadd.f32 %v3217_v61, %v5956_v35 }
 0x1db   :  { %v3250_v11 = vmul.f32 %v5958_v36, %v5958_v36 }
 0x1dc   :  { %v3206_v52 = vadd.f32 %v3205_v4, %v5942_v28  ;;  %v3261_v53 = vadd.f32 %v3260_v43, %v3236_v39  ;;  %v3274_v54 = vadd.f32 %v3273_v46, %v3248_v42  ;;  %v3219_v55 = vadd.f32 %v3218_v6, %v5948_v17 }
 0x1de   :  { %v3262_v56 = vadd.f32 %v3261_v53, %v3237_v48  ;;  %v3220_v57 = vadd.f32 %v3219_v55, %v5958_v36  ;;  %v3275_v58 = vadd.f32 %v3274_v54, %v3249_v49 }
 0x1e0   :  { %v3276_v59 = vadd.f32 %v3275_v58, %v3250_v11 }
 0x255   :  { %v5976_v60 = vpop.f32.mrb[8].mxu0 }
 0x256   :  { %v3207_v62 = vadd.f32 %v3206_v52, %v5976_v60  ;;  %v3238_v63 = vmul.f32 %v5976_v60, %v5976_v60  ;;  %v5981_v0 = vpop.f32.mrb[8].mxu1  ;;  %v5983_v1 = vpop.f32.mrb[9].mxu0 }
 0x257   :  { %v3239_v47 = vmul.f32 %v5983_v1, %v5983_v1  ;;  %v5987_v30 = vpop.f32.mrb[9].mxu1  ;;  %v5989_v2 = vpop.f32.mrb[10].mxu0  ;;  %v3240_v16 = vmul.f32 %v5981_v0, %v5981_v0 }
 0x258   :  { %v3263_v3 = vadd.f32 %v3262_v56, %v3238_v63  ;;  %v3208_v8 = vadd.f32 %v3207_v62, %v5983_v1  ;;  %v3221_v9 = vadd.f32 %v3220_v57, %v5989_v2  ;;  %v5993_v10 = vpop.f32.mrb[10].mxu1  ;;  %v5995_v12 = vpop.f32.mrb[11].mxu0  ;;  %v3251_v13 = vmul.f32 %v5989_v2, %v5989_v2 }
 0x259   :  { %v3252_v14 = vmul.f32 %v5995_v12, %v5995_v12  ;;  %v6001_v15 = vpop.f32.mrb[11].mxu1  ;;  %v3241_v20 = vmul.f32 %v5987_v30, %v5987_v30  ;;  %v3253_v26 = vmul.f32 %v5993_v10, %v5993_v10 }
 0x25a   :  { %v3264_v5 = vadd.f32 %v3263_v3, %v3239_v47  ;;  %v3222_v18 = vadd.f32 %v3221_v9, %v5995_v12  ;;  %v3209_v7 = vadd.f32 %v3208_v8, %v5981_v0  ;;  %v3277_v19 = vadd.f32 %v3276_v59, %v3251_v13 }
 0x25b   :  { %v3254_v61 = vmul.f32 %v6001_v15, %v6001_v15  ;;  %v4547_v8 = vmov 0  }
 0x25c   :  { %v3210_v21 = vadd.f32 %v3209_v7, %v5987_v30  ;;  %v3265_v22 = vadd.f32 %v3264_v5, %v3240_v16  ;;  %v3223_v25 = vadd.f32 %v3222_v18, %v5993_v10  ;;  %v3278_v29 = vadd.f32 %v3277_v19, %v3252_v14  ;;  %3923 = vset.pattern.permute.xlu0 %v4547_v8 }
 0x25d   :  { %3924 = vset.pattern.permute.xlu1 %v4547_v8 }
 0x25e   :  { %v3266_v32 = vadd.f32 %v3265_v22, %v3241_v20  ;;  %v3224_v33 = vadd.f32 %v3223_v25, %v6001_v15  ;;  %v3279_v34 = vadd.f32 %v3278_v29, %v3253_v26 }
 0x260   :  { %v3280_v39 = vadd.f32 %v3279_v34, %v3254_v61  ;;  %v3292_v61 = vld [vmem:[%s6144_s2] sm:$0xff] }
 0x275   :  { %v3870_v42 = vpop.f32.mrb[12].mxu0 }
 0x276   :  { %v3892_v43 = vpop.f32.mrb[12].mxu1  ;;  %v3871_v4 = vpop.f32.mrb[13].mxu0 }
 0x277   :  { %v3872_v46 = vadd.f32 %v3871_v4, %v3870_v42  ;;  %v3893_v6 = vpop.f32.mrb[13].mxu1  ;;  %v3873_v48 = vpop.f32.mrb[14].mxu0  ;;  %v3293_v42 = vld [vmem:[%s6144_s2 + $0x8] sm:$0xff] }
 0x278   :  { %v3894_v49 = vadd.f32 %v3893_v6, %v3892_v43  ;;  %v3895_v52 = vpop.f32.mrb[14].mxu1  ;;  %v3874_v53 = vpop.f32.mrb[15].mxu0  ;;  %v3300_v6 = vld [vmem:[%s6145_s3] sm:$0xff] }
 0x279   :  { %v3875_v54 = vadd.f32 %v3874_v53, %v3873_v48  ;;  %v3896_v55 = vpop.f32.mrb[15].mxu1 }
 0x27a   :  { %v6016_v56 = vadd.f32 %v3894_v49, %v3872_v46  ;;  %v3897_v57 = vadd.f32 %v3896_v55, %v3895_v52  ;;  %v3301_v52 = vld [vmem:[%s6145_s3 + $0x8] sm:$0xff] }
 0x27c   :  { %v6018_v11 = vadd.f32 %v3897_v57, %v3875_v54  ;;  %v3211_v58 = vadd.f32 %v3210_v21, %v6016_v56  ;;  %v3242_v59 = vmul.f32 %v6016_v56, %v6016_v56 }
 0x27e   :  { %3212 = vadd.xlane.f32.xlu0 %v3211_v58  ;;  %v3267_v62 = vadd.f32 %v3266_v32, %v3242_v59  ;;  %v3255_v63 = vmul.f32 %v6018_v11, %v6018_v11  ;;  %v3225_v47 = vadd.f32 %v3224_v33, %v6018_v11 }
 0x280   :  { %3268 = vadd.xlane.f32.xlu1 %v3267_v62  ;;  %v3281_v3 = vadd.f32 %v3280_v39, %v3255_v63 }
 0x282   :  { %3226 = vadd.xlane.f32.xlu0 %v3225_v47 }
 0x284   :  { %3282 = vadd.xlane.f32.xlu1 %v3281_v3 }
 0x30b   :  { %v3213_v9 = vpop.xlane.xlu0 %3212 }
 0x30c   :  { %v3228_v13 = vmul.f32 0.0006377551, %v3213_v9 }
 0x30d   :  { %v3269_v14 = vpop.xlane.xlu1 %3268 }
 0x30e   :  { %v3286_v16 = vmul.f32 %v3228_v13, %v3228_v13  ;;  %v3284_v5 = vmul.f32 0.0006377551, %v3269_v14 }
 0x30f   :  { %v3227_v18 = vpop.xlane.xlu0 %3226 }
 0x310   :  { %v3288_v7 = vsub.f32 %v3284_v5, %v3286_v16  ;;  %v3229_v19 = vmul.f32 0.0006377551, %v3227_v18 }
 0x311   :  { %v3283_v20 = vpop.xlane.xlu1 %3282 }
 0x312   :  { %v3290_v21 = vmax.f32 %v3288_v7, 0.0  ;;  %v3287_v22 = vmul.f32 %v3229_v19, %v3229_v19  ;;  %v3285_v25 = vmul.f32 0.0006377551, %v3283_v20 }
 0x314   :  { %v3294_v26 = vadd.f32 1e-05, %v3290_v21  ;;  %v3289_v29 = vsub.f32 %v3285_v25, %v3287_v22 }
 0x316   :  { %4539 = vrsqrt.f32 %v3294_v26  ;;  %v3291_v32 = vmax.f32 %v3289_v29, 0.0 }
 0x318   :  { %v3295_v33 = vadd.f32 1e-05, %v3291_v32 }
 0x31a   :  { %4541 = vrsqrt.f32 %v3295_v33 }
 0x320   :  { %v4540_v34 = vpop.eup %4539 }
 0x321   :  { %v3298_v39 = vmul.f32 %v4540_v34, %v3292_v61 }
 0x323   :  { %3308 = vperm.xlu0 %3923, %v3298_v39   ;;  %v3302_v46 = vmul.f32 %v3298_v39, %v3228_v13 }
 0x324   :  { %v4542_v43 = vpop.eup %4541 }
 0x325   :  { %v3299_v4 = vmul.f32 %v4542_v43, %v3293_v42  ;;  %v3304_v48 = vsub.f32 %v3300_v6, %v3302_v46 }
 0x327   :  { %3313 = vperm.xlu1 %3924, %v3299_v4   ;;  %v3303_v49 = vmul.f32 %v3299_v4, %v3229_v19 }
 0x329   :  { %v3305_v53 = vsub.f32 %v3301_v52, %v3303_v49 }
 0x32b   :  { %3344 = vperm.xlu1 %3924, %v3304_v48  }
 0x32f   :  { %3349 = vperm.xlu1 %3924, %v3305_v53  }
 0x3a2   :  { %v3309_v54 = vpop.permute.xlu0 %3308 }
 0x3a3   :  { %v3316_v55 = vmul.f32 %v3309_v54, %v5668_v37  ;;  %v3317_v57 = vmul.f32 %v3309_v54, %v5674_v40  ;;  %v3318_v58 = vmul.f32 %v3309_v54, %v5670_v38  ;;  %v3319_v59 = vmul.f32 %v3309_v54, %v5676_v41 }
 0x3a4   :  { %v3320_v62 = vmul.f32 %v3309_v54, %v5932_v23  ;;  %v3321_v63 = vmul.f32 %v3309_v54, %v5940_v27  ;;  %v3322_v47 = vmul.f32 %v3309_v54, %v5934_v24  ;;  %v3323_v3 = vmul.f32 %v3309_v54, %v5942_v28 }
 0x3a5   :  { %v3324_v8 = vmul.f32 %v3309_v54, %v5976_v60  ;;  %v3325_v9 = vmul.f32 %v3309_v54, %v5983_v1  ;;  %v3326_v37 = vmul.f32 %v3309_v54, %v5981_v0  ;;  %v3327_v40 = vmul.f32 %v3309_v54, %v5987_v30 }
 0x3a6   :  { %v3314_v13 = vpop.permute.xlu1 %3313  ;;  %v3328_v38 = vmul.f32 %v3309_v54, %v6016_v56 }
 0x3a7   :  { %v3329_v41 = vmul.f32 %v3314_v13, %v5682_v44  ;;  %v3330_v23 = vmul.f32 %v3314_v13, %v5693_v50  ;;  %v3331_v27 = vmul.f32 %v3314_v13, %v5684_v45  ;;  %v3332_v24 = vmul.f32 %v3314_v13, %v5695_v51 }
 0x3a8   :  { %v3333_v28 = vmul.f32 %v3314_v13, %v5946_v31  ;;  %v3334_v60 = vmul.f32 %v3314_v13, %v5956_v35  ;;  %v3335_v1 = vmul.f32 %v3314_v13, %v5948_v17  ;;  %v3336_v0 = vmul.f32 %v3314_v13, %v5958_v36 }
 0x3a9   :  { %v3337_v30 = vmul.f32 %v3314_v13, %v5989_v2  ;;  %v3338_v56 = vmul.f32 %v3314_v13, %v5995_v12  ;;  %v3339_v44 = vmul.f32 %v3314_v13, %v5993_v10  ;;  %v3340_v50 = vmul.f32 %v3314_v13, %v6001_v15 }
 0x3aa   :  { %v3345_v14 = vpop.permute.xlu1 %3344  ;;  %v3341_v45 = vmul.f32 %v3314_v13, %v6018_v11 }
 0x3ab   :  { %v3352_v51 = vadd.f32 %v3345_v14, %v3316_v55  ;;  %v3353_v16 = vadd.f32 %v3345_v14, %v3317_v57  ;;  %v3354_v31 = vadd.f32 %v3345_v14, %v3318_v58  ;;  %v3355_v5 = vadd.f32 %v3345_v14, %v3319_v59 }
 0x3ac   :  { %v3356_v35 = vadd.f32 %v3345_v14, %v3320_v62  ;;  %v3357_v18 = vadd.f32 %v3345_v14, %v3321_v63  ;;  %v3358_v17 = vadd.f32 %v3345_v14, %v3322_v47  ;;  %v3359_v7 = vadd.f32 %v3345_v14, %v3323_v3 }
 0x3ad   :  { %v3360_v36 = vadd.f32 %v3345_v14, %v3324_v8  ;;  %v3361_v19 = vadd.f32 %v3345_v14, %v3325_v9  ;;  %v3362_v2 = vadd.f32 %v3345_v14, %v3326_v37  ;;  %v3363_v20 = vadd.f32 %v3345_v14, %v3327_v40 }
 0x3ae   :  { %v3364_v21 = vadd.f32 %v3345_v14, %v3328_v38  ;;  %v3378_v12 = vmax.f32 %v3352_v51, 0.0  ;;  %v3379_v22 = vmax.f32 %v3353_v16, 0.0  ;;  %v3380_v10 = vmax.f32 %v3354_v31, 0.0  ;;  %v3350_v25 = vpop.permute.xlu1 %3349 }
 0x3af   :  { %v3381_v15 = vmax.f32 %v3355_v5, 0.0  ;;  %v3382_v26 = vmax.f32 %v3356_v35, 0.0  ;;  %v3383_v11 = vmax.f32 %v3357_v18, 0.0  ;;  %v3384_v29 = vmax.f32 %v3358_v17, 0.0 }
 0x3b0   :  { %v3385_v32 = vmax.f32 %v3359_v7, 0.0  ;;  %v3386_v33 = vmax.f32 %v3360_v36, 0.0  ;;  %v3387_v61 = vmax.f32 %v3361_v19, 0.0  ;;  %v3388_v34 = vmax.f32 %v3362_v2, 0.0  ;;  %3404 = vst [vmem:[%s6146_s4] sm:$0xff] %v3378_v12  ;;  %3405 = vst [vmem:[%s6146_s4 + $0x8] sm:$0xff] %v3379_v22 }
 0x3b1   :  { %3406 = vst [vmem:[%s6146_s4 + $0x10] sm:$0xff] %v3380_v10  ;;  %v3389_v39 = vmax.f32 %v3363_v20, 0.0  ;;  %v3390_v42 = vmax.f32 %v3364_v21, 0.0  ;;  %3407 = vst [vmem:[%s6146_s4 + $0x18] sm:$0xff] %v3381_v15  ;;  %v3365_v43 = vadd.f32 %v3350_v25, %v3329_v41  ;;  %v3366_v4 = vadd.f32 %v3350_v25, %v3330_v23 }
 0x3b2   :  { %3408 = vst [vmem:[%s6146_s4 + $0x20] sm:$0xff] %v3382_v26  ;;  %3409 = vst [vmem:[%s6146_s4 + $0x28] sm:$0xff] %v3383_v11  ;;  %v3367_v46 = vadd.f32 %v3350_v25, %v3331_v27  ;;  %v3368_v6 = vadd.f32 %v3350_v25, %v3332_v24  ;;  %v3369_v48 = vadd.f32 %v3350_v25, %v3333_v28 }
 0x3b3   :  { %3410 = vst [vmem:[%s6146_s4 + $0x30] sm:$0xff] %v3384_v29  ;;  %3411 = vst [vmem:[%s6146_s4 + $0x38] sm:$0xff] %v3385_v32  ;;  %v3370_v49 = vadd.f32 %v3350_v25, %v3334_v60  ;;  %v3371_v52 = vadd.f32 %v3350_v25, %v3335_v1  ;;  %v3372_v53 = vadd.f32 %v3350_v25, %v3336_v0  ;;  %v3391_v62 = vmax.f32 %v3365_v43, 0.0 }
 0x3b4   :  { %3412 = vst [vmem:[%s6146_s4 + $0x40] sm:$0xff] %v3386_v33  ;;  %3413 = vst [vmem:[%s6146_s4 + $0x48] sm:$0xff] %v3387_v61  ;;  %v3373_v54 = vadd.f32 %v3350_v25, %v3337_v30  ;;  %v3374_v55 = vadd.f32 %v3350_v25, %v3338_v56  ;;  %v3375_v57 = vadd.f32 %v3350_v25, %v3339_v44  ;;  %v3392_v63 = vmax.f32 %v3366_v4, 0.0 }
 0x3b5   :  { %3414 = vst [vmem:[%s6146_s4 + $0x50] sm:$0xff] %v3388_v34  ;;  %3415 = vst [vmem:[%s6146_s4 + $0x58] sm:$0xff] %v3389_v39  ;;  %v3376_v58 = vadd.f32 %v3350_v25, %v3340_v50  ;;  %v3377_v59 = vadd.f32 %v3350_v25, %v3341_v45  ;;  %v3393_v47 = vmax.f32 %v3367_v46, 0.0  ;;  %v3394_v3 = vmax.f32 %v3368_v6, 0.0 }
 0x3b6   :  { %3416 = vst [vmem:[%s6146_s4 + $0x60] sm:$0xff] %v3390_v42  ;;  %v3395_v8 = vmax.f32 %v3369_v48, 0.0  ;;  %v3396_v9 = vmax.f32 %v3370_v49, 0.0  ;;  %v3397_v13 = vmax.f32 %v3371_v52, 0.0  ;;  %v3398_v37 = vmax.f32 %v3372_v53, 0.0  ;;  %3417 = vst [vmem:[%s6146_s4 + $0x68] sm:$0xff] %v3391_v62 }
 0x3b7   :  { %v3399_v40 = vmax.f32 %v3373_v54, 0.0  ;;  %v3400_v38 = vmax.f32 %v3374_v55, 0.0  ;;  %v3401_v41 = vmax.f32 %v3375_v57, 0.0  ;;  %v3402_v23 = vmax.f32 %v3376_v58, 0.0  ;;  %3418 = vst [vmem:[%s6146_s4 + $0x70] sm:$0xff] %v3392_v63  ;;  %3419 = vst [vmem:[%s6146_s4 + $0x78] sm:$0xff] %v3393_v47 }
 0x3b8   :  { %v3403_v27 = vmax.f32 %v3377_v59, 0.0  ;;  %3420 = vst [vmem:[%s6146_s4 + $0x80] sm:$0xff] %v3394_v3  ;;  %3421 = vst [vmem:[%s6146_s4 + $0x88] sm:$0xff] %v3395_v8 }
 0x3b9   :  { %3422 = vst [vmem:[%s6146_s4 + $0x90] sm:$0xff] %v3396_v9  ;;  %3423 = vst [vmem:[%s6146_s4 + $0x98] sm:$0xff] %v3397_v13 }
 0x3ba   :  { %3424 = vst [vmem:[%s6146_s4 + $0xa0] sm:$0xff] %v3398_v37  ;;  %3425 = vst [vmem:[%s6146_s4 + $0xa8] sm:$0xff] %v3399_v40 }
 0x3bb   :  { %3426 = vst [vmem:[%s6146_s4 + $0xb0] sm:$0xff] %v3400_v38  ;;  %3427 = vst [vmem:[%s6146_s4 + $0xb8] sm:$0xff] %v3401_v41 }
 0x3bc   :  { %3428 = vst [vmem:[%s6146_s4 + $0xc0] sm:$0xff] %v3402_v23  ;;  %3429 = vst [vmem:[%s6146_s4 + $0xc8] sm:$0xff] %v3403_v27 }

// kernel: generator_forward.7
= control target key start
LH: loop header
LB: loop body
LE: loop exit
PB: predicated region body
PF: predicated region fallthrough
CT: control target
= control target key end

     0   :  { %s2879_s1 = inlined_call_operand.vmem [shape: bf16[256,1664], index: 1, kind: input, shape index: {}]   ;;  %s2880_s0 = inlined_call_operand.vmem [shape: bf16[8,256], index: 0, kind: input, shape index: {}]   ;;  %s2881_s2 = inlined_call_operand.vmem [shape: f32[8,1664], index: 2, kind: output, shape index: {}]  }
   0x1   :  { %v1848_v0 = vld [vmem:[%s2879_s1 + $0x4] ss:$52 sps:$4 sm:$0xff]   ;;  %v1850_v1 = vld [vmem:[%s2879_s1] ss:$52 sps:$4 sm:$0xff]   ;;  %v1853_v3 = vld [vmem:[%s2879_s1 + $0x68] ss:$52 sps:$4 sm:$0xff]  }
   0x2   :  { %1300 = vmatprep.subr.bf16.mxu0 %v1848_v0  ;;  %v1851_v2 = vld [vmem:[%s2879_s1 + $0x6c] ss:$52 sps:$4 sm:$0xff]   ;;  %v1854_v4 = vld [vmem:[%s2879_s1 + $0xd4] ss:$52 sps:$4 sm:$0xff]   ;;  %v1856_v5 = vld [vmem:[%s2879_s1 + $0xd0] ss:$52 sps:$4 sm:$0xff]  }
   0x3   :  { %1301 = vmatpush1.bf16.msra.mxu0 %v1850_v1  ;;  %v1857_v6 = vld [vmem:[%s2879_s1 + $0x13c] ss:$52 sps:$4 sm:$0xff]   ;;  %v1859_v7 = vld [vmem:[%s2879_s1 + $0x138] ss:$52 sps:$4 sm:$0xff]   ;;  %v1878_v11 = vld [vmem:[%s2879_s1 + $0x74] ss:$52 sps:$4 sm:$0xff]  }
   0x4   :  { %1302 = vmatprep.subr.bf16.mxu0 %v1851_v2  ;;  %v1872_v8 = vld [vmem:[%s2879_s1 + $0xc] ss:$52 sps:$4 sm:$0xff]   ;;  %v1860_v9 = vld [vmem:[%s2879_s1 + $0x1a4] ss:$52 sps:$4 sm:$0xff]   ;;  %v1876_v10 = vld [vmem:[%s2879_s1 + $0x8] ss:$52 sps:$4 sm:$0xff]  }
   0x5   :  { %1341 = vmatprep.subr.bf16.mxu1 %v1872_v8  ;;  %v1862_v12 = vld [vmem:[%s2879_s1 + $0x1a0] ss:$52 sps:$4 sm:$0xff]   ;;  %v1882_v14 = vld [vmem:[%s2879_s1 + $0x70] ss:$52 sps:$4 sm:$0xff]   ;;  %v1865_v16 = vld [vmem:[%s2879_s1 + $0x208] ss:$52 sps:$4 sm:$0xff]  }
   0x6   :  { %1342 = vmatpush1.bf16.msra.mxu1 %v1876_v10  ;;  %v1863_v13 = vld [vmem:[%s2879_s1 + $0x20c] ss:$52 sps:$4 sm:$0xff]   ;;  %v1884_v15 = vld [vmem:[%s2879_s1 + $0xdc] ss:$52 sps:$4 sm:$0xff]   ;;  %v1890_v18 = vld [vmem:[%s2879_s1 + $0x144] ss:$52 sps:$4 sm:$0xff]  }
   0x7   :  { %1303 = vmatpush1.bf16.msra.mxu0 %v1853_v3  ;;  %1343 = vmatprep.subr.bf16.mxu1 %v1878_v11  ;;  %v1888_v17 = vld [vmem:[%s2879_s1 + $0xd8] ss:$52 sps:$4 sm:$0xff]   ;;  %v1866_v19 = vld [vmem:[%s2879_s1 + $0x274] ss:$52 sps:$4 sm:$0xff]   ;;  %v1868_v21 = vld [vmem:[%s2879_s1 + $0x270] ss:$52 sps:$4 sm:$0xff]  }
   0x8   :  { %1304 = vmatprep.subr.bf16.mxu0 %v1854_v4  ;;  %v1894_v20 = vld [vmem:[%s2879_s1 + $0x140] ss:$52 sps:$4 sm:$0xff]   ;;  %v1869_v23 = vld [vmem:[%s2879_s1 + $0x2dc] ss:$52 sps:$4 sm:$0xff]   ;;  %v1871_v24 = vld [vmem:[%s2879_s1 + $0x2d8] ss:$52 sps:$4 sm:$0xff]  }
   0x9   :  { %v1896_v22 = vld [vmem:[%s2879_s1 + $0x1ac] ss:$52 sps:$4 sm:$0xff]   ;;  %v1900_v25 = vld [vmem:[%s2879_s1 + $0x1a8] ss:$52 sps:$4 sm:$0xff]   ;;  %v1874_v27 = vld [vmem:[%s2879_s1 + $0x344] ss:$52 sps:$4 sm:$0xff]  }
   0xa   :  { %1344 = vmatpush1.bf16.msra.mxu1 %v1882_v14  ;;  %v1902_v26 = vld [vmem:[%s2879_s1 + $0x214] ss:$52 sps:$4 sm:$0xff]   ;;  %v1906_v28 = vld [vmem:[%s2879_s1 + $0x210] ss:$52 sps:$4 sm:$0xff]   ;;  %v1880_v30 = vld [vmem:[%s2879_s1 + $0x3ac] ss:$52 sps:$4 sm:$0xff]  }
   0xb   :  { %1305 = vmatpush1.bf16.msra.mxu0 %v1856_v5  ;;  %1345 = vmatprep.subr.bf16.mxu1 %v1884_v15  ;;  %v1877_v29 = vld [vmem:[%s2879_s1 + $0x340] ss:$52 sps:$4 sm:$0xff]   ;;  %v1908_v31 = vld [vmem:[%s2879_s1 + $0x27c] ss:$52 sps:$4 sm:$0xff]   ;;  %v1912_v35 = vld [vmem:[%s2879_s1 + $0x278] ss:$52 sps:$4 sm:$0xff]  }
   0xc   :  { %1306 = vmatprep.subr.bf16.mxu0 %v1857_v6  ;;  %v12_v32 = vld [vmem:[%s2880_s0] sm:$0xff]  ;;  %v1883_v34 = vld [vmem:[%s2879_s1 + $0x3a8] ss:$52 sps:$4 sm:$0xff]   ;;  %v1895_v42 = vld [vmem:[%s2879_s1 + $0x478] ss:$52 sps:$4 sm:$0xff]  }
   0xd   :  { %v2294_v33 = vcombine.high %v12_v32, %v12_v32  ;;  %v1914_v36 = vld [vmem:[%s2879_s1 + $0x2e4] ss:$52 sps:$4 sm:$0xff]   ;;  %v1886_v37 = vld [vmem:[%s2879_s1 + $0x414] ss:$52 sps:$4 sm:$0xff]   ;;  %v1921_v40 = vld [vmem:[%s2879_s1 + $0x34c] ss:$52 sps:$4 sm:$0xff]   ;;  %v2382_v62 = vcombine.low %v12_v32, %v12_v32 }
   0xe   :  { %1346 = vmatpush1.bf16.msra.mxu1 %v1888_v17  ;;  %v1889_v38 = vld [vmem:[%s2879_s1 + $0x410] ss:$52 sps:$4 sm:$0xff]   ;;  %v1918_v39 = vld [vmem:[%s2879_s1 + $0x2e0] ss:$52 sps:$4 sm:$0xff]   ;;  %v1924_v43 = vld [vmem:[%s2879_s1 + $0x348] ss:$52 sps:$4 sm:$0xff]  }
   0xf   :  { %1307 = vmatpush1.bf16.msra.mxu0 %v1859_v7  ;;  %1347 = vmatprep.subr.bf16.mxu1 %v1890_v18  ;;  %v1892_v41 = vld [vmem:[%s2879_s1 + $0x47c] ss:$52 sps:$4 sm:$0xff]   ;;  %v1928_v44 = vld [vmem:[%s2879_s1 + $0x3b4] ss:$52 sps:$4 sm:$0xff]   ;;  %v1898_v45 = vld [vmem:[%s2879_s1 + $0x4e4] ss:$52 sps:$4 sm:$0xff]  }
  0x10   :  { %1308 = vmatprep.subr.bf16.mxu0 %v1860_v9  ;;  %1332 = vmatprep.mubr.bf16.mxu0 %v2294_v33  ;;  %v1901_v46 = vld [vmem:[%s2879_s1 + $0x4e0] ss:$52 sps:$4 sm:$0xff]   ;;  %v1930_v47 = vld [vmem:[%s2879_s1 + $0x3b0] ss:$52 sps:$4 sm:$0xff]   ;;  %v1907_v50 = vld [vmem:[%s2879_s1 + $0x548] ss:$52 sps:$4 sm:$0xff]  }
  0x11   :  { %1373 = vmatprep.mubr.bf16.mxu1 %v2294_v33  ;;  %v1934_v48 = vld [vmem:[%s2879_s1 + $0x41c] ss:$52 sps:$4 sm:$0xff]   ;;  %v1904_v49 = vld [vmem:[%s2879_s1 + $0x54c] ss:$52 sps:$4 sm:$0xff]   ;;  %v1940_v52 = vld [vmem:[%s2879_s1 + $0x484] ss:$52 sps:$4 sm:$0xff]  }
  0x12   :  { %1348 = vmatpush1.bf16.msra.mxu1 %v1894_v20  ;;  %v1936_v51 = vld [vmem:[%s2879_s1 + $0x418] ss:$52 sps:$4 sm:$0xff]   ;;  %v1910_v53 = vld [vmem:[%s2879_s1 + $0x5b4] ss:$52 sps:$4 sm:$0xff]   ;;  %v1913_v54 = vld [vmem:[%s2879_s1 + $0x5b0] ss:$52 sps:$4 sm:$0xff]  }
  0x13   :  { %1309 = vmatpush1.bf16.msra.mxu0 %v1862_v12  ;;  %1349 = vmatprep.subr.bf16.mxu1 %v1896_v22  ;;  %v1942_v55 = vld [vmem:[%s2879_s1 + $0x480] ss:$52 sps:$4 sm:$0xff]   ;;  %v1916_v57 = vld [vmem:[%s2879_s1 + $0x61c] ss:$52 sps:$4 sm:$0xff]   ;;  %v1919_v58 = vld [vmem:[%s2879_s1 + $0x618] ss:$52 sps:$4 sm:$0xff]  }
  0x14   :  { %1310 = vmatprep.subr.bf16.mxu0 %v1863_v13  ;;  %v1946_v56 = vld [vmem:[%s2879_s1 + $0x4ec] ss:$52 sps:$4 sm:$0xff]   ;;  %v1948_v59 = vld [vmem:[%s2879_s1 + $0x4e8] ss:$52 sps:$4 sm:$0xff]   ;;  %v1925_v63 = vld [vmem:[%s2879_s1 + $0x10] ss:$52 sps:$4 sm:$0xff]  }
  0x15   :  { %v1952_v60 = vld [vmem:[%s2879_s1 + $0x554] ss:$52 sps:$4 sm:$0xff]   ;;  %v1954_v0 = vld [vmem:[%s2879_s1 + $0x550] ss:$52 sps:$4 sm:$0xff]   ;;  %v1931_v3 = vld [vmem:[%s2879_s1 + $0x78] ss:$52 sps:$4 sm:$0xff]  }
  0x16   :  { %1350 = vmatpush1.bf16.msra.mxu1 %v1900_v25  ;;  %v1927_v61 = vld [vmem:[%s2879_s1 + $0x14] ss:$52 sps:$4 sm:$0xff]   ;;  %v1958_v1 = vld [vmem:[%s2879_s1 + $0x5bc] ss:$52 sps:$4 sm:$0xff]   ;;  %v1960_v4 = vld [vmem:[%s2879_s1 + $0x5b8] ss:$52 sps:$4 sm:$0xff]  }
  0x17   :  { %1311 = vmatpush1.bf16.msra.mxu0 %v1865_v16  ;;  %1351 = vmatprep.subr.bf16.mxu1 %v1902_v26  ;;  %v1933_v2 = vld [vmem:[%s2879_s1 + $0x7c] ss:$52 sps:$4 sm:$0xff]   ;;  %v1964_v5 = vld [vmem:[%s2879_s1 + $0x624] ss:$52 sps:$4 sm:$0xff]   ;;  %v1937_v7 = vld [vmem:[%s2879_s1 + $0xe0] ss:$52 sps:$4 sm:$0xff]  }
  0x18   :  { %1312 = vmatprep.subr.bf16.mxu0 %v1866_v19  ;;  %v1939_v6 = vld [vmem:[%s2879_s1 + $0xe4] ss:$52 sps:$4 sm:$0xff]   ;;  %v1966_v8 = vld [vmem:[%s2879_s1 + $0x620] ss:$52 sps:$4 sm:$0xff]   ;;  %v1972_v9 = vld [vmem:[%s2879_s1 + $0x1c] ss:$52 sps:$4 sm:$0xff]  }
  0x19   :  { %v1945_v10 = vld [vmem:[%s2879_s1 + $0x14c] ss:$52 sps:$4 sm:$0xff]   ;;  %v1943_v11 = vld [vmem:[%s2879_s1 + $0x148] ss:$52 sps:$4 sm:$0xff]   ;;  %v1978_v13 = vld [vmem:[%s2879_s1 + $0x84] ss:$52 sps:$4 sm:$0xff]  }
  0x1a   :  { %1352 = vmatpush1.bf16.msra.mxu1 %v1906_v28  ;;  %v1970_v12 = vld [vmem:[%s2879_s1 + $0x18] ss:$52 sps:$4 sm:$0xff]   ;;  %v1951_v14 = vld [vmem:[%s2879_s1 + $0x1b4] ss:$52 sps:$4 sm:$0xff]   ;;  %v1949_v15 = vld [vmem:[%s2879_s1 + $0x1b0] ss:$52 sps:$4 sm:$0xff]  }
  0x1b   :  { %1313 = vmatpush1.bf16.msra.mxu0 %v1868_v21  ;;  %1353 = vmatprep.subr.bf16.mxu1 %v1908_v31  ;;  %v1976_v16 = vld [vmem:[%s2879_s1 + $0x80] ss:$52 sps:$4 sm:$0xff]   ;;  %v1957_v18 = vld [vmem:[%s2879_s1 + $0x21c] ss:$52 sps:$4 sm:$0xff]   ;;  %v1955_v19 = vld [vmem:[%s2879_s1 + $0x218] ss:$52 sps:$4 sm:$0xff]  }
  0x1c   :  { %1314 = vmatprep.subr.bf16.mxu0 %v1869_v23  ;;  %v1984_v17 = vld [vmem:[%s2879_s1 + $0xec] ss:$52 sps:$4 sm:$0xff]   ;;  %v1982_v20 = vld [vmem:[%s2879_s1 + $0xe8] ss:$52 sps:$4 sm:$0xff]   ;;  %v1963_v22 = vld [vmem:[%s2879_s1 + $0x284] ss:$52 sps:$4 sm:$0xff]  }
  0x1d   :  { %v1990_v21 = vld [vmem:[%s2879_s1 + $0x154] ss:$52 sps:$4 sm:$0xff]   ;;  %v1996_v25 = vld [vmem:[%s2879_s1 + $0x1bc] ss:$52 sps:$4 sm:$0xff]   ;;  %v1969_v26 = vld [vmem:[%s2879_s1 + $0x2ec] ss:$52 sps:$4 sm:$0xff]  }
  0x1e   :  { %1354 = vmatpush1.bf16.msra.mxu1 %v1912_v35  ;;  %v1961_v23 = vld [vmem:[%s2879_s1 + $0x280] ss:$52 sps:$4 sm:$0xff]   ;;  %v1994_v28 = vld [vmem:[%s2879_s1 + $0x1b8] ss:$52 sps:$4 sm:$0xff]   ;;  %v1973_v31 = vld [vmem:[%s2879_s1 + $0x350] ss:$52 sps:$4 sm:$0xff]  }
  0x1f   :  { %1315 = vmatpush1.bf16.msra.mxu0 %v1871_v24  ;;  %1355 = vmatprep.subr.bf16.mxu1 %v1914_v36  ;;  %v1988_v24 = vld [vmem:[%s2879_s1 + $0x150] ss:$52 sps:$4 sm:$0xff]   ;;  %v2000_v32 = vld [vmem:[%s2879_s1 + $0x220] ss:$52 sps:$4 sm:$0xff]   ;;  %v1979_v36 = vld [vmem:[%s2879_s1 + $0x3b8] ss:$52 sps:$4 sm:$0xff]  }
  0x20   :  { %1316 = vmatprep.subr.bf16.mxu0 %v1874_v27  ;;  %v1967_v27 = vld [vmem:[%s2879_s1 + $0x2e8] ss:$52 sps:$4 sm:$0xff]  }
  0x21   :  { %v1981_v35 = vld [vmem:[%s2879_s1 + $0x3bc] ss:$52 sps:$4 sm:$0xff]  }
  0x22   :  { %1356 = vmatpush1.bf16.msra.mxu1 %v1918_v39  ;;  %v1987_v39 = vld [vmem:[%s2879_s1 + $0x424] ss:$52 sps:$4 sm:$0xff]  }
  0x23   :  { %1317 = vmatpush1.bf16.msra.mxu0 %v1877_v29  ;;  %1357 = vmatprep.subr.bf16.mxu1 %v1921_v40  ;;  %v2002_v29 = vld [vmem:[%s2879_s1 + $0x224] ss:$52 sps:$4 sm:$0xff]   ;;  %v1985_v40 = vld [vmem:[%s2879_s1 + $0x420] ss:$52 sps:$4 sm:$0xff]  }
  0x24   :  { %1318 = vmatprep.subr.bf16.mxu0 %v1880_v30  ;;  %v1975_v30 = vld [vmem:[%s2879_s1 + $0x354] ss:$52 sps:$4 sm:$0xff]  }
  0x26   :  { %1358 = vmatpush1.bf16.msra.mxu1 %v1924_v43  ;;  %v1993_v43 = vld [vmem:[%s2879_s1 + $0x48c] ss:$52 sps:$4 sm:$0xff]  }
  0x27   :  { %1319 = vmatpush1.bf16.msra.mxu0 %v1883_v34  ;;  %1359 = vmatprep.subr.bf16.mxu1 %v1928_v44  ;;  %v2008_v34 = vld [vmem:[%s2879_s1 + $0x28c] ss:$52 sps:$4 sm:$0xff]   ;;  %v1991_v44 = vld [vmem:[%s2879_s1 + $0x488] ss:$52 sps:$4 sm:$0xff]  }
  0x28   :  { %1320 = vmatprep.subr.bf16.mxu0 %v1886_v37  ;;  %v2006_v37 = vld [vmem:[%s2879_s1 + $0x288] ss:$52 sps:$4 sm:$0xff]  }
  0x2a   :  { %1360 = vmatpush1.bf16.msra.mxu1 %v1930_v47  ;;  %v1999_v47 = vld [vmem:[%s2879_s1 + $0x4f4] ss:$52 sps:$4 sm:$0xff]  }
  0x2b   :  { %1321 = vmatpush1.bf16.msra.mxu0 %v1889_v38  ;;  %1361 = vmatprep.subr.bf16.mxu1 %v1934_v48  ;;  %v2014_v38 = vld [vmem:[%s2879_s1 + $0x2f4] ss:$52 sps:$4 sm:$0xff]   ;;  %v1997_v48 = vld [vmem:[%s2879_s1 + $0x4f0] ss:$52 sps:$4 sm:$0xff]  }
  0x2c   :  { %1322 = vmatprep.subr.bf16.mxu0 %v1892_v41  ;;  %v2012_v41 = vld [vmem:[%s2879_s1 + $0x2f0] ss:$52 sps:$4 sm:$0xff]  }
  0x2e   :  { %1362 = vmatpush1.bf16.msra.mxu1 %v1936_v51  ;;  %v2005_v51 = vld [vmem:[%s2879_s1 + $0x55c] ss:$52 sps:$4 sm:$0xff]  }
  0x2f   :  { %1323 = vmatpush1.bf16.msra.mxu0 %v1895_v42  ;;  %1363 = vmatprep.subr.bf16.mxu1 %v1940_v52  ;;  %v2020_v42 = vld [vmem:[%s2879_s1 + $0x35c] ss:$52 sps:$4 sm:$0xff]   ;;  %v2003_v52 = vld [vmem:[%s2879_s1 + $0x558] ss:$52 sps:$4 sm:$0xff]  }
  0x30   :  { %1324 = vmatprep.subr.bf16.mxu0 %v1898_v45  ;;  %v2018_v45 = vld [vmem:[%s2879_s1 + $0x358] ss:$52 sps:$4 sm:$0xff]  }
  0x32   :  { %1364 = vmatpush1.bf16.msra.mxu1 %v1942_v55  ;;  %v2011_v55 = vld [vmem:[%s2879_s1 + $0x5c4] ss:$52 sps:$4 sm:$0xff]  }
  0x33   :  { %1325 = vmatpush1.bf16.msra.mxu0 %v1901_v46  ;;  %1365 = vmatprep.subr.bf16.mxu1 %v1946_v56  ;;  %v2026_v46 = vld [vmem:[%s2879_s1 + $0x3c4] ss:$52 sps:$4 sm:$0xff]   ;;  %v2009_v56 = vld [vmem:[%s2879_s1 + $0x5c0] ss:$52 sps:$4 sm:$0xff]  }
  0x34   :  { %1326 = vmatprep.subr.bf16.mxu0 %v1904_v49  ;;  %v2024_v49 = vld [vmem:[%s2879_s1 + $0x3c0] ss:$52 sps:$4 sm:$0xff]  }
  0x36   :  { %1366 = vmatpush1.bf16.msra.mxu1 %v1948_v59  ;;  %v2017_v59 = vld [vmem:[%s2879_s1 + $0x62c] ss:$52 sps:$4 sm:$0xff]  }
  0x37   :  { %1327 = vmatpush1.bf16.msra.mxu0 %v1907_v50  ;;  %1367 = vmatprep.subr.bf16.mxu1 %v1952_v60  ;;  %v2032_v50 = vld [vmem:[%s2879_s1 + $0x42c] ss:$52 sps:$4 sm:$0xff]   ;;  %v2015_v60 = vld [vmem:[%s2879_s1 + $0x628] ss:$52 sps:$4 sm:$0xff]  }
  0x38   :  { %1328 = vmatprep.subr.bf16.mxu0 %v1910_v53  ;;  %v2030_v53 = vld [vmem:[%s2879_s1 + $0x428] ss:$52 sps:$4 sm:$0xff]  }
  0x3a   :  { %1368 = vmatpush1.bf16.msra.mxu1 %v1954_v0  ;;  %v2023_v0 = vld [vmem:[%s2879_s1 + $0x24] ss:$52 sps:$4 sm:$0xff]  }
  0x3b   :  { %1329 = vmatpush1.bf16.msra.mxu0 %v1913_v54  ;;  %1369 = vmatprep.subr.bf16.mxu1 %v1958_v1  ;;  %v2038_v54 = vld [vmem:[%s2879_s1 + $0x494] ss:$52 sps:$4 sm:$0xff]  }
  0x3c   :  { %1330 = vmatprep.subr.bf16.mxu0 %v1916_v57  ;;  %v2036_v57 = vld [vmem:[%s2879_s1 + $0x490] ss:$52 sps:$4 sm:$0xff]   ;;  %v2021_v1 = vld [vmem:[%s2879_s1 + $0x20] ss:$52 sps:$4 sm:$0xff]  }
  0x3e   :  { %1370 = vmatpush1.bf16.msra.mxu1 %v1960_v4  ;;  %v2029_v4 = vld [vmem:[%s2879_s1 + $0x8c] ss:$52 sps:$4 sm:$0xff]  }
  0x3f   :  { %1331 = vmatpush1.bf16.msra.mxu0 %v1919_v58  ;;  %1371 = vmatprep.subr.bf16.mxu1 %v1964_v5  ;;  %v2044_v58 = vld [vmem:[%s2879_s1 + $0x4fc] ss:$52 sps:$4 sm:$0xff]  }
  0x40   :  { %1382 = vmatprep.subr.bf16.mxu0 %v1927_v61  ;;  %v2042_v61 = vld [vmem:[%s2879_s1 + $0x4f8] ss:$52 sps:$4 sm:$0xff]   ;;  %v2027_v5 = vld [vmem:[%s2879_s1 + $0x88] ss:$52 sps:$4 sm:$0xff]  }
  0x42   :  { %1333 = vmatmul.mubr.bf16.vlgmr.msra.gmra.mrb[0].mxu0 %v2382_v62  ;;  %1372 = vmatpush1.bf16.msra.mxu1 %v1966_v8  ;;  %v2035_v8 = vld [vmem:[%s2879_s1 + $0xf4] ss:$52 sps:$4 sm:$0xff]  }
  0x43   :  { %1383 = vmatpush1.bf16.msra.mxu0 %v1925_v63  ;;  %1414 = vmatprep.mubr.bf16.mxu0 %v2294_v33  ;;  %v2050_v63 = vld [vmem:[%s2879_s1 + $0x564] ss:$52 sps:$4 sm:$0xff]  }
  0x44   :  { %1384 = vmatprep.subr.bf16.mxu0 %v1933_v2  ;;  %1423 = vmatprep.subr.bf16.mxu1 %v1972_v9  ;;  %v2048_v2 = vld [vmem:[%s2879_s1 + $0x560] ss:$52 sps:$4 sm:$0xff]   ;;  %v2060_v9 = vld [vmem:[%s2879_s1 + $0x630] ss:$52 sps:$4 sm:$0xff]  }
  0x45   :  { %1374 = vmatmul.mubr.bf16.vlgmr.msra.gmra.mrb[0].mxu1 %v2382_v62 }
  0x46   :  { %1424 = vmatpush1.bf16.msra.mxu1 %v1970_v12  ;;  %1455 = vmatprep.mubr.bf16.mxu1 %v2294_v33  ;;  %v2041_v12 = vld [vmem:[%s2879_s1 + $0x15c] ss:$52 sps:$4 sm:$0xff]  }
  0x47   :  { %1385 = vmatpush1.bf16.msra.mxu0 %v1931_v3  ;;  %1425 = vmatprep.subr.bf16.mxu1 %v1978_v13  ;;  %v2056_v3 = vld [vmem:[%s2879_s1 + $0x5cc] ss:$52 sps:$4 sm:$0xff]  }
  0x48   :  { %1386 = vmatprep.subr.bf16.mxu0 %v1939_v6  ;;  %v2054_v6 = vld [vmem:[%s2879_s1 + $0x5c8] ss:$52 sps:$4 sm:$0xff]   ;;  %v2039_v13 = vld [vmem:[%s2879_s1 + $0x158] ss:$52 sps:$4 sm:$0xff]  }
  0x4a   :  { %1426 = vmatpush1.bf16.msra.mxu1 %v1976_v16  ;;  %v2047_v16 = vld [vmem:[%s2879_s1 + $0x1c4] ss:$52 sps:$4 sm:$0xff]  }
  0x4b   :  { %1387 = vmatpush1.bf16.msra.mxu0 %v1937_v7  ;;  %1427 = vmatprep.subr.bf16.mxu1 %v1984_v17  ;;  %v2062_v7 = vld [vmem:[%s2879_s1 + $0x634] ss:$52 sps:$4 sm:$0xff]  }
  0x4c   :  { %1388 = vmatprep.subr.bf16.mxu0 %v1945_v10  ;;  %v2033_v10 = vld [vmem:[%s2879_s1 + $0xf0] ss:$52 sps:$4 sm:$0xff]   ;;  %v2045_v17 = vld [vmem:[%s2879_s1 + $0x1c0] ss:$52 sps:$4 sm:$0xff]  }
  0x4e   :  { %1428 = vmatpush1.bf16.msra.mxu1 %v1982_v20  ;;  %v2053_v20 = vld [vmem:[%s2879_s1 + $0x22c] ss:$52 sps:$4 sm:$0xff]  }
  0x4f   :  { %1389 = vmatpush1.bf16.msra.mxu0 %v1943_v11  ;;  %1429 = vmatprep.subr.bf16.mxu1 %v1990_v21  ;;  %v2068_v11 = vld [vmem:[%s2879_s1 + $0x2c] ss:$52 sps:$4 sm:$0xff]  }
  0x50   :  { %1390 = vmatprep.subr.bf16.mxu0 %v1951_v14  ;;  %v2066_v14 = vld [vmem:[%s2879_s1 + $0x28] ss:$52 sps:$4 sm:$0xff]   ;;  %v2078_v21 = vld [vmem:[%s2879_s1 + $0xf8] ss:$52 sps:$4 sm:$0xff]  }
  0x52   :  { %1430 = vmatpush1.bf16.msra.mxu1 %v1988_v24  ;;  %v2059_v24 = vld [vmem:[%s2879_s1 + $0x294] ss:$52 sps:$4 sm:$0xff]  }
  0x53   :  { %1391 = vmatpush1.bf16.msra.mxu0 %v1949_v15  ;;  %1431 = vmatprep.subr.bf16.mxu1 %v1996_v25  ;;  %v2074_v15 = vld [vmem:[%s2879_s1 + $0x94] ss:$52 sps:$4 sm:$0xff]  }
  0x54   :  { %1392 = vmatprep.subr.bf16.mxu0 %v1957_v18  ;;  %v2072_v18 = vld [vmem:[%s2879_s1 + $0x90] ss:$52 sps:$4 sm:$0xff]   ;;  %v2084_v25 = vld [vmem:[%s2879_s1 + $0x160] ss:$52 sps:$4 sm:$0xff]  }
  0x56   :  { %1432 = vmatpush1.bf16.msra.mxu1 %v1994_v28  ;;  %v2065_v28 = vld [vmem:[%s2879_s1 + $0x2fc] ss:$52 sps:$4 sm:$0xff]  }
  0x57   :  { %1393 = vmatpush1.bf16.msra.mxu0 %v1955_v19  ;;  %1433 = vmatprep.subr.bf16.mxu1 %v2002_v29  ;;  %v2080_v19 = vld [vmem:[%s2879_s1 + $0xfc] ss:$52 sps:$4 sm:$0xff]  }
  0x58   :  { %1394 = vmatprep.subr.bf16.mxu0 %v1963_v22  ;;  %v2051_v22 = vld [vmem:[%s2879_s1 + $0x228] ss:$52 sps:$4 sm:$0xff]  }
  0x59   :  { %v2090_v29 = vld [vmem:[%s2879_s1 + $0x1c8] ss:$52 sps:$4 sm:$0xff]  }
  0x5a   :  { %1434 = vmatpush1.bf16.msra.mxu1 %v2000_v32  ;;  %v2071_v32 = vld [vmem:[%s2879_s1 + $0x364] ss:$52 sps:$4 sm:$0xff]  }
  0x5b   :  { %1395 = vmatpush1.bf16.msra.mxu0 %v1961_v23  ;;  %1435 = vmatprep.subr.bf16.mxu1 %v2008_v34  ;;  %v2086_v23 = vld [vmem:[%s2879_s1 + $0x164] ss:$52 sps:$4 sm:$0xff]  }
  0x5c   :  { %1396 = vmatprep.subr.bf16.mxu0 %v1969_v26  ;;  %v2057_v26 = vld [vmem:[%s2879_s1 + $0x290] ss:$52 sps:$4 sm:$0xff]  }
  0x5d   :  { %v2096_v34 = vld [vmem:[%s2879_s1 + $0x230] ss:$52 sps:$4 sm:$0xff]  }
  0x5e   :  { %1436 = vmatpush1.bf16.msra.mxu1 %v2006_v37  ;;  %v2077_v37 = vld [vmem:[%s2879_s1 + $0x3cc] ss:$52 sps:$4 sm:$0xff]  }
  0x5f   :  { %1397 = vmatpush1.bf16.msra.mxu0 %v1967_v27  ;;  %1437 = vmatprep.subr.bf16.mxu1 %v2014_v38  ;;  %v2092_v27 = vld [vmem:[%s2879_s1 + $0x1cc] ss:$52 sps:$4 sm:$0xff]  }
  0x60   :  { %1398 = vmatprep.subr.bf16.mxu0 %v1975_v30  ;;  %v2063_v30 = vld [vmem:[%s2879_s1 + $0x2f8] ss:$52 sps:$4 sm:$0xff]  }
  0x61   :  { %v2102_v38 = vld [vmem:[%s2879_s1 + $0x298] ss:$52 sps:$4 sm:$0xff]  }
  0x62   :  { %1438 = vmatpush1.bf16.msra.mxu1 %v2012_v41  ;;  %v2083_v41 = vld [vmem:[%s2879_s1 + $0x434] ss:$52 sps:$4 sm:$0xff]  }
  0x63   :  { %1399 = vmatpush1.bf16.msra.mxu0 %v1973_v31  ;;  %1439 = vmatprep.subr.bf16.mxu1 %v2020_v42  ;;  %v2098_v31 = vld [vmem:[%s2879_s1 + $0x234] ss:$52 sps:$4 sm:$0xff]  }
  0x64   :  { %1400 = vmatprep.subr.bf16.mxu0 %v1981_v35  ;;  %v2069_v35 = vld [vmem:[%s2879_s1 + $0x360] ss:$52 sps:$4 sm:$0xff]  }
  0x65   :  { %v2108_v42 = vld [vmem:[%s2879_s1 + $0x300] ss:$52 sps:$4 sm:$0xff]  }
  0x66   :  { %1440 = vmatpush1.bf16.msra.mxu1 %v2018_v45  ;;  %v2089_v45 = vld [vmem:[%s2879_s1 + $0x49c] ss:$52 sps:$4 sm:$0xff]  }
  0x67   :  { %1401 = vmatpush1.bf16.msra.mxu0 %v1979_v36  ;;  %1441 = vmatprep.subr.bf16.mxu1 %v2026_v46  ;;  %v2104_v36 = vld [vmem:[%s2879_s1 + $0x29c] ss:$52 sps:$4 sm:$0xff]  }
  0x68   :  { %1402 = vmatprep.subr.bf16.mxu0 %v1987_v39  ;;  %v2075_v39 = vld [vmem:[%s2879_s1 + $0x3c8] ss:$52 sps:$4 sm:$0xff]  }
  0x69   :  { %v2114_v46 = vld [vmem:[%s2879_s1 + $0x368] ss:$52 sps:$4 sm:$0xff]  }
  0x6a   :  { %1442 = vmatpush1.bf16.msra.mxu1 %v2024_v49  ;;  %v2095_v49 = vld [vmem:[%s2879_s1 + $0x504] ss:$52 sps:$4 sm:$0xff]  }
  0x6b   :  { %1403 = vmatpush1.bf16.msra.mxu0 %v1985_v40  ;;  %1443 = vmatprep.subr.bf16.mxu1 %v2032_v50  ;;  %v2110_v40 = vld [vmem:[%s2879_s1 + $0x304] ss:$52 sps:$4 sm:$0xff]  }
  0x6c   :  { %1404 = vmatprep.subr.bf16.mxu0 %v1993_v43  ;;  %v2081_v43 = vld [vmem:[%s2879_s1 + $0x430] ss:$52 sps:$4 sm:$0xff]  }
  0x6d   :  { %v2119_v50 = vld [vmem:[%s2879_s1 + $0x3d0] ss:$52 sps:$4 sm:$0xff]  }
  0x6e   :  { %1444 = vmatpush1.bf16.msra.mxu1 %v2030_v53  ;;  %v2101_v53 = vld [vmem:[%s2879_s1 + $0x56c] ss:$52 sps:$4 sm:$0xff]  }
  0x6f   :  { %1405 = vmatpush1.bf16.msra.mxu0 %v1991_v44  ;;  %1445 = vmatprep.subr.bf16.mxu1 %v2038_v54  ;;  %v2116_v44 = vld [vmem:[%s2879_s1 + $0x36c] ss:$52 sps:$4 sm:$0xff]  }
  0x70   :  { %1406 = vmatprep.subr.bf16.mxu0 %v1999_v47  ;;  %v2087_v47 = vld [vmem:[%s2879_s1 + $0x498] ss:$52 sps:$4 sm:$0xff]  }
  0x71   :  { %v2124_v54 = vld [vmem:[%s2879_s1 + $0x438] ss:$52 sps:$4 sm:$0xff]  }
  0x72   :  { %1446 = vmatpush1.bf16.msra.mxu1 %v2036_v57  ;;  %v2107_v57 = vld [vmem:[%s2879_s1 + $0x5d4] ss:$52 sps:$4 sm:$0xff]  }
  0x73   :  { %1407 = vmatpush1.bf16.msra.mxu0 %v1997_v48  ;;  %1447 = vmatprep.subr.bf16.mxu1 %v2044_v58  ;;  %v2121_v48 = vld [vmem:[%s2879_s1 + $0x3d4] ss:$52 sps:$4 sm:$0xff]  }
  0x74   :  { %1408 = vmatprep.subr.bf16.mxu0 %v2005_v51  ;;  %v2093_v51 = vld [vmem:[%s2879_s1 + $0x500] ss:$52 sps:$4 sm:$0xff]  }
  0x75   :  { %v2129_v58 = vld [vmem:[%s2879_s1 + $0x4a0] ss:$52 sps:$4 sm:$0xff]  }
  0x76   :  { %1448 = vmatpush1.bf16.msra.mxu1 %v2042_v61  ;;  %v2113_v61 = vld [vmem:[%s2879_s1 + $0x63c] ss:$52 sps:$4 sm:$0xff]  }
  0x77   :  { %1409 = vmatpush1.bf16.msra.mxu0 %v2003_v52  ;;  %1449 = vmatprep.subr.bf16.mxu1 %v2050_v63  ;;  %v2126_v52 = vld [vmem:[%s2879_s1 + $0x43c] ss:$52 sps:$4 sm:$0xff]  }
  0x78   :  { %1410 = vmatprep.subr.bf16.mxu0 %v2011_v55  ;;  %v2099_v55 = vld [vmem:[%s2879_s1 + $0x568] ss:$52 sps:$4 sm:$0xff]  }
  0x79   :  { %v2134_v63 = vld [vmem:[%s2879_s1 + $0x508] ss:$52 sps:$4 sm:$0xff]  }
  0x7a   :  { %1450 = vmatpush1.bf16.msra.mxu1 %v2048_v2  ;;  %v2117_v2 = vld [vmem:[%s2879_s1 + $0x370] ss:$52 sps:$4 sm:$0xff]  }
  0x7b   :  { %1411 = vmatpush1.bf16.msra.mxu0 %v2009_v56  ;;  %1451 = vmatprep.subr.bf16.mxu1 %v2056_v3  ;;  %v2131_v56 = vld [vmem:[%s2879_s1 + $0x4a4] ss:$52 sps:$4 sm:$0xff]  }
  0x7c   :  { %1412 = vmatprep.subr.bf16.mxu0 %v2017_v59  ;;  %v2105_v59 = vld [vmem:[%s2879_s1 + $0x5d0] ss:$52 sps:$4 sm:$0xff]  }
  0x7d   :  { %v2139_v3 = vld [vmem:[%s2879_s1 + $0x570] ss:$52 sps:$4 sm:$0xff]  }
  0x7e   :  { %1452 = vmatpush1.bf16.msra.mxu1 %v2054_v6  ;;  %v2122_v6 = vld [vmem:[%s2879_s1 + $0x3d8] ss:$52 sps:$4 sm:$0xff]  }
  0x7f   :  { %1413 = vmatpush1.bf16.msra.mxu0 %v2015_v60  ;;  %1453 = vmatprep.subr.bf16.mxu1 %v2062_v7  ;;  %v2136_v60 = vld [vmem:[%s2879_s1 + $0x50c] ss:$52 sps:$4 sm:$0xff]  }
  0x80   :  { %1464 = vmatprep.subr.bf16.mxu0 %v2023_v0  ;;  %v2111_v0 = vld [vmem:[%s2879_s1 + $0x638] ss:$52 sps:$4 sm:$0xff]  }
  0x81   :  { %v2144_v7 = vld [vmem:[%s2879_s1 + $0x5d8] ss:$52 sps:$4 sm:$0xff]  }
  0x82   :  { %1415 = vmatmul.mubr.bf16.vlgmr.msra.gmra.mrb[4].mxu0 %v2382_v62  ;;  %1454 = vmatpush1.bf16.msra.mxu1 %v2060_v9  ;;  %v2151_v9 = vld [vmem:[%s2879_s1 + $0x644] ss:$52 sps:$4 sm:$0xff]  }
  0x83   :  { %1465 = vmatpush1.bf16.msra.mxu0 %v2021_v1  ;;  %1496 = vmatprep.mubr.bf16.mxu0 %v2294_v33  ;;  %v2141_v1 = vld [vmem:[%s2879_s1 + $0x574] ss:$52 sps:$4 sm:$0xff]  }
  0x84   :  { %1466 = vmatprep.subr.bf16.mxu0 %v2029_v4  ;;  %1505 = vmatprep.subr.bf16.mxu1 %v2068_v11  ;;  %v2118_v4 = vld [vmem:[%s2879_s1 + $0x30] ss:$52 sps:$4 sm:$0xff]   ;;  %v2149_v11 = vld [vmem:[%s2879_s1 + $0x640] ss:$52 sps:$4 sm:$0xff]  }
  0x85   :  { %1456 = vmatmul.mubr.bf16.vlgmr.msra.gmra.mrb[4].mxu1 %v2382_v62 }
  0x86   :  { %1506 = vmatpush1.bf16.msra.mxu1 %v2066_v14  ;;  %1537 = vmatprep.mubr.bf16.mxu1 %v2294_v33  ;;  %v2137_v14 = vld [vmem:[%s2879_s1 + $0x510] ss:$52 sps:$4 sm:$0xff]  }
  0x87   :  { %1467 = vmatpush1.bf16.msra.mxu0 %v2027_v5  ;;  %1507 = vmatprep.subr.bf16.mxu1 %v2074_v15  ;;  %v2146_v5 = vld [vmem:[%s2879_s1 + $0x5dc] ss:$52 sps:$4 sm:$0xff]  }
  0x88   :  { %1468 = vmatprep.subr.bf16.mxu0 %v2035_v8  ;;  %v2123_v8 = vld [vmem:[%s2879_s1 + $0x98] ss:$52 sps:$4 sm:$0xff]   ;;  %v2138_v15 = vld [vmem:[%s2879_s1 + $0x1d0] ss:$52 sps:$4 sm:$0xff]  }
  0x8a   :  { %1508 = vmatpush1.bf16.msra.mxu1 %v2072_v18  ;;  %v2147_v18 = vld [vmem:[%s2879_s1 + $0x5e0] ss:$52 sps:$4 sm:$0xff]  }
  0x8b   :  { %1469 = vmatpush1.bf16.msra.mxu0 %v2033_v10  ;;  %1509 = vmatprep.subr.bf16.mxu1 %v2080_v19  ;;  %v2127_v10 = vld [vmem:[%s2879_s1 + $0x440] ss:$52 sps:$4 sm:$0xff]  }
  0x8c   :  { %1470 = vmatprep.subr.bf16.mxu0 %v2041_v12  ;;  %v2128_v12 = vld [vmem:[%s2879_s1 + $0x100] ss:$52 sps:$4 sm:$0xff]  }
  0x8d   :  { %v2148_v19 = vld [vmem:[%s2879_s1 + $0x2a0] ss:$52 sps:$4 sm:$0xff]  }
  0x8e   :  { %1510 = vmatpush1.bf16.msra.mxu1 %v2078_v21  ;;  %v2153_v21 = vld [vmem:[%s2879_s1 + $0x308] ss:$52 sps:$4 sm:$0xff]  }
  0x8f   :  { %1471 = vmatpush1.bf16.msra.mxu0 %v2039_v13  ;;  %1511 = vmatprep.subr.bf16.mxu1 %v2086_v23  ;;  %v2132_v13 = vld [vmem:[%s2879_s1 + $0x4a8] ss:$52 sps:$4 sm:$0xff]  }
  0x90   :  { %1472 = vmatprep.subr.bf16.mxu0 %v2047_v16  ;;  %v2142_v16 = vld [vmem:[%s2879_s1 + $0x578] ss:$52 sps:$4 sm:$0xff]  }
  0x92   :  { %1512 = vmatpush1.bf16.msra.mxu1 %v2084_v25 }
  0x93   :  { %1473 = vmatpush1.bf16.msra.mxu0 %v2045_v17  ;;  %1513 = vmatprep.subr.bf16.mxu1 %v2092_v27  ;;  %v2143_v17 = vld [vmem:[%s2879_s1 + $0x238] ss:$52 sps:$4 sm:$0xff]  }
  0x94   :  { %1474 = vmatprep.subr.bf16.mxu0 %v2053_v20  ;;  %v2152_v20 = vld [vmem:[%s2879_s1 + $0x648] ss:$52 sps:$4 sm:$0xff]  }
  0x96   :  { %1514 = vmatpush1.bf16.msra.mxu1 %v2090_v29 }
  0x97   :  { %1475 = vmatpush1.bf16.msra.mxu0 %v2051_v22  ;;  %1515 = vmatprep.subr.bf16.mxu1 %v2098_v31 }
  0x98   :  { %1476 = vmatprep.subr.bf16.mxu0 %v2059_v24 }
  0x9a   :  { %1516 = vmatpush1.bf16.msra.mxu1 %v2096_v34 }
  0x9b   :  { %1477 = vmatpush1.bf16.msra.mxu0 %v2057_v26  ;;  %1517 = vmatprep.subr.bf16.mxu1 %v2104_v36 }
  0x9c   :  { %1478 = vmatprep.subr.bf16.mxu0 %v2065_v28 }
  0x9e   :  { %1518 = vmatpush1.bf16.msra.mxu1 %v2102_v38 }
  0x9f   :  { %1479 = vmatpush1.bf16.msra.mxu0 %v2063_v30  ;;  %1519 = vmatprep.subr.bf16.mxu1 %v2110_v40 }
  0xa0   :  { %1480 = vmatprep.subr.bf16.mxu0 %v2071_v32 }
  0xa2   :  { %1520 = vmatpush1.bf16.msra.mxu1 %v2108_v42 }
  0xa3   :  { %1481 = vmatpush1.bf16.msra.mxu0 %v2069_v35  ;;  %1521 = vmatprep.subr.bf16.mxu1 %v2116_v44 }
  0xa4   :  { %1482 = vmatprep.subr.bf16.mxu0 %v2077_v37 }
  0xa6   :  { %1522 = vmatpush1.bf16.msra.mxu1 %v2114_v46 }
  0xa7   :  { %1483 = vmatpush1.bf16.msra.mxu0 %v2075_v39  ;;  %1523 = vmatprep.subr.bf16.mxu1 %v2121_v48 }
  0xa8   :  { %1484 = vmatprep.subr.bf16.mxu0 %v2083_v41 }
  0xaa   :  { %1524 = vmatpush1.bf16.msra.mxu1 %v2119_v50 }
  0xab   :  { %1485 = vmatpush1.bf16.msra.mxu0 %v2081_v43  ;;  %1525 = vmatprep.subr.bf16.mxu1 %v2126_v52 }
  0xac   :  { %1486 = vmatprep.subr.bf16.mxu0 %v2089_v45 }
  0xae   :  { %1526 = vmatpush1.bf16.msra.mxu1 %v2124_v54 }
  0xaf   :  { %1487 = vmatpush1.bf16.msra.mxu0 %v2087_v47  ;;  %1527 = vmatprep.subr.bf16.mxu1 %v2131_v56 }
  0xb0   :  { %1488 = vmatprep.subr.bf16.mxu0 %v2095_v49 }
  0xb2   :  { %1528 = vmatpush1.bf16.msra.mxu1 %v2129_v58 }
  0xb3   :  { %1489 = vmatpush1.bf16.msra.mxu0 %v2093_v51  ;;  %1529 = vmatprep.subr.bf16.mxu1 %v2136_v60 }
  0xb4   :  { %1490 = vmatprep.subr.bf16.mxu0 %v2101_v53 }
  0xb6   :  { %1530 = vmatpush1.bf16.msra.mxu1 %v2134_v63 }
  0xb7   :  { %1491 = vmatpush1.bf16.msra.mxu0 %v2099_v55  ;;  %1531 = vmatprep.subr.bf16.mxu1 %v2141_v1 }
  0xb8   :  { %1492 = vmatprep.subr.bf16.mxu0 %v2107_v57 }
  0xba   :  { %1532 = vmatpush1.bf16.msra.mxu1 %v2139_v3 }
  0xbb   :  { %1493 = vmatpush1.bf16.msra.mxu0 %v2105_v59  ;;  %1533 = vmatprep.subr.bf16.mxu1 %v2146_v5 }
  0xbc   :  { %1494 = vmatprep.subr.bf16.mxu0 %v2113_v61 }
  0xbe   :  { %1534 = vmatpush1.bf16.msra.mxu1 %v2144_v7 }
  0xbf   :  { %1495 = vmatpush1.bf16.msra.mxu0 %v2111_v0  ;;  %1535 = vmatprep.subr.bf16.mxu1 %v2151_v9 }
  0xc0   :  { %1826 = vmatprep.subr.bf16.mxu0 %v2117_v2 }
  0xc2   :  { %1497 = vmatmul.mubr.bf16.vlgmr.msra.gmra.mrb[8].mxu0 %v2382_v62  ;;  %1536 = vmatpush1.bf16.msra.mxu1 %v2149_v11 }
  0xc3   :  { %1827 = vmatpush3.bf16.msra.mxu0 %v2118_v4  ;;  %1578 = vmatprep.mubr.bf16.mxu0 %v2294_v33  ;;  %v2133_v33 = vld [vmem:[%s2879_s1 + $0x168] ss:$52 sps:$4 sm:$0xff]  }
  0xc4   :  { %1828 = vmatprep.subr.bf16.mxu0 %v2122_v6 }
  0xc5   :  { %1538 = vmatmul.mubr.bf16.vlgmr.msra.gmra.mrb[8].mxu1 %v2382_v62 }
  0xc7   :  { %1829 = vmatpush3.bf16.msra.mxu0 %v2123_v8 }
  0xc8   :  { %1830 = vmatprep.subr.bf16.mxu0 %v2127_v10 }
  0xcb   :  { %1831 = vmatpush3.bf16.msra.mxu0 %v2128_v12 }
  0xcc   :  { %1832 = vmatprep.subr.bf16.mxu0 %v2132_v13 }
  0xcf   :  { %1833 = vmatpush3.bf16.msra.mxu0 %v2133_v33 }
  0xd0   :  { %1834 = vmatprep.subr.bf16.mxu0 %v2137_v14 }
  0xd3   :  { %1835 = vmatpush3.bf16.msra.mxu0 %v2138_v15 }
  0xd4   :  { %1836 = vmatprep.subr.bf16.mxu0 %v2142_v16 }
  0xd7   :  { %1837 = vmatpush3.bf16.msra.mxu0 %v2143_v17 }
  0xd8   :  { %1838 = vmatprep.subr.bf16.mxu0 %v2147_v18 }
  0xdb   :  { %1839 = vmatpush3.bf16.msra.mxu0 %v2148_v19 }
  0xdc   :  { %1840 = vmatprep.subr.bf16.mxu0 %v2152_v20 }
  0xdf   :  { %1841 = vmatpush3.bf16.msra.mxu0 %v2153_v21 }
  0xe2   :  { %1579 = vmatmul.mubr.bf16.vlgmr.msra.gmra.mrb[12].mxu0 %v2382_v62 }
 0x115   :  { %v1334_v22 = vpop.f32.mrb[0].mxu0 }
 0x116   :  { %2154 = vtanh.f32 %v1334_v22  ;;  %v1336_v23 = vpop.f32.mrb[1].mxu0 }
 0x117   :  { %2156 = vtanh.f32 %v1336_v23  ;;  %v1338_v24 = vpop.f32.mrb[2].mxu0 }
 0x118   :  { %v1339_v25 = vpop.f32.mrb[3].mxu0  ;;  %v1375_v27 = vpop.f32.mrb[0].mxu1 }
 0x119   :  { %2158 = vtanh.f32 %v1375_v27  ;;  %v1377_v29 = vpop.f32.mrb[1].mxu1 }
 0x11a   :  { %2160 = vtanh.f32 %v1377_v29  ;;  %v1379_v62 = vpop.f32.mrb[2].mxu1 }
 0x11b   :  { %v1380_v30 = vpop.f32.mrb[3].mxu1 }
 0x120   :  { %v2155_v26 = vpop.eup %2154 }
 0x121   :  { %v2157_v28 = vpop.eup %2156  ;;  %1599 = vst [vmem:[%s2881_s2] sm:$0xff] %v2155_v26 }
 0x122   :  { %1600 = vst [vmem:[%s2881_s2 + $0x8] sm:$0xff] %v2157_v28 }
 0x123   :  { %v2159_v31 = vpop.eup %2158 }
 0x124   :  { %v2161_v32 = vpop.eup %2160  ;;  %1601 = vst [vmem:[%s2881_s2 + $0x10] sm:$0xff] %v2159_v31 }
 0x125   :  { %1602 = vst [vmem:[%s2881_s2 + $0x18] sm:$0xff] %v2161_v32 }
 0x155   :  { %v1416_v34 = vpop.f32.mrb[4].mxu0 }
 0x156   :  { %2162 = vtanh.f32 %v1416_v34  ;;  %v1418_v35 = vpop.f32.mrb[5].mxu0 }
 0x157   :  { %2164 = vtanh.f32 %v1418_v35  ;;  %v1420_v36 = vpop.f32.mrb[6].mxu0 }
 0x158   :  { %v1421_v37 = vpop.f32.mrb[7].mxu0  ;;  %v1457_v39 = vpop.f32.mrb[4].mxu1 }
 0x159   :  { %2166 = vtanh.f32 %v1457_v39  ;;  %v1459_v41 = vpop.f32.mrb[5].mxu1 }
 0x15a   :  { %2168 = vtanh.f32 %v1459_v41  ;;  %v1461_v42 = vpop.f32.mrb[6].mxu1 }
 0x15b   :  { %v1462_v43 = vpop.f32.mrb[7].mxu1 }
 0x160   :  { %v2163_v38 = vpop.eup %2162 }
 0x161   :  { %v2165_v40 = vpop.eup %2164  ;;  %1603 = vst [vmem:[%s2881_s2 + $0x20] sm:$0xff] %v2163_v38 }
 0x162   :  { %1604 = vst [vmem:[%s2881_s2 + $0x28] sm:$0xff] %v2165_v40 }
 0x163   :  { %v2167_v44 = vpop.eup %2166 }
 0x164   :  { %v2169_v45 = vpop.eup %2168  ;;  %1605 = vst [vmem:[%s2881_s2 + $0x30] sm:$0xff] %v2167_v44 }
 0x165   :  { %1606 = vst [vmem:[%s2881_s2 + $0x38] sm:$0xff] %v2169_v45 }
 0x195   :  { %v1498_v46 = vpop.f32.mrb[8].mxu0 }
 0x196   :  { %2170 = vtanh.f32 %v1498_v46  ;;  %v1500_v47 = vpop.f32.mrb[9].mxu0 }
 0x197   :  { %2172 = vtanh.f32 %v1500_v47  ;;  %v1502_v48 = vpop.f32.mrb[10].mxu0 }
 0x198   :  { %v1503_v49 = vpop.f32.mrb[11].mxu0  ;;  %v1539_v51 = vpop.f32.mrb[8].mxu1 }
 0x199   :  { %2174 = vtanh.f32 %v1539_v51  ;;  %v1541_v53 = vpop.f32.mrb[9].mxu1 }
 0x19a   :  { %2176 = vtanh.f32 %v1541_v53  ;;  %v1543_v54 = vpop.f32.mrb[10].mxu1 }
 0x19b   :  { %v1544_v55 = vpop.f32.mrb[11].mxu1 }
 0x1a0   :  { %v2171_v50 = vpop.eup %2170 }
 0x1a1   :  { %v2173_v52 = vpop.eup %2172  ;;  %1607 = vst [vmem:[%s2881_s2 + $0x40] sm:$0xff] %v2171_v50 }
 0x1a2   :  { %1608 = vst [vmem:[%s2881_s2 + $0x48] sm:$0xff] %v2173_v52 }
 0x1a3   :  { %v2175_v56 = vpop.eup %2174 }
 0x1a4   :  { %v2177_v57 = vpop.eup %2176  ;;  %1609 = vst [vmem:[%s2881_s2 + $0x50] sm:$0xff] %v2175_v56 }
 0x1a5   :  { %1610 = vst [vmem:[%s2881_s2 + $0x58] sm:$0xff] %v2177_v57 }
 0x1b5   :  { %v1842_v58 = vpop.f32.mrb[12].mxu0 }
 0x1b6   :  { %v1843_v59 = vpop.f32.mrb[13].mxu0 }
 0x1b7   :  { %v1844_v60 = vadd.f32 %v1843_v59, %v1842_v58  ;;  %v1845_v61 = vpop.f32.mrb[14].mxu0 }
 0x1b8   :  { %v1846_v63 = vpop.f32.mrb[15].mxu0 }
 0x1b9   :  { %2178 = vtanh.f32 %v1844_v60 }
 0x1c3   :  { %v2179_v0 = vpop.eup %2178 }
 0x1c4   :  { %1611 = vst [vmem:[%s2881_s2 + $0x60] sm:$0xff] %v2179_v0 }

</bundles_post_ra>
